<compile_context>
chip_gen: v7x
topology: tpu7x:2x2x1
jax: 0.10.0
libtpu: 0.0.40
codegen_flags: <defaults>
</compile_context>

<pallas_src>
import functools

import numpy as np
import jax
import jax.numpy as jnp
from jax.experimental import pallas as pl
from jax.experimental.pallas import tpu as pltpu


# --------------------------------------------------------------------------
# One fused kernel for ALL diffusion steps x batch.
# grid = (n_steps, N); one (step, image) pair per grid step:
#   q_sample -> input conv -> ONE wide matmul (mid conv + all decoder skip
#   halves) -> decoder blocks (SiLU), storing only hooked activations.
# Activations live in the lane-dense (H, W*C) row layout; 3x3 convs are banded
# matmuls so no im2col relayout / halo scratch / masked stores are needed.
# --------------------------------------------------------------------------
def _unet_all_steps_kernel(coef_ref,            # SMEM (n_steps, 2) f32: [sqrt_ac, sqrt_1mac]
                           x_ref, noise_ref,    # (1, H, W*cin_p) f32
                           w_in_ref, b_in_ref,  # (3*W*cin_p, W*C) bf16, (1, W*C) f32
                           w_h0_ref, b_h0_ref,  # (3*W*C, (1+n)*W*C) bf16, (1, 1, (1+n)*W*C) f32
                           w_dec_ref,           # (n_blocks, 3*W*C, W*C) bf16
                           act_ref,             # out: (1, n_hooked, 1, H, W*c_act) f32
                           *, H, W, C, n_blocks, hooked, input_activations):
    s = pl.program_id(0)
    WC = W * C
    bf = jnp.bfloat16

    def cat3(rows):
        # (H, K) f32 -> (H, 3K) bf16 = [row y-1 | row y | row y+1], zeros at borders.
        r = rows.astype(bf)
        z = jnp.zeros((1, r.shape[1]), bf)
        up = jnp.concatenate([z, r[:H - 1]], axis=0)   # row y holds input row y-1
        dn = jnp.concatenate([r[1:], z], axis=0)       # row y holds input row y+1
        return jnp.concatenate([up, r, dn], axis=1)

    # ---- q_sample fused (f32): noisy = sqrt_ac[t] * x + sqrt_1mac[t] * noise ----
    c0 = coef_ref[s, 0]
    c1 = coef_ref[s, 1]
    noisy = c0 * x_ref[0] + c1 * noise_ref[0]                              # (H, W*cin_p)

    # ---- input conv (banded matmul; no temb / SiLU in the toy stand-in) ----
    h0 = jnp.dot(cat3(noisy), w_in_ref[...],
                 preferred_element_type=jnp.float32) + b_in_ref[...]       # (H, W*C)

    # ---- ONE wide matmul for the whole h0 path: mid conv + every decoder
    #      skip-half; per-step temb is already folded into b_h0's columns. ----
    dec_all = jnp.dot(cat3(h0), w_h0_ref[...],
                      preferred_element_type=jnp.float32) + b_h0_ref[0]    # (H, (1+n)*W*C)

    h = dec_all[:, :WC]                   # mid conv output (+bias +temb)
    h = h * jax.nn.sigmoid(h)             # SiLU

    # ---- decoder output blocks with forward "hooks" (lane-dense stores) ----
    slot = 0
    for i in range(n_blocks):
        if input_activations and (i in hooked):
            act_ref[0, slot, 0] = jnp.concatenate([h, h0], axis=1)         # (H, 2*W*C)
            slot += 1
        out = (jnp.dot(cat3(h), w_dec_ref[i], preferred_element_type=jnp.float32)
               + dec_all[:, (i + 1) * WC:(i + 2) * WC])   # skip half + bias + temb
        out = out * jax.nn.sigmoid(out)
        if (not input_activations) and (i in hooked):
            act_ref[0, slot, 0] = out                                      # (H, W*C)
            slot += 1
        h = out


# --------------------------------------------------------------------------
# Diffusion schedule (guided-diffusion linear betas)
# --------------------------------------------------------------------------
def make_linear_schedule(num_timesteps):
    scale = 1000.0 / num_timesteps
    betas = np.linspace(scale * 1e-4, scale * 2e-2, num_timesteps, dtype=np.float64)
    alphas_cumprod = np.cumprod(1.0 - betas)
    return np.sqrt(alphas_cumprod), np.sqrt(1.0 - alphas_cumprod)


# --------------------------------------------------------------------------
# Deterministic synthetic parameters (shapes implied by the toy UNet)
# --------------------------------------------------------------------------
def init_params(key, in_channels, model_ch, emb_ch, n_out_blocks):
    keys = iter(jax.random.split(key, 8 + 4 * n_out_blocks))

    def nrm(shape, scale=0.05):
        return scale * jax.random.normal(next(keys), shape, jnp.float32)

    p = {
        "temb_w1": nrm((model_ch, emb_ch)), "temb_b1": jnp.zeros((1, emb_ch), jnp.float32),
        "temb_w2": nrm((emb_ch, emb_ch)),   "temb_b2": jnp.zeros((1, emb_ch), jnp.float32),
        "in_w": nrm((3, 3, in_channels, model_ch)), "in_b": jnp.zeros((model_ch,), jnp.float32),
        "mid_w": nrm((3, 3, model_ch, model_ch)),   "mid_b": jnp.zeros((model_ch,), jnp.float32),
        "mid_tw": nrm((emb_ch, model_ch)),          "mid_tb": jnp.zeros((1, model_ch), jnp.float32),
        "out": [],
    }
    for _ in range(n_out_blocks):
        p["out"].append(dict(
            w=nrm((3, 3, 2 * model_ch, model_ch)), b=jnp.zeros((model_ch,), jnp.float32),
            tw=nrm((emb_ch, model_ch)),            tb=jnp.zeros((1, model_ch), jnp.float32)))
    return p


def pack_params(raw, cin, cin_p, C, W):
    """Pack conv weights as banded row-conv matrices for the lane-dense (H, W*C)
    layout: BW[dy*W*Cin + xi*Cin + c, xo*Cout + co] = w[dy, xi-xo+1, c, co]."""
    def band(w, Cin, Cout):
        w = np.asarray(w, np.float32)                       # (3, 3, Cin, Cout)
        bw = np.zeros((3, W * Cin, W * Cout), np.float32)
        for xo in range(W):
            for dx in range(3):
                xi = xo + dx - 1
                if 0 <= xi < W:
                    bw[:, xi * Cin:(xi + 1) * Cin, xo * Cout:(xo + 1) * Cout] = w[:, dx]
        return bw.reshape(3 * W * Cin, W * Cout)

    w_in = np.asarray(raw["in_w"], np.float32)
    if cin_p != cin:                                        # zero rows for padded channels
        w_in = np.pad(w_in, ((0, 0), (0, 0), (0, cin_p - cin), (0, 0)))

    # Merged h0-path weight: output columns = [mid | dec0_h0 | dec1_h0 | ...].
    # Decoder input is cat([h, h0]) on channels, so the skip half is w[:, :, C:, :].
    w_h0_parts = [band(np.asarray(raw["mid_w"], np.float32), C, C)]
    w_dec_parts = []
    for b in raw["out"]:
        w = np.asarray(b["w"], np.float32)                  # (3, 3, 2C, C)
        w_dec_parts.append(band(w[:, :, :C, :], C, C))
        w_h0_parts.append(band(w[:, :, C:, :], C, C))

    return dict(
        w_in=jnp.asarray(band(w_in, cin_p, C), jnp.bfloat16),
        b_in=jnp.asarray(np.tile(np.asarray(raw["in_b"], np.float32), W)[None, :]),
        w_h0=jnp.asarray(np.concatenate(w_h0_parts, axis=1), jnp.bfloat16),
        w_dec=jnp.asarray(np.stack(w_dec_parts, axis=0), jnp.bfloat16),
        b_mid=jnp.asarray(raw["mid_b"], jnp.float32),
        b_dec=jnp.stack([jnp.asarray(b["b"], jnp.float32) for b in raw["out"]]),
        temb_w1=raw["temb_w1"], temb_b1=raw["temb_b1"],
        temb_w2=raw["temb_w2"], temb_b2=raw["temb_b2"],
        # stacked temb projections: [mid, out_0, ..., out_{n-1}]
        wproj=jnp.concatenate([raw["mid_tw"]] + [b["tw"] for b in raw["out"]], axis=1),
        bproj=jnp.concatenate([raw["mid_tb"]] + [b["tb"] for b in raw["out"]], axis=1),
    )


# --------------------------------------------------------------------------
# Build a fully-jitted forward for a fixed (steps, blocks, H, W) configuration
# --------------------------------------------------------------------------
def _build_forward(*, raw_params, steps, sqrt_ac, sqrt_1mac, num_timesteps, blocks,
                   input_activations, in_channels, model_ch, emb_ch, n_out_blocks, H, W):
    C = model_ch
    cin = in_channels
    cin_p = -(-cin // 8) * 8
    hooked = tuple(sorted({b for b in blocks if 0 <= b < n_out_blocks}))
    n_hooked = len(hooked)
    c_act = 2 * C if input_activations else C
    n_b = n_out_blocks
    S = len(steps)
    WC = W * C

    packed = pack_params(raw_params, cin, cin_p, C, W)

    # Per-step q_sample coefficients (static schedule) -> SMEM table.
    coefs = jnp.asarray(
        np.stack([np.asarray([sqrt_ac[t] for t in steps], np.float32),
                  np.asarray([sqrt_1mac[t] for t in steps], np.float32)], axis=1))
    t_scaled = jnp.asarray([t * 1000.0 / num_timesteps for t in steps], jnp.float32)

    kernel = functools.partial(
        _unet_all_steps_kernel, H=H, W=W, C=C, n_blocks=n_b, hooked=hooked,
        input_activations=input_activations)

    def fwd(params, x_nchw, noise_nchw):
        # NCHW -> lane-dense (N, H, W*cin_p) once per forward.
        def to_dense(a):
            a = jnp.transpose(a, (0, 2, 3, 1)).astype(jnp.float32)
            if cin_p != cin:
                a = jnp.pad(a, ((0, 0), (0, 0), (0, 0), (0, cin_p - cin)))
            return a.reshape(a.shape[0], H, W * cin_p)

        x = to_dense(x_nchw)
        noise = to_dense(noise_nchw)
        N = x.shape[0]

        # ---- timestep-embedding MLP + all per-block projections (plain XLA,
        #      tiny); folded into the per-step bias table of the merged dot ----
        half = model_ch // 2
        freqs = jnp.exp(-jnp.log(10000.0) * jnp.arange(half, dtype=jnp.float32) / half)
        args = t_scaled[:, None] * freqs[None, :]
        emb = jnp.concatenate([jnp.cos(args), jnp.sin(args)], axis=-1)     # (S, model_ch)
        e = emb @ params["temb_w1"] + params["temb_b1"]
        e = e * jax.nn.sigmoid(e)
        e = e @ params["temb_w2"] + params["temb_b2"]
        proj = e @ params["wproj"] + params["bproj"]                       # (S, (1+n)*C)
        base = jnp.concatenate([params["b_mid"][None, :], params["b_dec"]], axis=0)
        eff = base[None] + proj.reshape(S, 1 + n_b, C)                     # (S, 1+n, C)
        b_h0_eff = jnp.tile(eff, (1, 1, W)).reshape(S, 1, (1 + n_b) * WC)  # per-step bias

        acts = pl.pallas_call(
            kernel,
            out_shape=jax.ShapeDtypeStruct((S, n_hooked, N, H, W * c_act), jnp.float32),
            grid=(S, N),
            in_specs=[
                pl.BlockSpec(memory_space=pltpu.MemorySpace.SMEM),              # coefs
                pl.BlockSpec((1, H, W * cin_p), lambda s, n: (n, 0, 0)),        # x
                pl.BlockSpec((1, H, W * cin_p), lambda s, n: (n, 0, 0)),        # noise
                pl.BlockSpec((3 * W * cin_p, WC), lambda s, n: (0, 0)),         # w_in (banded)
                pl.BlockSpec((1, WC), lambda s, n: (0, 0)),                     # b_in
                pl.BlockSpec((3 * WC, (1 + n_b) * WC), lambda s, n: (0, 0)),    # w_h0 merged
                pl.BlockSpec((1, 1, (1 + n_b) * WC), lambda s, n: (s, 0, 0)),   # per-step bias
                pl.BlockSpec((n_b, 3 * WC, WC), lambda s, n: (0, 0, 0)),        # w_dec (banded)
            ],
            out_specs=pl.BlockSpec((1, n_hooked, 1, H, W * c_act),
                                   lambda s, n: (s, 0, n, 0, 0)),
            compiler_params=pltpu.CompilerParams(
                dimension_semantics=("parallel", "parallel")),
        )(coefs, x, noise, params["w_in"], params["b_in"], params["w_h0"],
          b_h0_eff, params["w_dec"])

        # lane-dense slabs -> NCHW float32 (save_tensors' .detach().float()),
        # list order: step-major, hooked-block-index minor (matches PyTorch loop).
        outs = []
        for si in range(S):
            for k in range(n_hooked):
                slab = acts[si, k]                                   # (N, H, W*c_act)
                if input_activations:
                    a = slab.reshape(N, H, 2, W, C)                  # lanes = [h | h0]
                    a = jnp.transpose(a, (0, 2, 4, 1, 3)).reshape(N, 2 * C, H, W)
                else:
                    a = slab.reshape(N, H, W, C)
                    a = jnp.transpose(a, (0, 3, 1, 2))
                outs.append(a)
        return tuple(outs)

    return jax.jit(fwd), packed


# --------------------------------------------------------------------------
# FeatureExtractorDDPM equivalent
# --------------------------------------------------------------------------
class FeatureExtractorDDPM:
    def __init__(self, input_activations, steps, blocks, *, num_timesteps=100,
                 in_channels=4, model_ch=16, emb_ch=32, n_out_blocks=3, key=None):
        self.input_activations = bool(input_activations)
        self.steps = list(steps)
        self.blocks = list(blocks)
        self.num_timesteps = num_timesteps
        self.sqrt_ac, self.sqrt_1mac = make_linear_schedule(num_timesteps)
        self.model_ch = model_ch
        self.emb_ch = emb_ch
        self.in_channels = in_channels
        self.n_out_blocks = n_out_blocks
        self.n_hooked = len({b for b in blocks if 0 <= b < n_out_blocks})
        self.raw_params = init_params(key if key is not None else jax.random.PRNGKey(42),
                                      in_channels, model_ch, emb_ch, n_out_blocks)
        self._cache = {}

    def _get_fwd(self, H, W):
        if (H, W) not in self._cache:
            self._cache[(H, W)] = _build_forward(
                raw_params=self.raw_params, steps=self.steps, sqrt_ac=self.sqrt_ac,
                sqrt_1mac=self.sqrt_1mac, num_timesteps=self.num_timesteps,
                blocks=self.blocks, input_activations=self.input_activations,
                in_channels=self.in_channels, model_ch=self.model_ch,
                emb_ch=self.emb_ch, n_out_blocks=self.n_out_blocks, H=H, W=W)
        return self._cache[(H, W)]

    def forward(self, x_nchw, noise=None):
        # TODO(synk): original draws fresh gaussian noise when noise is None; we
        # use deterministic zeros for reproducibility.
        if noise is None:
            noise = jnp.zeros_like(x_nchw)
        if self.n_hooked == 0 or not self.steps:
            return []
        H, W = int(x_nchw.shape[2]), int(x_nchw.shape[3])
        fwd, packed = self._get_fwd(H, W)
        return list(fwd(packed, x_nchw, noise))

    __call__ = forward


if __name__ == "__main__":
    key = jax.random.PRNGKey(0)
    kx, kn = jax.random.split(key)
    x = jax.random.normal(kx, (2, 4, 16, 16), jnp.float32)       # NCHW like PyTorch
    noise = jax.random.normal(kn, (2, 4, 16, 16), jnp.float32)

    extractor = FeatureExtractorDDPM(
        input_activations=False, steps=[10, 50], blocks=[0, 2],
        num_timesteps=100, in_channels=4, model_ch=16, emb_ch=32,
        n_out_blocks=3, key=jax.random.PRNGKey(42))

    acts = extractor(x, noise=noise)
    acts = [jax.block_until_ready(a) for a in acts]

    assert len(acts) == len(extractor.steps) * len(extractor.blocks)
    for a in acts:
        assert a.shape == (2, 16, 16, 16) and a.dtype == jnp.float32
        assert bool(jnp.all(jnp.isfinite(a)))
    print("KERNEL_OK")
</pallas_src>

<mosaic_0001>
module attributes {stable_mosaic.version = 11 : i64} {
  func.func @_unet_all_steps_kernel(%arg0: i32, %arg1: i32, %arg2: memref<2x2xf32, #tpu.memory_space<smem>>, %arg3: memref<1x16x128xf32, #tpu.memory_space<vmem>>, %arg4: memref<1x16x128xf32, #tpu.memory_space<vmem>>, %arg5: memref<384x256xbf16, #tpu.memory_space<vmem>>, %arg6: memref<1x256xf32, #tpu.memory_space<vmem>>, %arg7: memref<768x1024xbf16, #tpu.memory_space<vmem>>, %arg8: memref<1x1x1024xf32, #tpu.memory_space<vmem>>, %arg9: memref<3x768x256xbf16, #tpu.memory_space<vmem>>, %arg10: memref<1x2x1x16x256xf32, #tpu.memory_space<vmem>>) attributes {dimension_semantics = [#tpu.dimension_semantics<parallel>, #tpu.dimension_semantics<parallel>], iteration_bounds = array<i64: 2, 2>, scalar_prefetch = 0 : i64, scratch_operands = 0 : i64, tpu.core_type = #tpu.core_type<tc>, window_params = [{transform_indices = @transform_0, window_bounds = array<i64: 2, 2>}, {transform_indices = @transform_1, window_bounds = array<i64: 1, 16, 128>}, {transform_indices = @transform_2, window_bounds = array<i64: 1, 16, 128>}, {pipeline_mode = #tpu.pipeline_mode<synchronous>, transform_indices = @transform_3, window_bounds = array<i64: 384, 256>}, {pipeline_mode = #tpu.pipeline_mode<synchronous>, transform_indices = @transform_4, window_bounds = array<i64: 1, 256>}, {pipeline_mode = #tpu.pipeline_mode<synchronous>, transform_indices = @transform_5, window_bounds = array<i64: 768, 1024>}, {transform_indices = @transform_6, window_bounds = array<i64: 1, 1, 1024>}, {pipeline_mode = #tpu.pipeline_mode<synchronous>, transform_indices = @transform_7, window_bounds = array<i64: 3, 768, 256>}, {transform_indices = @transform_8, window_bounds = array<i64: 1, 2, 1, 16, 256>}]} {
    %0 = arith.index_cast %arg0 : i32 to index
    %c0 = arith.constant 0 : index
    %1 = memref.load %arg2[%0, %c0] : memref<2x2xf32, #tpu.memory_space<smem>>
    %2 = arith.index_cast %arg0 : i32 to index
    %c1 = arith.constant 1 : index
    %3 = memref.load %arg2[%2, %c1] : memref<2x2xf32, #tpu.memory_space<smem>>
    %c0_0 = arith.constant 0 : index
    %c0_1 = arith.constant 0 : index
    %c0_2 = arith.constant 0 : index
    %4 = vector.load %arg3[%c0_0, %c0_1, %c0_2] : memref<1x16x128xf32, #tpu.memory_space<vmem>>, vector<1x16x128xf32>
    %5 = vector.shape_cast %4 : vector<1x16x128xf32> to vector<16x128xf32>
    %6 = vector.broadcast %1 : f32 to vector<16x128xf32>
    %7 = arith.mulf %6, %5 : vector<16x128xf32>
    %c0_3 = arith.constant 0 : index
    %c0_4 = arith.constant 0 : index
    %c0_5 = arith.constant 0 : index
    %8 = vector.load %arg4[%c0_3, %c0_4, %c0_5] : memref<1x16x128xf32, #tpu.memory_space<vmem>>, vector<1x16x128xf32>
    %9 = vector.shape_cast %8 : vector<1x16x128xf32> to vector<16x128xf32>
    %10 = vector.broadcast %3 : f32 to vector<16x128xf32>
    %11 = arith.mulf %10, %9 : vector<16x128xf32>
    %12 = arith.addf %7, %11 : vector<16x128xf32>
    %13 = arith.truncf %12 : vector<16x128xf32> to vector<16x128xbf16>
    %cst = arith.constant 0.000000e+00 : bf16
    %14 = vector.broadcast %cst : bf16 to vector<1x128xbf16>
    %15 = vector.extract_strided_slice %13 {offsets = [0, 0], sizes = [15, 128], strides = [1, 1]} : vector<16x128xbf16> to vector<15x128xbf16>
    %16 = tpu.concatenate %14, %15 in 0 : vector<1x128xbf16>, vector<15x128xbf16> -> vector<16x128xbf16>
    %17 = vector.extract_strided_slice %13 {offsets = [1, 0], sizes = [15, 128], strides = [1, 1]} : vector<16x128xbf16> to vector<15x128xbf16>
    %18 = tpu.concatenate %17, %14 in 0 : vector<15x128xbf16>, vector<1x128xbf16> -> vector<16x128xbf16>
    %19 = tpu.concatenate %16, %13, %18 in 1 : vector<16x128xbf16>, vector<16x128xbf16>, vector<16x128xbf16> -> vector<16x384xbf16>
    %c0_6 = arith.constant 0 : index
    %c0_7 = arith.constant 0 : index
    %20 = vector.load %arg5[%c0_6, %c0_7] : memref<384x256xbf16, #tpu.memory_space<vmem>>, vector<384x256xbf16>
    %cst_8 = arith.constant dense<0.000000e+00> : vector<16x256xf32>
    %21 = tpu.matmul %19, %20, %cst_8 {dimension_numbers = #tpu.dot_dimension_numbers<[1], [0], [0], [1], [0, 0, 1, 1], [], []>} : vector<16x384xbf16>, vector<384x256xbf16>, vector<16x256xf32> -> vector<16x256xf32>
    %c0_9 = arith.constant 0 : index
    %c0_10 = arith.constant 0 : index
    %22 = vector.load %arg6[%c0_9, %c0_10] : memref<1x256xf32, #tpu.memory_space<vmem>>, vector<1x256xf32>
    %23 = vector.broadcast %22 : vector<1x256xf32> to vector<16x256xf32>
    %24 = arith.addf %21, %23 : vector<16x256xf32>
    %25 = arith.truncf %24 : vector<16x256xf32> to vector<16x256xbf16>
    %cst_11 = arith.constant 0.000000e+00 : bf16
    %26 = vector.broadcast %cst_11 : bf16 to vector<1x256xbf16>
    %27 = vector.extract_strided_slice %25 {offsets = [0, 0], sizes = [15, 256], strides = [1, 1]} : vector<16x256xbf16> to vector<15x256xbf16>
    %28 = tpu.concatenate %26, %27 in 0 : vector<1x256xbf16>, vector<15x256xbf16> -> vector<16x256xbf16>
    %29 = vector.extract_strided_slice %25 {offsets = [1, 0], sizes = [15, 256], strides = [1, 1]} : vector<16x256xbf16> to vector<15x256xbf16>
    %30 = tpu.concatenate %29, %26 in 0 : vector<15x256xbf16>, vector<1x256xbf16> -> vector<16x256xbf16>
    %31 = tpu.concatenate %28, %25, %30 in 1 : vector<16x256xbf16>, vector<16x256xbf16>, vector<16x256xbf16> -> vector<16x768xbf16>
    %c0_12 = arith.constant 0 : index
    %c0_13 = arith.constant 0 : index
    %32 = vector.load %arg7[%c0_12, %c0_13] : memref<768x1024xbf16, #tpu.memory_space<vmem>>, vector<768x1024xbf16>
    %cst_14 = arith.constant dense<0.000000e+00> : vector<16x1024xf32>
    %33 = tpu.matmul %31, %32, %cst_14 {dimension_numbers = #tpu.dot_dimension_numbers<[1], [0], [0], [1], [0, 0, 1, 1], [], []>} : vector<16x768xbf16>, vector<768x1024xbf16>, vector<16x1024xf32> -> vector<16x1024xf32>
    %c0_15 = arith.constant 0 : index
    %c0_16 = arith.constant 0 : index
    %c0_17 = arith.constant 0 : index
    %34 = vector.load %arg8[%c0_15, %c0_16, %c0_17] : memref<1x1x1024xf32, #tpu.memory_space<vmem>>, vector<1x1x1024xf32>
    %35 = vector.shape_cast %34 : vector<1x1x1024xf32> to vector<1x1024xf32>
    %36 = vector.broadcast %35 : vector<1x1024xf32> to vector<16x1024xf32>
    %37 = arith.addf %33, %36 : vector<16x1024xf32>
    %38 = vector.extract_strided_slice %37 {offsets = [0, 0], sizes = [16, 256], strides = [1, 1]} : vector<16x1024xf32> to vector<16x256xf32>
    %39 = arith.negf %38 : vector<16x256xf32>
    %40 = math.exp %39 : vector<16x256xf32>
    %cst_18 = arith.constant 1.000000e+00 : f32
    %41 = vector.broadcast %cst_18 : f32 to vector<16x256xf32>
    %42 = arith.addf %41, %40 : vector<16x256xf32>
    %43 = arith.divf %41, %42 : vector<16x256xf32>
    %44 = arith.mulf %38, %43 : vector<16x256xf32>
    %45 = arith.truncf %44 : vector<16x256xf32> to vector<16x256xbf16>
    %cst_19 = arith.constant 0.000000e+00 : bf16
    %46 = vector.broadcast %cst_19 : bf16 to vector<1x256xbf16>
    %47 = vector.extract_strided_slice %45 {offsets = [0, 0], sizes = [15, 256], strides = [1, 1]} : vector<16x256xbf16> to vector<15x256xbf16>
    %48 = tpu.concatenate %46, %47 in 0 : vector<1x256xbf16>, vector<15x256xbf16> -> vector<16x256xbf16>
    %49 = vector.extract_strided_slice %45 {offsets = [1, 0], sizes = [15, 256], strides = [1, 1]} : vector<16x256xbf16> to vector<15x256xbf16>
    %50 = tpu.concatenate %49, %46 in 0 : vector<15x256xbf16>, vector<1x256xbf16> -> vector<16x256xbf16>
    %51 = tpu.concatenate %48, %45, %50 in 1 : vector<16x256xbf16>, vector<16x256xbf16>, vector<16x256xbf16> -> vector<16x768xbf16>
    %c0_20 = arith.constant 0 : index
    %c0_21 = arith.constant 0 : index
    %c0_22 = arith.constant 0 : index
    %52 = vector.load %arg9[%c0_20, %c0_21, %c0_22] : memref<3x768x256xbf16, #tpu.memory_space<vmem>>, vector<1x768x256xbf16>
    %53 = vector.shape_cast %52 : vector<1x768x256xbf16> to vector<768x256xbf16>
    %cst_23 = arith.constant dense<0.000000e+00> : vector<16x256xf32>
    %54 = tpu.matmul %51, %53, %cst_23 {dimension_numbers = #tpu.dot_dimension_numbers<[1], [0], [0], [1], [0, 0, 1, 1], [], []>} : vector<16x768xbf16>, vector<768x256xbf16>, vector<16x256xf32> -> vector<16x256xf32>
    %55 = vector.extract_strided_slice %37 {offsets = [0, 256], sizes = [16, 256], strides = [1, 1]} : vector<16x1024xf32> to vector<16x256xf32>
    %56 = arith.addf %54, %55 : vector<16x256xf32>
    %57 = arith.negf %56 : vector<16x256xf32>
    %58 = math.exp %57 : vector<16x256xf32>
    %cst_24 = arith.constant 1.000000e+00 : f32
    %59 = vector.broadcast %cst_24 : f32 to vector<16x256xf32>
    %60 = arith.addf %59, %58 : vector<16x256xf32>
    %61 = arith.divf %59, %60 : vector<16x256xf32>
    %62 = arith.mulf %56, %61 : vector<16x256xf32>
    %c0_25 = arith.constant 0 : index
    %c0_26 = arith.constant 0 : index
    %c0_27 = arith.constant 0 : index
    %c0_28 = arith.constant 0 : index
    %c0_29 = arith.constant 0 : index
    %63 = vector.load %arg10[%c0_25, %c0_26, %c0_27, %c0_28, %c0_29] : memref<1x2x1x16x256xf32, #tpu.memory_space<vmem>>, vector<1x1x1x16x256xf32>
    %64 = vector.shape_cast %63 : vector<1x1x1x16x256xf32> to vector<16x256xf32>
    %65 = vector.shape_cast %62 : vector<16x256xf32> to vector<1x1x1x16x256xf32>
    tpu.vector_store %arg10[%c0_25, %c0_26, %c0_27, %c0_28, %c0_29], %65 {strides = array<i32>} : memref<1x2x1x16x256xf32, #tpu.memory_space<vmem>>, vector<1x1x1x16x256xf32>,
    %66 = arith.truncf %62 : vector<16x256xf32> to vector<16x256xbf16>
    %cst_30 = arith.constant 0.000000e+00 : bf16
    %67 = vector.broadcast %cst_30 : bf16 to vector<1x256xbf16>
    %68 = vector.extract_strided_slice %66 {offsets = [0, 0], sizes = [15, 256], strides = [1, 1]} : vector<16x256xbf16> to vector<15x256xbf16>
    %69 = tpu.concatenate %67, %68 in 0 : vector<1x256xbf16>, vector<15x256xbf16> -> vector<16x256xbf16>
    %70 = vector.extract_strided_slice %66 {offsets = [1, 0], sizes = [15, 256], strides = [1, 1]} : vector<16x256xbf16> to vector<15x256xbf16>
    %71 = tpu.concatenate %70, %67 in 0 : vector<15x256xbf16>, vector<1x256xbf16> -> vector<16x256xbf16>
    %72 = tpu.concatenate %69, %66, %71 in 1 : vector<16x256xbf16>, vector<16x256xbf16>, vector<16x256xbf16> -> vector<16x768xbf16>
    %c1_31 = arith.constant 1 : index
    %c0_32 = arith.constant 0 : index
    %c0_33 = arith.constant 0 : index
    %73 = vector.load %arg9[%c1_31, %c0_32, %c0_33] : memref<3x768x256xbf16, #tpu.memory_space<vmem>>, vector<1x768x256xbf16>
    %74 = vector.shape_cast %73 : vector<1x768x256xbf16> to vector<768x256xbf16>
    %cst_34 = arith.constant dense<0.000000e+00> : vector<16x256xf32>
    %75 = tpu.matmul %72, %74, %cst_34 {dimension_numbers = #tpu.dot_dimension_numbers<[1], [0], [0], [1], [0, 0, 1, 1], [], []>} : vector<16x768xbf16>, vector<768x256xbf16>, vector<16x256xf32> -> vector<16x256xf32>
    %76 = vector.extract_strided_slice %37 {offsets = [0, 512], sizes = [16, 256], strides = [1, 1]} : vector<16x1024xf32> to vector<16x256xf32>
    %77 = arith.addf %75, %76 : vector<16x256xf32>
    %78 = arith.negf %77 : vector<16x256xf32>
    %79 = math.exp %78 : vector<16x256xf32>
    %cst_35 = arith.constant 1.000000e+00 : f32
    %80 = vector.broadcast %cst_35 : f32 to vector<16x256xf32>
    %81 = arith.addf %80, %79 : vector<16x256xf32>
    %82 = arith.divf %80, %81 : vector<16x256xf32>
    %83 = arith.mulf %77, %82 : vector<16x256xf32>
    %84 = arith.truncf %83 : vector<16x256xf32> to vector<16x256xbf16>
    %cst_36 = arith.constant 0.000000e+00 : bf16
    %85 = vector.broadcast %cst_36 : bf16 to vector<1x256xbf16>
    %86 = vector.extract_strided_slice %84 {offsets = [0, 0], sizes = [15, 256], strides = [1, 1]} : vector<16x256xbf16> to vector<15x256xbf16>
    %87 = tpu.concatenate %85, %86 in 0 : vector<1x256xbf16>, vector<15x256xbf16> -> vector<16x256xbf16>
    %88 = vector.extract_strided_slice %84 {offsets = [1, 0], sizes = [15, 256], strides = [1, 1]} : vector<16x256xbf16> to vector<15x256xbf16>
    %89 = tpu.concatenate %88, %85 in 0 : vector<15x256xbf16>, vector<1x256xbf16> -> vector<16x256xbf16>
    %90 = tpu.concatenate %87, %84, %89 in 1 : vector<16x256xbf16>, vector<16x256xbf16>, vector<16x256xbf16> -> vector<16x768xbf16>
    %c2 = arith.constant 2 : index
    %c0_37 = arith.constant 0 : index
    %c0_38 = arith.constant 0 : index
    %91 = vector.load %arg9[%c2, %c0_37, %c0_38] : memref<3x768x256xbf16, #tpu.memory_space<vmem>>, vector<1x768x256xbf16>
    %92 = vector.shape_cast %91 : vector<1x768x256xbf16> to vector<768x256xbf16>
    %cst_39 = arith.constant dense<0.000000e+00> : vector<16x256xf32>
    %93 = tpu.matmul %90, %92, %cst_39 {dimension_numbers = #tpu.dot_dimension_numbers<[1], [0], [0], [1], [0, 0, 1, 1], [], []>} : vector<16x768xbf16>, vector<768x256xbf16>, vector<16x256xf32> -> vector<16x256xf32>
    %94 = vector.extract_strided_slice %37 {offsets = [0, 768], sizes = [16, 256], strides = [1, 1]} : vector<16x1024xf32> to vector<16x256xf32>
    %95 = arith.addf %93, %94 : vector<16x256xf32>
    %96 = arith.negf %95 : vector<16x256xf32>
    %97 = math.exp %96 : vector<16x256xf32>
    %cst_40 = arith.constant 1.000000e+00 : f32
    %98 = vector.broadcast %cst_40 : f32 to vector<16x256xf32>
    %99 = arith.addf %98, %97 : vector<16x256xf32>
    %100 = arith.divf %98, %99 : vector<16x256xf32>
    %101 = arith.mulf %95, %100 : vector<16x256xf32>
    %c0_41 = arith.constant 0 : index
    %c1_42 = arith.constant 1 : index
    %c0_43 = arith.constant 0 : index
    %c0_44 = arith.constant 0 : index
    %c0_45 = arith.constant 0 : index
    %102 = vector.load %arg10[%c0_41, %c1_42, %c0_43, %c0_44, %c0_45] : memref<1x2x1x16x256xf32, #tpu.memory_space<vmem>>, vector<1x1x1x16x256xf32>
    %103 = vector.shape_cast %102 : vector<1x1x1x16x256xf32> to vector<16x256xf32>
    %104 = vector.shape_cast %101 : vector<16x256xf32> to vector<1x1x1x16x256xf32>
    tpu.vector_store %arg10[%c0_41, %c1_42, %c0_43, %c0_44, %c0_45], %104 {strides = array<i32>} : memref<1x2x1x16x256xf32, #tpu.memory_space<vmem>>, vector<1x1x1x16x256xf32>,
    return
  }
  func.func @transform_0(%arg0: i32, %arg1: i32) -> (i32, i32) {
    %c0_i32 = arith.constant 0 : i32
    %c0_i32_0 = arith.constant 0 : i32
    %c0_i32_1 = arith.constant 0 : i32
    return %c0_i32, %c0_i32_0 : i32, i32
  }
  func.func @transform_1(%arg0: i32, %arg1: i32) -> (i32, i32, i32) {
    %c0_i32 = arith.constant 0 : i32
    %c0_i32_0 = arith.constant 0 : i32
    %c0_i32_1 = arith.constant 0 : i32
    return %arg1, %c0_i32, %c0_i32_0 : i32, i32, i32
  }
  func.func @transform_2(%arg0: i32, %arg1: i32) -> (i32, i32, i32) {
    %c0_i32 = arith.constant 0 : i32
    %c0_i32_0 = arith.constant 0 : i32
    %c0_i32_1 = arith.constant 0 : i32
    return %arg1, %c0_i32, %c0_i32_0 : i32, i32, i32
  }
  func.func @transform_3(%arg0: i32, %arg1: i32) -> (i32, i32) {
    %c0_i32 = arith.constant 0 : i32
    %c0_i32_0 = arith.constant 0 : i32
    %c0_i32_1 = arith.constant 0 : i32
    return %c0_i32, %c0_i32_0 : i32, i32
  }
  func.func @transform_4(%arg0: i32, %arg1: i32) -> (i32, i32) {
    %c0_i32 = arith.constant 0 : i32
    %c0_i32_0 = arith.constant 0 : i32
    %c0_i32_1 = arith.constant 0 : i32
    return %c0_i32, %c0_i32_0 : i32, i32
  }
  func.func @transform_5(%arg0: i32, %arg1: i32) -> (i32, i32) {
    %c0_i32 = arith.constant 0 : i32
    %c0_i32_0 = arith.constant 0 : i32
    %c0_i32_1 = arith.constant 0 : i32
    return %c0_i32, %c0_i32_0 : i32, i32
  }
  func.func @transform_6(%arg0: i32, %arg1: i32) -> (i32, i32, i32) {
    %c0_i32 = arith.constant 0 : i32
    %c0_i32_0 = arith.constant 0 : i32
    %c0_i32_1 = arith.constant 0 : i32
    return %arg0, %c0_i32, %c0_i32_0 : i32, i32, i32
  }
  func.func @transform_7(%arg0: i32, %arg1: i32) -> (i32, i32, i32) {
    %c0_i32 = arith.constant 0 : i32
    %c0_i32_0 = arith.constant 0 : i32
    %c0_i32_1 = arith.constant 0 : i32
    %c0_i32_2 = arith.constant 0 : i32
    return %c0_i32, %c0_i32_0, %c0_i32_1 : i32, i32, i32
  }
  func.func @transform_8(%arg0: i32, %arg1: i32) -> (i32, i32, i32, i32, i32) {
    %c0_i32 = arith.constant 0 : i32
    %c0_i32_0 = arith.constant 0 : i32
    %c0_i32_1 = arith.constant 0 : i32
    %c0_i32_2 = arith.constant 0 : i32
    return %arg0, %c0_i32, %arg1, %c0_i32_0, %c0_i32_1 : i32, i32, i32, i32, i32
  }
}

</mosaic_0001>

<bundles_post_ra>
// kernel: squeeze.7
= control target key start
LH: loop header
LB: loop body
LE: loop exit
PB: predicated region body
PF: predicated region fallthrough
CT: control target
= control target key end

     0   :  { %s785_s10 = smov 112   ;;  %s786_s23 = smov 96   ;;  %vm3_vm0 = vcmask 130048   ;;  %s1498_s0 = inlined_call_operand.vmem [shape: f32[1,1,2,16,256], index: 0, kind: input, shape index: {}]   ;;  %s1499_s1 = inlined_call_operand.vmem [shape: f32[2,16,16,16], index: 1, kind: output, shape index: {}]  }
   0x1   :  { %v805_v0 = vld.sshfl [vmem:[%s1498_s0 + $0x10] sm:$0xff pattern:$0xb3a29180]   ;;  %v810_v1 = vld.sshfl [vmem:[%s1498_s0] sm:$0xff pattern:$0xb3a29180]  }
   0x2   :  { %104 = vrot.lane.b32.xlu1 %v805_v0, %s785_s10  ;;  %86 = vrot.lane.b32.xlu0 %v810_v1, %s785_s10  ;;  %v817_v2 = vld.sshfl [vmem:[%s1498_s0 + $0x14] sm:$0xff pattern:$0xb3a29180]   ;;  %v822_v3 = vld.sshfl [vmem:[%s1498_s0 + $0x4] sm:$0xff pattern:$0xb3a29180]  }
   0x3   :  { %v829_v4 = vld.sshfl [vmem:[%s1498_s0 + $0x24] sm:$0xff pattern:$0xb3a29180]   ;;  %v834_v5 = vld.sshfl [vmem:[%s1498_s0 + $0x20] sm:$0xff pattern:$0xb3a29180]  }
   0x4   :  { %v841_v6 = vld.sshfl [vmem:[%s1498_s0 + $0x34] sm:$0xff pattern:$0xb3a29180]   ;;  %v846_v7 = vld.sshfl [vmem:[%s1498_s0 + $0x30] sm:$0xff pattern:$0xb3a29180]  }
   0x5   :  { %s787_s24 = smov 80   ;;  %s788_s25 = smov 64   ;;  %v2_v8 = vld [vmem:[%s1498_s0] sm:$0xff]   ;;  %v582_v9 = vld [vmem:[%s1498_s0 + $0x8] sm:$0xff]   ;;  %v587_v10 = vld [vmem:[%s1498_s0 + $0x10] sm:$0xff]  }
   0x6   :  { %113 = vrot.lane.b32.xlu1 %v817_v2, %s785_s10  ;;  %95 = vrot.lane.b32.xlu0 %v822_v3, %s785_s10  ;;  %s789_s26 = smov 48   ;;  %s790_s27 = smov 32   ;;  %4 = vst.msk [vmem:[%s1499_s1] ss:$16 sm:$0x3] %vm3_vm0, %v2_v8   ;;  %v592_v11 = vld [vmem:[%s1498_s0 + $0x18] sm:$0xff]  }
   0x7   :  { %5 = vst.msk [vmem:[%s1499_s1] ss:$16 sm:$0xc] %vm3_vm0, %v2_v8   ;;  %6 = vst.msk [vmem:[%s1499_s1] ss:$16 sm:$0x30] %vm3_vm0, %v2_v8  }
   0x8   :  { %7 = vst.msk [vmem:[%s1499_s1] ss:$16 sm:$0xc0] %vm3_vm0, %v2_v8   ;;  %583 = vst.msk [vmem:[%s1499_s1 + $0x8] ss:$16 sm:$0x3] %vm3_vm0, %v582_v9  }
   0x9   :  { %584 = vst.msk [vmem:[%s1499_s1 + $0x8] ss:$16 sm:$0xc] %vm3_vm0, %v582_v9   ;;  %585 = vst.msk [vmem:[%s1499_s1 + $0x8] ss:$16 sm:$0x30] %vm3_vm0, %v582_v9  }
   0xa   :  { %131 = vrot.lane.b32.xlu1 %v829_v4, %s785_s10  ;;  %122 = vrot.lane.b32.xlu0 %v834_v5, %s785_s10  ;;  %586 = vst.msk [vmem:[%s1499_s1 + $0x8] ss:$16 sm:$0xc0] %vm3_vm0, %v582_v9   ;;  %588 = vst.msk [vmem:[%s1499_s1 + $0x80] ss:$16 sm:$0x3] %vm3_vm0, %v587_v10  }
   0xb   :  { %589 = vst.msk [vmem:[%s1499_s1 + $0x80] ss:$16 sm:$0xc] %vm3_vm0, %v587_v10   ;;  %590 = vst.msk [vmem:[%s1499_s1 + $0x80] ss:$16 sm:$0x30] %vm3_vm0, %v587_v10  }
   0xc   :  { %591 = vst.msk [vmem:[%s1499_s1 + $0x80] ss:$16 sm:$0xc0] %vm3_vm0, %v587_v10   ;;  %v597_v12 = vld [vmem:[%s1498_s0 + $0x20] sm:$0xff]   ;;  %v602_v13 = vld [vmem:[%s1498_s0 + $0x28] sm:$0xff]   ;;  %s791_s6 = smov 16  }
   0xd   :  { %593 = vst.msk [vmem:[%s1499_s1 + $0x88] ss:$16 sm:$0x3] %vm3_vm0, %v592_v11   ;;  %594 = vst.msk [vmem:[%s1499_s1 + $0x88] ss:$16 sm:$0xc] %vm3_vm0, %v592_v11  }
   0xe   :  { %149 = vrot.lane.b32.xlu1 %v841_v6, %s785_s10  ;;  %140 = vrot.lane.b32.xlu0 %v846_v7, %s785_s10  ;;  %595 = vst.msk [vmem:[%s1499_s1 + $0x88] ss:$16 sm:$0x30] %vm3_vm0, %v592_v11   ;;  %596 = vst.msk [vmem:[%s1499_s1 + $0x88] ss:$16 sm:$0xc0] %vm3_vm0, %v592_v11  }
   0xf   :  { %598 = vst.msk [vmem:[%s1499_s1 + $0x100] ss:$16 sm:$0x3] %vm3_vm0, %v597_v12   ;;  %599 = vst.msk [vmem:[%s1499_s1 + $0x100] ss:$16 sm:$0xc] %vm3_vm0, %v597_v12  }
  0x10   :  { %600 = vst.msk [vmem:[%s1499_s1 + $0x100] ss:$16 sm:$0x30] %vm3_vm0, %v597_v12   ;;  %601 = vst.msk [vmem:[%s1499_s1 + $0x100] ss:$16 sm:$0xc0] %vm3_vm0, %v597_v12  }
  0x11   :  { %603 = vst.msk [vmem:[%s1499_s1 + $0x108] ss:$16 sm:$0x3] %vm3_vm0, %v602_v13   ;;  %604 = vst.msk [vmem:[%s1499_s1 + $0x108] ss:$16 sm:$0xc] %vm3_vm0, %v602_v13  }
  0x12   :  { %166 = vrot.lane.b32.xlu1 %v822_v3, %s786_s23  ;;  %157 = vrot.lane.b32.xlu0 %v810_v1, %s786_s23  ;;  %605 = vst.msk [vmem:[%s1499_s1 + $0x108] ss:$16 sm:$0x30] %vm3_vm0, %v602_v13   ;;  %606 = vst.msk [vmem:[%s1499_s1 + $0x108] ss:$16 sm:$0xc0] %vm3_vm0, %v602_v13  }
  0x13   :  { %v607_v14 = vld [vmem:[%s1498_s0 + $0x30] sm:$0xff]   ;;  %v612_v15 = vld [vmem:[%s1498_s0 + $0x38] sm:$0xff]  }
  0x14   :  { %608 = vst.msk [vmem:[%s1499_s1 + $0x180] ss:$16 sm:$0x3] %vm3_vm0, %v607_v14   ;;  %609 = vst.msk [vmem:[%s1499_s1 + $0x180] ss:$16 sm:$0xc] %vm3_vm0, %v607_v14  }
  0x15   :  { %610 = vst.msk [vmem:[%s1499_s1 + $0x180] ss:$16 sm:$0x30] %vm3_vm0, %v607_v14   ;;  %611 = vst.msk [vmem:[%s1499_s1 + $0x180] ss:$16 sm:$0xc0] %vm3_vm0, %v607_v14  }
  0x16   :  { %184 = vrot.lane.b32.xlu1 %v817_v2, %s786_s23  ;;  %175 = vrot.lane.b32.xlu0 %v805_v0, %s786_s23  ;;  %613 = vst.msk [vmem:[%s1499_s1 + $0x188] ss:$16 sm:$0x3] %vm3_vm0, %v612_v15   ;;  %614 = vst.msk [vmem:[%s1499_s1 + $0x188] ss:$16 sm:$0xc] %vm3_vm0, %v612_v15  }
  0x17   :  { %615 = vst.msk [vmem:[%s1499_s1 + $0x188] ss:$16 sm:$0x30] %vm3_vm0, %v612_v15   ;;  %616 = vst.msk [vmem:[%s1499_s1 + $0x188] ss:$16 sm:$0xc0] %vm3_vm0, %v612_v15  }
  0x1a   :  { %202 = vrot.lane.b32.xlu1 %v829_v4, %s786_s23  ;;  %193 = vrot.lane.b32.xlu0 %v834_v5, %s786_s23 }
  0x1e   :  { %220 = vrot.lane.b32.xlu1 %v841_v6, %s786_s23  ;;  %211 = vrot.lane.b32.xlu0 %v846_v7, %s786_s23 }
  0x22   :  { %237 = vrot.lane.b32.xlu1 %v822_v3, %s787_s24  ;;  %228 = vrot.lane.b32.xlu0 %v810_v1, %s787_s24 }
  0x26   :  { %255 = vrot.lane.b32.xlu1 %v817_v2, %s787_s24  ;;  %246 = vrot.lane.b32.xlu0 %v805_v0, %s787_s24 }
  0x2a   :  { %273 = vrot.lane.b32.xlu1 %v829_v4, %s787_s24  ;;  %264 = vrot.lane.b32.xlu0 %v834_v5, %s787_s24 }
  0x2e   :  { %291 = vrot.lane.b32.xlu1 %v841_v6, %s787_s24  ;;  %282 = vrot.lane.b32.xlu0 %v846_v7, %s787_s24 }
  0x32   :  { %308 = vrot.lane.b32.xlu1 %v822_v3, %s788_s25  ;;  %299 = vrot.lane.b32.xlu0 %v810_v1, %s788_s25 }
  0x36   :  { %326 = vrot.lane.b32.xlu1 %v817_v2, %s788_s25  ;;  %317 = vrot.lane.b32.xlu0 %v805_v0, %s788_s25 }
  0x3a   :  { %344 = vrot.lane.b32.xlu1 %v829_v4, %s788_s25  ;;  %335 = vrot.lane.b32.xlu0 %v834_v5, %s788_s25 }
  0x3e   :  { %362 = vrot.lane.b32.xlu1 %v841_v6, %s788_s25  ;;  %353 = vrot.lane.b32.xlu0 %v846_v7, %s788_s25 }
  0x42   :  { %379 = vrot.lane.b32.xlu1 %v822_v3, %s789_s26  ;;  %370 = vrot.lane.b32.xlu0 %v810_v1, %s789_s26 }
  0x46   :  { %397 = vrot.lane.b32.xlu1 %v817_v2, %s789_s26  ;;  %388 = vrot.lane.b32.xlu0 %v805_v0, %s789_s26 }
  0x4a   :  { %415 = vrot.lane.b32.xlu1 %v829_v4, %s789_s26  ;;  %406 = vrot.lane.b32.xlu0 %v834_v5, %s789_s26 }
  0x4e   :  { %433 = vrot.lane.b32.xlu1 %v841_v6, %s789_s26  ;;  %424 = vrot.lane.b32.xlu0 %v846_v7, %s789_s26 }
  0x52   :  { %450 = vrot.lane.b32.xlu1 %v822_v3, %s790_s27  ;;  %441 = vrot.lane.b32.xlu0 %v810_v1, %s790_s27 }
  0x56   :  { %468 = vrot.lane.b32.xlu1 %v817_v2, %s790_s27  ;;  %459 = vrot.lane.b32.xlu0 %v805_v0, %s790_s27 }
  0x5a   :  { %486 = vrot.lane.b32.xlu1 %v829_v4, %s790_s27  ;;  %477 = vrot.lane.b32.xlu0 %v834_v5, %s790_s27 }
  0x5e   :  { %504 = vrot.lane.b32.xlu1 %v841_v6, %s790_s27  ;;  %495 = vrot.lane.b32.xlu0 %v846_v7, %s790_s27 }
  0x62   :  { %521 = vrot.lane.b32.xlu1 %v822_v3, %s791_s6  ;;  %512 = vrot.lane.b32.xlu0 %v810_v1, %s791_s6 }
  0x66   :  { %539 = vrot.lane.b32.xlu1 %v817_v2, %s791_s6  ;;  %530 = vrot.lane.b32.xlu0 %v805_v0, %s791_s6 }
  0x6a   :  { %557 = vrot.lane.b32.xlu1 %v829_v4, %s791_s6  ;;  %548 = vrot.lane.b32.xlu0 %v834_v5, %s791_s6 }
  0x6e   :  { %575 = vrot.lane.b32.xlu1 %v841_v6, %s791_s6  ;;  %566 = vrot.lane.b32.xlu0 %v846_v7, %s791_s6 }
  0x74   :  { %v105_v16 = vpop.permute.xlu1 %104   ;;  %v87_v17 = vpop.permute.xlu0 %86  }
  0x75   :  { %623 = vst.msk [vmem:[%s1499_s1 + $0x81] ss:$8 sm:$0xf] %vm3_vm0, %v105_v16   ;;  %624 = vst.msk [vmem:[%s1499_s1 + $0x81] ss:$8 sm:$0xf0] %vm3_vm0, %v105_v16  }
  0x76   :  { %617 = vst.msk [vmem:[%s1499_s1 + $0x1] ss:$8 sm:$0xf] %vm3_vm0, %v87_v17   ;;  %618 = vst.msk [vmem:[%s1499_s1 + $0x1] ss:$8 sm:$0xf0] %vm3_vm0, %v87_v17  }
  0x78   :  { %v114_v18 = vpop.permute.xlu1 %113   ;;  %v96_v19 = vpop.permute.xlu0 %95  }
  0x79   :  { %626 = vst.msk [vmem:[%s1499_s1 + $0xc1] ss:$8 sm:$0xf] %vm3_vm0, %v114_v18   ;;  %627 = vst.msk [vmem:[%s1499_s1 + $0xc1] ss:$8 sm:$0xf0] %vm3_vm0, %v114_v18  }
  0x7a   :  { %620 = vst.msk [vmem:[%s1499_s1 + $0x41] ss:$8 sm:$0xf] %vm3_vm0, %v96_v19   ;;  %621 = vst.msk [vmem:[%s1499_s1 + $0x41] ss:$8 sm:$0xf0] %vm3_vm0, %v96_v19  }
  0x7c   :  { %v132_v20 = vpop.permute.xlu1 %131   ;;  %v123_v21 = vpop.permute.xlu0 %122  }
  0x7d   :  { %632 = vst.msk [vmem:[%s1499_s1 + $0x141] ss:$8 sm:$0xf] %vm3_vm0, %v132_v20   ;;  %633 = vst.msk [vmem:[%s1499_s1 + $0x141] ss:$8 sm:$0xf0] %vm3_vm0, %v132_v20  }
  0x7e   :  { %629 = vst.msk [vmem:[%s1499_s1 + $0x101] ss:$8 sm:$0xf] %vm3_vm0, %v123_v21   ;;  %630 = vst.msk [vmem:[%s1499_s1 + $0x101] ss:$8 sm:$0xf0] %vm3_vm0, %v123_v21  }
  0x80   :  { %v150_v22 = vpop.permute.xlu1 %149   ;;  %v141_v23 = vpop.permute.xlu0 %140  }
  0x81   :  { %638 = vst.msk [vmem:[%s1499_s1 + $0x1c1] ss:$8 sm:$0xf] %vm3_vm0, %v150_v22   ;;  %639 = vst.msk [vmem:[%s1499_s1 + $0x1c1] ss:$8 sm:$0xf0] %vm3_vm0, %v150_v22  }
  0x82   :  { %635 = vst.msk [vmem:[%s1499_s1 + $0x181] ss:$8 sm:$0xf] %vm3_vm0, %v141_v23   ;;  %636 = vst.msk [vmem:[%s1499_s1 + $0x181] ss:$8 sm:$0xf0] %vm3_vm0, %v141_v23  }
  0x84   :  { %v167_v24 = vpop.permute.xlu1 %166   ;;  %v158_v25 = vpop.permute.xlu0 %157  }
  0x85   :  { %643 = vst.msk [vmem:[%s1499_s1 + $0x42] ss:$8 sm:$0xf] %vm3_vm0, %v167_v24   ;;  %644 = vst.msk [vmem:[%s1499_s1 + $0x42] ss:$8 sm:$0xf0] %vm3_vm0, %v167_v24  }
  0x86   :  { %640 = vst.msk [vmem:[%s1499_s1 + $0x2] ss:$8 sm:$0xf] %vm3_vm0, %v158_v25   ;;  %641 = vst.msk [vmem:[%s1499_s1 + $0x2] ss:$8 sm:$0xf0] %vm3_vm0, %v158_v25  }
  0x88   :  { %v185_v26 = vpop.permute.xlu1 %184   ;;  %v176_v27 = vpop.permute.xlu0 %175  }
  0x89   :  { %649 = vst.msk [vmem:[%s1499_s1 + $0xc2] ss:$8 sm:$0xf] %vm3_vm0, %v185_v26   ;;  %650 = vst.msk [vmem:[%s1499_s1 + $0xc2] ss:$8 sm:$0xf0] %vm3_vm0, %v185_v26  }
  0x8a   :  { %646 = vst.msk [vmem:[%s1499_s1 + $0x82] ss:$8 sm:$0xf] %vm3_vm0, %v176_v27   ;;  %647 = vst.msk [vmem:[%s1499_s1 + $0x82] ss:$8 sm:$0xf0] %vm3_vm0, %v176_v27  }
  0x8c   :  { %v203_v28 = vpop.permute.xlu1 %202   ;;  %v194_v29 = vpop.permute.xlu0 %193  }
  0x8d   :  { %655 = vst.msk [vmem:[%s1499_s1 + $0x142] ss:$8 sm:$0xf] %vm3_vm0, %v203_v28   ;;  %656 = vst.msk [vmem:[%s1499_s1 + $0x142] ss:$8 sm:$0xf0] %vm3_vm0, %v203_v28  }
  0x8e   :  { %652 = vst.msk [vmem:[%s1499_s1 + $0x102] ss:$8 sm:$0xf] %vm3_vm0, %v194_v29   ;;  %653 = vst.msk [vmem:[%s1499_s1 + $0x102] ss:$8 sm:$0xf0] %vm3_vm0, %v194_v29  }
  0x90   :  { %v221_v30 = vpop.permute.xlu1 %220   ;;  %v212_v31 = vpop.permute.xlu0 %211  }
  0x91   :  { %661 = vst.msk [vmem:[%s1499_s1 + $0x1c2] ss:$8 sm:$0xf] %vm3_vm0, %v221_v30   ;;  %662 = vst.msk [vmem:[%s1499_s1 + $0x1c2] ss:$8 sm:$0xf0] %vm3_vm0, %v221_v30  }
  0x92   :  { %658 = vst.msk [vmem:[%s1499_s1 + $0x182] ss:$8 sm:$0xf] %vm3_vm0, %v212_v31   ;;  %659 = vst.msk [vmem:[%s1499_s1 + $0x182] ss:$8 sm:$0xf0] %vm3_vm0, %v212_v31  }
  0x94   :  { %v238_v32 = vpop.permute.xlu1 %237   ;;  %v229_v33 = vpop.permute.xlu0 %228  }
  0x95   :  { %666 = vst.msk [vmem:[%s1499_s1 + $0x43] ss:$8 sm:$0xf] %vm3_vm0, %v238_v32   ;;  %667 = vst.msk [vmem:[%s1499_s1 + $0x43] ss:$8 sm:$0xf0] %vm3_vm0, %v238_v32  }
  0x96   :  { %663 = vst.msk [vmem:[%s1499_s1 + $0x3] ss:$8 sm:$0xf] %vm3_vm0, %v229_v33   ;;  %664 = vst.msk [vmem:[%s1499_s1 + $0x3] ss:$8 sm:$0xf0] %vm3_vm0, %v229_v33  }
  0x98   :  { %v256_v34 = vpop.permute.xlu1 %255   ;;  %v247_v35 = vpop.permute.xlu0 %246  }
  0x99   :  { %672 = vst.msk [vmem:[%s1499_s1 + $0xc3] ss:$8 sm:$0xf] %vm3_vm0, %v256_v34   ;;  %673 = vst.msk [vmem:[%s1499_s1 + $0xc3] ss:$8 sm:$0xf0] %vm3_vm0, %v256_v34  }
  0x9a   :  { %669 = vst.msk [vmem:[%s1499_s1 + $0x83] ss:$8 sm:$0xf] %vm3_vm0, %v247_v35   ;;  %670 = vst.msk [vmem:[%s1499_s1 + $0x83] ss:$8 sm:$0xf0] %vm3_vm0, %v247_v35  }
  0x9c   :  { %v274_v36 = vpop.permute.xlu1 %273   ;;  %v265_v37 = vpop.permute.xlu0 %264  }
  0x9d   :  { %678 = vst.msk [vmem:[%s1499_s1 + $0x143] ss:$8 sm:$0xf] %vm3_vm0, %v274_v36   ;;  %679 = vst.msk [vmem:[%s1499_s1 + $0x143] ss:$8 sm:$0xf0] %vm3_vm0, %v274_v36  }
  0x9e   :  { %675 = vst.msk [vmem:[%s1499_s1 + $0x103] ss:$8 sm:$0xf] %vm3_vm0, %v265_v37   ;;  %676 = vst.msk [vmem:[%s1499_s1 + $0x103] ss:$8 sm:$0xf0] %vm3_vm0, %v265_v37  }
  0xa0   :  { %v292_v38 = vpop.permute.xlu1 %291   ;;  %v283_v39 = vpop.permute.xlu0 %282  }
  0xa1   :  { %684 = vst.msk [vmem:[%s1499_s1 + $0x1c3] ss:$8 sm:$0xf] %vm3_vm0, %v292_v38   ;;  %685 = vst.msk [vmem:[%s1499_s1 + $0x1c3] ss:$8 sm:$0xf0] %vm3_vm0, %v292_v38  }
  0xa2   :  { %681 = vst.msk [vmem:[%s1499_s1 + $0x183] ss:$8 sm:$0xf] %vm3_vm0, %v283_v39   ;;  %682 = vst.msk [vmem:[%s1499_s1 + $0x183] ss:$8 sm:$0xf0] %vm3_vm0, %v283_v39  }
  0xa4   :  { %v309_v40 = vpop.permute.xlu1 %308   ;;  %v300_v41 = vpop.permute.xlu0 %299  }
  0xa5   :  { %689 = vst.msk [vmem:[%s1499_s1 + $0x44] ss:$8 sm:$0xf] %vm3_vm0, %v309_v40   ;;  %690 = vst.msk [vmem:[%s1499_s1 + $0x44] ss:$8 sm:$0xf0] %vm3_vm0, %v309_v40  }
  0xa6   :  { %686 = vst.msk [vmem:[%s1499_s1 + $0x4] ss:$8 sm:$0xf] %vm3_vm0, %v300_v41   ;;  %687 = vst.msk [vmem:[%s1499_s1 + $0x4] ss:$8 sm:$0xf0] %vm3_vm0, %v300_v41  }
  0xa8   :  { %v327_v42 = vpop.permute.xlu1 %326   ;;  %v318_v43 = vpop.permute.xlu0 %317  }
  0xa9   :  { %695 = vst.msk [vmem:[%s1499_s1 + $0xc4] ss:$8 sm:$0xf] %vm3_vm0, %v327_v42   ;;  %696 = vst.msk [vmem:[%s1499_s1 + $0xc4] ss:$8 sm:$0xf0] %vm3_vm0, %v327_v42  }
  0xaa   :  { %692 = vst.msk [vmem:[%s1499_s1 + $0x84] ss:$8 sm:$0xf] %vm3_vm0, %v318_v43   ;;  %693 = vst.msk [vmem:[%s1499_s1 + $0x84] ss:$8 sm:$0xf0] %vm3_vm0, %v318_v43  }
  0xac   :  { %v345_v44 = vpop.permute.xlu1 %344   ;;  %v336_v45 = vpop.permute.xlu0 %335  }
  0xad   :  { %701 = vst.msk [vmem:[%s1499_s1 + $0x144] ss:$8 sm:$0xf] %vm3_vm0, %v345_v44   ;;  %702 = vst.msk [vmem:[%s1499_s1 + $0x144] ss:$8 sm:$0xf0] %vm3_vm0, %v345_v44  }
  0xae   :  { %698 = vst.msk [vmem:[%s1499_s1 + $0x104] ss:$8 sm:$0xf] %vm3_vm0, %v336_v45   ;;  %699 = vst.msk [vmem:[%s1499_s1 + $0x104] ss:$8 sm:$0xf0] %vm3_vm0, %v336_v45  }
  0xb0   :  { %v363_v46 = vpop.permute.xlu1 %362   ;;  %v354_v47 = vpop.permute.xlu0 %353  }
  0xb1   :  { %707 = vst.msk [vmem:[%s1499_s1 + $0x1c4] ss:$8 sm:$0xf] %vm3_vm0, %v363_v46   ;;  %708 = vst.msk [vmem:[%s1499_s1 + $0x1c4] ss:$8 sm:$0xf0] %vm3_vm0, %v363_v46  }
  0xb2   :  { %704 = vst.msk [vmem:[%s1499_s1 + $0x184] ss:$8 sm:$0xf] %vm3_vm0, %v354_v47   ;;  %705 = vst.msk [vmem:[%s1499_s1 + $0x184] ss:$8 sm:$0xf0] %vm3_vm0, %v354_v47  }
  0xb4   :  { %v380_v48 = vpop.permute.xlu1 %379   ;;  %v371_v49 = vpop.permute.xlu0 %370  }
  0xb5   :  { %712 = vst.msk [vmem:[%s1499_s1 + $0x45] ss:$8 sm:$0xf] %vm3_vm0, %v380_v48   ;;  %713 = vst.msk [vmem:[%s1499_s1 + $0x45] ss:$8 sm:$0xf0] %vm3_vm0, %v380_v48  }
  0xb6   :  { %709 = vst.msk [vmem:[%s1499_s1 + $0x5] ss:$8 sm:$0xf] %vm3_vm0, %v371_v49   ;;  %710 = vst.msk [vmem:[%s1499_s1 + $0x5] ss:$8 sm:$0xf0] %vm3_vm0, %v371_v49  }
  0xb8   :  { %v398_v50 = vpop.permute.xlu1 %397   ;;  %v389_v51 = vpop.permute.xlu0 %388  }
  0xb9   :  { %718 = vst.msk [vmem:[%s1499_s1 + $0xc5] ss:$8 sm:$0xf] %vm3_vm0, %v398_v50   ;;  %719 = vst.msk [vmem:[%s1499_s1 + $0xc5] ss:$8 sm:$0xf0] %vm3_vm0, %v398_v50  }
  0xba   :  { %715 = vst.msk [vmem:[%s1499_s1 + $0x85] ss:$8 sm:$0xf] %vm3_vm0, %v389_v51   ;;  %716 = vst.msk [vmem:[%s1499_s1 + $0x85] ss:$8 sm:$0xf0] %vm3_vm0, %v389_v51  }
  0xbc   :  { %v416_v52 = vpop.permute.xlu1 %415   ;;  %v407_v53 = vpop.permute.xlu0 %406  }
  0xbd   :  { %724 = vst.msk [vmem:[%s1499_s1 + $0x145] ss:$8 sm:$0xf] %vm3_vm0, %v416_v52   ;;  %725 = vst.msk [vmem:[%s1499_s1 + $0x145] ss:$8 sm:$0xf0] %vm3_vm0, %v416_v52  }
  0xbe   :  { %721 = vst.msk [vmem:[%s1499_s1 + $0x105] ss:$8 sm:$0xf] %vm3_vm0, %v407_v53   ;;  %722 = vst.msk [vmem:[%s1499_s1 + $0x105] ss:$8 sm:$0xf0] %vm3_vm0, %v407_v53  }
  0xc0   :  { %v434_v54 = vpop.permute.xlu1 %433   ;;  %v425_v55 = vpop.permute.xlu0 %424  }
  0xc1   :  { %730 = vst.msk [vmem:[%s1499_s1 + $0x1c5] ss:$8 sm:$0xf] %vm3_vm0, %v434_v54   ;;  %731 = vst.msk [vmem:[%s1499_s1 + $0x1c5] ss:$8 sm:$0xf0] %vm3_vm0, %v434_v54  }
  0xc2   :  { %727 = vst.msk [vmem:[%s1499_s1 + $0x185] ss:$8 sm:$0xf] %vm3_vm0, %v425_v55   ;;  %728 = vst.msk [vmem:[%s1499_s1 + $0x185] ss:$8 sm:$0xf0] %vm3_vm0, %v425_v55  }
  0xc4   :  { %v451_v56 = vpop.permute.xlu1 %450   ;;  %v442_v57 = vpop.permute.xlu0 %441  }
  0xc5   :  { %735 = vst.msk [vmem:[%s1499_s1 + $0x46] ss:$8 sm:$0xf] %vm3_vm0, %v451_v56   ;;  %736 = vst.msk [vmem:[%s1499_s1 + $0x46] ss:$8 sm:$0xf0] %vm3_vm0, %v451_v56  }
  0xc6   :  { %732 = vst.msk [vmem:[%s1499_s1 + $0x6] ss:$8 sm:$0xf] %vm3_vm0, %v442_v57   ;;  %733 = vst.msk [vmem:[%s1499_s1 + $0x6] ss:$8 sm:$0xf0] %vm3_vm0, %v442_v57  }
  0xc8   :  { %v469_v58 = vpop.permute.xlu1 %468   ;;  %v460_v59 = vpop.permute.xlu0 %459  }
  0xc9   :  { %741 = vst.msk [vmem:[%s1499_s1 + $0xc6] ss:$8 sm:$0xf] %vm3_vm0, %v469_v58   ;;  %742 = vst.msk [vmem:[%s1499_s1 + $0xc6] ss:$8 sm:$0xf0] %vm3_vm0, %v469_v58  }
  0xca   :  { %738 = vst.msk [vmem:[%s1499_s1 + $0x86] ss:$8 sm:$0xf] %vm3_vm0, %v460_v59   ;;  %739 = vst.msk [vmem:[%s1499_s1 + $0x86] ss:$8 sm:$0xf0] %vm3_vm0, %v460_v59  }
  0xcc   :  { %v487_v60 = vpop.permute.xlu1 %486   ;;  %v478_v61 = vpop.permute.xlu0 %477  }
  0xcd   :  { %747 = vst.msk [vmem:[%s1499_s1 + $0x146] ss:$8 sm:$0xf] %vm3_vm0, %v487_v60   ;;  %748 = vst.msk [vmem:[%s1499_s1 + $0x146] ss:$8 sm:$0xf0] %vm3_vm0, %v487_v60  }
  0xce   :  { %744 = vst.msk [vmem:[%s1499_s1 + $0x106] ss:$8 sm:$0xf] %vm3_vm0, %v478_v61   ;;  %745 = vst.msk [vmem:[%s1499_s1 + $0x106] ss:$8 sm:$0xf0] %vm3_vm0, %v478_v61  }
  0xd0   :  { %v505_v62 = vpop.permute.xlu1 %504   ;;  %v496_v63 = vpop.permute.xlu0 %495  }
  0xd1   :  { %753 = vst.msk [vmem:[%s1499_s1 + $0x1c6] ss:$8 sm:$0xf] %vm3_vm0, %v505_v62   ;;  %754 = vst.msk [vmem:[%s1499_s1 + $0x1c6] ss:$8 sm:$0xf0] %vm3_vm0, %v505_v62  }
  0xd2   :  { %750 = vst.msk [vmem:[%s1499_s1 + $0x186] ss:$8 sm:$0xf] %vm3_vm0, %v496_v63   ;;  %751 = vst.msk [vmem:[%s1499_s1 + $0x186] ss:$8 sm:$0xf0] %vm3_vm0, %v496_v63  }
  0xd4   :  { %v522_v0 = vpop.permute.xlu1 %521   ;;  %v513_v1 = vpop.permute.xlu0 %512  }
  0xd5   :  { %758 = vst.msk [vmem:[%s1499_s1 + $0x47] ss:$8 sm:$0xf] %vm3_vm0, %v522_v0   ;;  %759 = vst.msk [vmem:[%s1499_s1 + $0x47] ss:$8 sm:$0xf0] %vm3_vm0, %v522_v0  }
  0xd6   :  { %755 = vst.msk [vmem:[%s1499_s1 + $0x7] ss:$8 sm:$0xf] %vm3_vm0, %v513_v1   ;;  %756 = vst.msk [vmem:[%s1499_s1 + $0x7] ss:$8 sm:$0xf0] %vm3_vm0, %v513_v1  }
  0xd8   :  { %v540_v2 = vpop.permute.xlu1 %539   ;;  %v531_v3 = vpop.permute.xlu0 %530  }
  0xd9   :  { %764 = vst.msk [vmem:[%s1499_s1 + $0xc7] ss:$8 sm:$0xf] %vm3_vm0, %v540_v2   ;;  %765 = vst.msk [vmem:[%s1499_s1 + $0xc7] ss:$8 sm:$0xf0] %vm3_vm0, %v540_v2  }
  0xda   :  { %761 = vst.msk [vmem:[%s1499_s1 + $0x87] ss:$8 sm:$0xf] %vm3_vm0, %v531_v3   ;;  %762 = vst.msk [vmem:[%s1499_s1 + $0x87] ss:$8 sm:$0xf0] %vm3_vm0, %v531_v3  }
  0xdc   :  { %v558_v4 = vpop.permute.xlu1 %557   ;;  %v549_v5 = vpop.permute.xlu0 %548  }
  0xdd   :  { %770 = vst.msk [vmem:[%s1499_s1 + $0x147] ss:$8 sm:$0xf] %vm3_vm0, %v558_v4   ;;  %771 = vst.msk [vmem:[%s1499_s1 + $0x147] ss:$8 sm:$0xf0] %vm3_vm0, %v558_v4  }
  0xde   :  { %767 = vst.msk [vmem:[%s1499_s1 + $0x107] ss:$8 sm:$0xf] %vm3_vm0, %v549_v5   ;;  %768 = vst.msk [vmem:[%s1499_s1 + $0x107] ss:$8 sm:$0xf0] %vm3_vm0, %v549_v5  }
  0xe0   :  { %v576_v6 = vpop.permute.xlu1 %575   ;;  %v567_v7 = vpop.permute.xlu0 %566  }
  0xe1   :  { %776 = vst.msk [vmem:[%s1499_s1 + $0x1c7] ss:$8 sm:$0xf] %vm3_vm0, %v576_v6   ;;  %777 = vst.msk [vmem:[%s1499_s1 + $0x1c7] ss:$8 sm:$0xf0] %vm3_vm0, %v576_v6  }
  0xe2   :  { %773 = vst.msk [vmem:[%s1499_s1 + $0x187] ss:$8 sm:$0xf] %vm3_vm0, %v567_v7   ;;  %774 = vst.msk [vmem:[%s1499_s1 + $0x187] ss:$8 sm:$0xf0] %vm3_vm0, %v567_v7  }

// kernel: fwd.1
= control target key start
LH: loop header
LB: loop body
LE: loop exit
PB: predicated region body
PF: predicated region fallthrough
CT: control target
= control target key end

     0   :  { %s9456_s0 = inlined_call_operand.hbm [shape: f32[2,2], index: 0, kind: input, shape index: {}]   ;;  %s9457_s1 = inlined_call_operand.vmem [shape: f32[2,16,128], index: 1, kind: input, shape index: {}]   ;;  %s9458_s2 = inlined_call_operand.vmem [shape: f32[2,16,128], index: 2, kind: input, shape index: {}]   ;;  %s9459_s3 = inlined_call_operand.hbm [shape: bf16[384,256], index: 3, kind: input, shape index: {}]   ;;  %s9460_s4 = inlined_call_operand.hbm [shape: f32[1,256], index: 4, kind: input, shape index: {}]   ;;  %s9461_s5 = inlined_call_operand.hbm [shape: bf16[768,1024], index: 5, kind: input, shape index: {}]   ;;  %s9462_s6 = inlined_call_operand.vmem [shape: f32[2,1,1024], index: 6, kind: input, shape index: {}]   ;;  %s9463_s7 = inlined_call_operand.vmem [shape: bf16[3,768,256], index: 7, kind: input, shape index: {}]   ;;  %s9464_s8 = inlined_call_operand.vmem [shape: f32[2,2,2,16,256], index: 8, kind: output, shape index: {}]  }
   0x1   :  { %9472 = sst [smem:[#allocation18_spill]] %s9456_s0 }
   0x2   :  { %9473 = sst [smem:[#allocation19_spill]] %s9460_s4 }
   0x3   :  { %13 = vsyncpa [#allocation4], 0 }
   0x4   :  { %14 = vsyncpa [#allocation3], 0 }
   0x5   :  { %15 = vsyncpa [#allocation7], 0  ;;  %s8157_s27 = smov 0   ;;  %s8159_s28 = smov 0  }
   0x6   :  { %s8161_s29 = smov 0   ;;  %s8163_s30 = smov 0  }
   0x7   :  { %s8165_s9 = smov 0   ;;  %s8167_s10 = smov 0  }
   0x8   :  { %s8169_s11 = smov 0  }
   0x9 LB: > { %9474 = sst [smem:[#allocation13_spill]] %s8093_s9  ;;  %s6215_s12 = sadd.s32 4294967295, %s8101_s11   ;;  %s8101_s11 = sphi %s8169_s11, %s21_s11   ;;  %s8097_s10 = sphi %s8167_s10, %s9497_s10   ;;  %s8093_s9 = sphi %s8165_s9, %s9496_s9   ;;  %s8089_s30 = sphi %s8163_s30, %s9501_s30   ;;  %s8085_s29 = sphi %s8161_s29, %s9500_s29   ;;  %s8081_s28 = sphi %s8159_s28, %s9499_s28   ;;  %s8077_s27 = sphi %s8157_s27, %s9498_s27  }
   0xa   : > { %9475 = sst [smem:[#allocation14_spill]] %s8097_s10  ;;  %s30_s13 = sadd.s32 1, %s8093_s9 }
   0xb   : > { %p31_p0 = scmp.ge.s32.totalorder %s30_s13, 2  ;;  %s33_s14 = sadd.s32 1, %s8097_s10 }
   0xc   : > { %s225_s15 = sadd.s32 1, %s8081_s28  ;;  %p235_p1 = scmp.ne.s32.totalorder %s8081_s28, %s8077_s27 }
   0xd   : > { %s9503_s13 = smov (%p31_p0, %s30_s13), 0  ;;  %s9505_s14 = smov (!%p31_p0, %s33_s14), %s8097_s10 }
   0xe   : > { %9476 = sst [smem:[#allocation15_spill]] %s9503_s13  ;;  %s221_s16 = ssub.s32 %s8093_s9, %s9503_s13 }
   0xf   : > { %p236_p2 = scmp.eq.s32.totalorder %s6215_s12, 3  ;;  %p35_p3 = scmp.ge.s32.totalorder %s9505_s14, 2 }
  0x10   : > { %p6217_p4 = scmp.ge.s32.totalorder %s8101_s11, 1  ;;  %p249_p6 = scmp.lt.s32.totalorder %s8101_s11, 5 }
  0x11   : > { %p8204_p5 = por %p236_p2, %p235_p1  ;;  %s9507_s14 = smov (%p35_p3, %s9505_s14), 0 }
  0x12   : > { %9478 = sst [smem:[#allocation16_spill]] %s9507_s14  ;;  %p8211_p7 = pnand %p6217_p4, %p249_p6 }
  0x13   : > { %s9477_s17 = scalar_select %p8204_p5, 1, 0 }
  0x14   : > { %s9479_s18 = scalar_select %p8211_p7, 1, 0 }
  0x15   : > { %s220_s19 = ssub.s32 %s8097_s10, %s9507_s14  ;;  %p8217_p8 = scmp.eq.s32.totalorder %s6215_s12, 0 }
  0x16   : > { %s222_s21 = sor.u32 %s221_s16, %s220_s19  ;;  %p7283_p9 = pneg %p8211_p7 }
  0x17   : > { %s9480_s20 = scalar_select %p8217_p8, 1, 0 }
  0x18   : > { %p223_p10 = scmp.eq.s32.totalorder %s222_s21, 0  ;;  %p8225_p11 = pnand %p8217_p8, %p7283_p9 }
  0x19   : > { %s8103_s23 = smov [#allocation6]   ;;  %s9483_s4 = sld [smem:[#allocation19_spill]] }
  0x1a   : > { %s284_s24 = sshll.u32 %s8103_s23, 4  ;;  %p8240_p13 = pneg %p8225_p11  ;;  %s285_s24 = int_to_ptr.vmem [resolvable:$true] %s284_s24 }
  0x1b   : > { %s8230_s25 = scalar_select %p223_p10, %s8081_s28, %s225_s15  }
  0x1d   : > { %9482 = sst [smem:[#allocation17_spill]] %s8230_s25 }
  0x1f   : > { %s7938_s14 = scalar_lea.hbm %s9483_s4, 32 }
  0x20   : > { %p7939_p12 = scmp.ne.s32.totalorder %s9483_s4, %s7938_s14  ;;  %p7945_p2 = scmp.lt.u32.totalorder %s7938_s14, %s9483_s4 }
  0x22   : > { %p7941_p0 = pnand %p8240_p13, %p7939_p12 }
  0x24   : > { %p7942_p1 = pneg %p7941_p0 }
  0x26   : > { %p7947_p3 = pnand %p7945_p2, %p7942_p1 }
  0x28   : > { %7950 = shalt.err (!%p7947_p3)
}
  0x29   : > { %s7951_s23 = scalar_lea.vmem %s285_s24, 32  ;;  %p7959_p10 = scmp.lt.s32.totalorder %s285_s24, %s285_s24 }
  0x2a   : > { %p7952_p4 = scmp.ne.s32.totalorder %s285_s24, %s7951_s23  ;;  %p7960_p5 = scmp.lt.s32.totalorder %s7951_s23, %s7951_s23 }
  0x2c   : > { %p7954_p6 = pnand %p7952_p4, %p8240_p13  ;;  %p7961_p8 = por %p7960_p5, %p7959_p10 }
  0x2e   : > { %p7955_p9 = pneg %p7954_p6 }
  0x30   : > { %p7962_p7 = pnand %p7961_p8, %p7955_p9 }
  0x32   : > { %7965 = shalt.err (!%p7962_p7)
}
  0x33   : > { %7292 = dma.hbm_to_vmem [thread:$0]  (!%p8225_p11), %s9483_s4, 32, %s285_s24, [#allocation7]  }
  0x34   : > { %s9485_s0 = sld [smem:[#allocation18_spill]] }
  0x3a   : > { %s7966_s16 = scalar_lea.hbm %s9485_s0, 32 }
  0x3b   : > { %p7967_p12 = scmp.ne.s32.totalorder %s9485_s0, %s7966_s16  ;;  %p7973_p7 = scmp.lt.u32.totalorder %s7966_s16, %s9485_s0 }
  0x3d   : > { %p7969_p0 = pnand %p7967_p12, %p8240_p13 }
  0x3f   : > { %p7970_p5 = pneg %p7969_p0 }
  0x41   : > { %p7975_p8 = pnand %p7973_p7, %p7970_p5 }
  0x43   : > { %7978 = shalt.err (!%p7975_p8)
}
  0x44   : > { %s8104_s13 = smov [#allocation2]   ;;  %s8105_s14 = smov [#allocation5]  }
  0x45   : > { %7286 = dma.hbm_to_smem (!%p8225_p11), %s9485_s0, 32, %s8104_s13, [#allocation4]  }
  0x46   : > { %s270_s12 = sshll.u32 %s8105_s14, 4  ;;  %s7979_s4 = scalar_lea.hbm %s9459_s3, 6144  ;;  %s271_s12 = int_to_ptr.vmem [resolvable:$true] %s270_s12 }
  0x47   : > { %p7980_p1 = scmp.ne.s32.totalorder %s9459_s3, %s7979_s4  ;;  %p7986_p4 = scmp.lt.u32.totalorder %s7979_s4, %s9459_s3 }
  0x49   : > { %p7982_p2 = pnand %p7980_p1, %p8240_p13 }
  0x4b   : > { %p7983_p3 = pneg %p7982_p2 }
  0x4d   : > { %p7988_p6 = pnand %p7986_p4, %p7983_p3 }
  0x4f   : > { %7991 = shalt.err (!%p7988_p6)
}
  0x50   : > { %s7992_s13 = scalar_lea.vmem %s271_s12, 6144  ;;  %p8000_p0 = scmp.lt.s32.totalorder %s271_s12, %s271_s12 }
  0x51   : > { %p7993_p9 = scmp.ne.s32.totalorder %s271_s12, %s7992_s13  ;;  %p8001_p5 = scmp.lt.s32.totalorder %s7992_s13, %s7992_s13 }
  0x53   : > { %p7995_p10 = pnand %p7993_p9, %p8240_p13  ;;  %p8002_p7 = por %p8001_p5, %p8000_p0 }
  0x55   : > { %p7996_p12 = pneg %p7995_p10 }
  0x57   : > { %p8003_p8 = pnand %p8002_p7, %p7996_p12 }
  0x59   : > { %8006 = shalt.err (!%p8003_p8)
}
  0x5a   : > { %s8106_s9 = smov 128   ;;  %s8107_s24 = smov 8  }
  0x5b   : > { %7289 = dma.hbm_to_vmem [thread:$0]  (!%p8225_p11), %s9459_s3, 6144, %s271_s12, [#allocation3], %s8106_s9, %s8106_s9, %s8107_s24  }
  0x5c   : > { %s8108_s14 = smov [#allocation8]   ;;  %s8007_s16 = scalar_lea.hbm %s9461_s5, 49152 }
  0x5d   : > { %s294_s15 = sshll.u32 %s8108_s14, 4  ;;  %p8008_p1 = scmp.ne.s32.totalorder %s9461_s5, %s8007_s16  ;;  %s295_s15 = int_to_ptr.vmem [resolvable:$true] %s294_s15 }
  0x5e   : > { %p8014_p4 = scmp.lt.u32.totalorder %s8007_s16, %s9461_s5 }
  0x5f   : > { %p8010_p2 = pnand %p8008_p1, %p8240_p13 }
  0x61   : > { %p8011_p3 = pneg %p8010_p2 }
  0x63   : > { %p8016_p6 = pnand %p8014_p4, %p8011_p3 }
  0x65   : > { %8019 = shalt.err (!%p8016_p6)
}
  0x66   : > { %s8020_s12 = scalar_lea.vmem %s295_s15, 49152  ;;  %p8028_p0 = scmp.lt.s32.totalorder %s295_s15, %s295_s15 }
  0x67   : > { %p8021_p9 = scmp.ne.s32.totalorder %s295_s15, %s8020_s12  ;;  %p8029_p5 = scmp.lt.s32.totalorder %s8020_s12, %s8020_s12 }
  0x69   : > { %p8023_p10 = pnand %p8021_p9, %p8240_p13  ;;  %p8030_p7 = por %p8029_p5, %p8028_p0 }
  0x6b   : > { %p8024_p12 = pneg %p8023_p10 }
  0x6d   : > { %p8031_p8 = pnand %p8030_p7, %p8024_p12 }
  0x6f   : > { %8034 = shalt.err (!%p8031_p8)
}
  0x70   : > { %s8109_s9 = smov 512   ;;  %s8110_s24 = smov 32  }
  0x71   : > { %7295 = dma.hbm_to_vmem [thread:$0]  (!%p8225_p11), %s9461_s5, 49152, %s295_s15, [#allocation7], %s8109_s9, %s8109_s9, %s8110_s24  }
  0x72   : > { %p9486_p1 = scmp.ne.s32.totalorder %s9479_s18, 0 }
  0x73   : > { %p9487_p2 = scmp.ne.s32.totalorder (!%p9486_p1), %s9480_s20, 0 }
  0x74   : > { %336 = sbr.rel (%p9486_p1) target bundleno = 1955 (0x7a3), region = 52 }
  0x7b   : > { %8064 = dma.done.wait (%p9487_p2), [#allocation4], 32  }
  0x7c   : > { %8066 = vsyncadd (%p9487_p2), [#allocation4], 4294967264 }
  0x7d   : > { %8068 = dma.done.wait (%p9487_p2), [#allocation3], 6144  }
  0x7e   : > { %8070 = vsyncadd (%p9487_p2), [#allocation3], 4294961152 }
  0x7f   : > { %8072 = dma.done.wait (%p9487_p2), [#allocation7], 49184  }
  0x80   : > { %8074 = vsyncadd (%p9487_p2), [#allocation7], 4294918112 }
  0x81   : > { %354 = sfence }
  0x82   : > { %v7369_v0 = vld [vmem:[#allocation5 + $0x4] ss:$8 sps:$4 sm:$0xff]   ;;  %v7371_v1 = vld [vmem:[#allocation5] ss:$8 sps:$4 sm:$0xff]   ;;  %v8111_v2 = vmov 0   ;;  %s6234_s18 = sshll.u32 %s8089_s30, 7 }
  0x83   : > { %817 = vmatprep.mubr.bf16.mxu0 %v8111_v2  ;;  %742 = vmatprep.subr.bf16.mxu1 %v7369_v0  ;;  %v7372_v3 = vld [vmem:[#allocation5 + $0x14] ss:$8 sps:$4 sm:$0xff]   ;;  %v7374_v4 = vld [vmem:[#allocation5 + $0x10] ss:$8 sps:$4 sm:$0xff]   ;;  %v7375_v5 = vld [vmem:[#allocation5 + $0x24] ss:$8 sps:$4 sm:$0xff]  }
  0x84   : > { %743 = vmatpush1.bf16.msra.mxu1 %v7371_v1  ;;  %v7377_v6 = vld [vmem:[#allocation5 + $0x20] ss:$8 sps:$4 sm:$0xff]   ;;  %v7378_v7 = vld [vmem:[#allocation5 + $0x34] ss:$8 sps:$4 sm:$0xff]   ;;  %v7380_v8 = vld [vmem:[#allocation5 + $0x30] ss:$8 sps:$4 sm:$0xff]  }
  0x85   : > { %744 = vmatprep.subr.bf16.mxu1 %v7372_v3  ;;  %v7393_v9 = vld [vmem:[#allocation5 + $0x104] ss:$8 sps:$4 sm:$0xff]   ;;  %v7397_v11 = vld [vmem:[#allocation5 + $0x100] ss:$8 sps:$4 sm:$0xff]   ;;  %v7399_v12 = vld [vmem:[#allocation5 + $0x114] ss:$8 sps:$4 sm:$0xff]  }
  0x86   : > { %v7381_v10 = vld [vmem:[#allocation5 + $0x44] ss:$8 sps:$4 sm:$0xff]   ;;  %785 = vmatprep.subr.bf16.mxu0 %v7393_v9  ;;  %v7383_v13 = vld [vmem:[#allocation5 + $0x40] ss:$8 sps:$4 sm:$0xff]   ;;  %v7384_v14 = vld [vmem:[#allocation5 + $0x54] ss:$8 sps:$4 sm:$0xff]  }
  0x87   : > { %786 = vmatpush1.bf16.msra.mxu0 %v7397_v11  ;;  %v7403_v15 = vld [vmem:[#allocation5 + $0x110] ss:$8 sps:$4 sm:$0xff]   ;;  %v7405_v16 = vld [vmem:[#allocation5 + $0x124] ss:$8 sps:$4 sm:$0xff]   ;;  %p391_p11 = scmp.lt.s32.totalorder %s8085_s29, 1  ;;  %s408_s20 = sadd.s32 1, %s6234_s18 }
  0x88   : > { %745 = vmatpush1.bf16.msra.mxu1 %v7374_v4  ;;  %787 = vmatprep.subr.bf16.mxu0 %v7399_v12  ;;  %v7386_v17 = vld [vmem:[#allocation5 + $0x50] ss:$8 sps:$4 sm:$0xff]   ;;  %v7409_v18 = vld [vmem:[#allocation5 + $0x120] ss:$8 sps:$4 sm:$0xff]   ;;  %v7411_v19 = vld [vmem:[#allocation5 + $0x134] ss:$8 sps:$4 sm:$0xff]  }
  0x89   : > { %746 = vmatprep.subr.bf16.mxu1 %v7375_v5  ;;  %v7387_v20 = vld [vmem:[#allocation5 + $0x64] ss:$8 sps:$4 sm:$0xff]   ;;  %s392_s22 = scalar_select %p391_p11, %s8085_s29, 1  ;;  %v7415_v21 = vld [vmem:[#allocation5 + $0x130] ss:$8 sps:$4 sm:$0xff]   ;;  %vm438_vm0 = vcmask 1047552  }
  0x8a   : > { %s8325_s25 = sld [smem:[#allocation2 + %s6234_s18]]  ;;  %v7389_v22 = vld [vmem:[#allocation5 + $0x60] ss:$8 sps:$4 sm:$0xff]   ;;  %v7417_v23 = vld [vmem:[#allocation5 + $0x144] ss:$8 sps:$4 sm:$0xff]   ;;  %vm431_vm3 = vcmask 1040384  }
  0x8b   : > { %788 = vmatpush1.bf16.msra.mxu0 %v7403_v15  ;;  %s8327_s19 = sld [smem:[#allocation2 + %s408_s20]]  ;;  %v7390_v24 = vld [vmem:[#allocation5 + $0x74] ss:$8 sps:$4 sm:$0xff]   ;;  %v7392_v25 = vld [vmem:[#allocation5 + $0x70] ss:$8 sps:$4 sm:$0xff]   ;;  %s7173_s4 = sshll.u32 %s392_s22, 4 }
  0x8c   : > { %747 = vmatpush1.bf16.msra.mxu1 %v7377_v6  ;;  %789 = vmatprep.subr.bf16.mxu0 %v7405_v16  ;;  %v7421_v26 = vld [vmem:[#allocation5 + $0x140] ss:$8 sps:$4 sm:$0xff]   ;;  %v7423_v27 = vld [vmem:[#allocation5 + $0x154] ss:$8 sps:$4 sm:$0xff]   ;;  %v7395_v28 = vld [vmem:[#allocation5 + $0x84] ss:$8 sps:$4 sm:$0xff]   ;;  %s395_s21 = scalar_lea.vmem %s9457_s1, %s7173_s4  ;;  %s400_s23 = scalar_lea.vmem %s9458_s2, %s7173_s4 }
  0x8d   : > { %748 = vmatprep.subr.bf16.mxu1 %v7378_v7  ;;  %v7427_v29 = vld [vmem:[#allocation5 + $0x150] ss:$8 sps:$4 sm:$0xff]   ;;  %v7398_v32 = vld [vmem:[#allocation5 + $0x80] ss:$8 sps:$4 sm:$0xff]   ;;  %v7401_v33 = vld [vmem:[#allocation5 + $0x94] ss:$8 sps:$4 sm:$0xff]  }
  0x8e   : > { %v7429_v34 = vld [vmem:[#allocation5 + $0x164] ss:$8 sps:$4 sm:$0xff]   ;;  %v7433_v42 = vld [vmem:[#allocation5 + $0x160] ss:$8 sps:$4 sm:$0xff]   ;;  %v7404_v44 = vld [vmem:[#allocation5 + $0x90] ss:$8 sps:$4 sm:$0xff]  }
  0x8f   : > { %790 = vmatpush1.bf16.msra.mxu0 %v7409_v18  ;;  %v410_v35 = vld [vmem:[%s395_s21] sm:$0xff]  ;;  %v411_v36 = vld [vmem:[%s395_s21 + $0x8] sm:$0xff]  ;;  %v7435_v45 = vld [vmem:[#allocation5 + $0x174] ss:$8 sps:$4 sm:$0xff]   ;;  %vm439_vm1 = vsmask.f32 7424 }
  0x90   : > { %749 = vmatpush1.bf16.msra.mxu1 %v7380_v8  ;;  %791 = vmatprep.subr.bf16.mxu0 %v7411_v19  ;;  %v412_v30 = vstv %s8325_s25  ;;  %v415_v37 = vld [vmem:[%s400_s23] sm:$0xff]  ;;  %v416_v40 = vld [vmem:[%s400_s23 + $0x8] sm:$0xff]  ;;  %v7439_v51 = vld [vmem:[#allocation5 + $0x170] ss:$8 sps:$4 sm:$0xff]   ;;  %vm432_vm4 = vsmask.f32 256 }
  0x91   : > { %750 = vmatprep.subr.bf16.mxu1 %v7381_v10  ;;  %v417_v31 = vstv %s8327_s19  ;;  %v413_v38 = vmul.f32 %v412_v30, %v410_v35  ;;  %v414_v39 = vmul.f32 %v412_v30, %v411_v36  ;;  %v7407_v47 = vld [vmem:[#allocation5 + $0xa4] ss:$8 sps:$4 sm:$0xff]   ;;  %v7410_v53 = vld [vmem:[#allocation5 + $0xa0] ss:$8 sps:$4 sm:$0xff]   ;;  %v7413_v55 = vld [vmem:[#allocation5 + $0xb4] ss:$8 sps:$4 sm:$0xff]  }
  0x92   : > { %v418_v41 = vmul.f32 %v417_v31, %v415_v37  ;;  %v419_v43 = vmul.f32 %v417_v31, %v416_v40  ;;  %v985_v49 = vld [vmem:[#allocation8 + $0x408] sm:$0xff]  ;;  %vm8342_vm2 = vmand %vm438_vm0, %vm439_vm1  ;;  %v7425_v7 = vld [vmem:[#allocation5 + $0xd4] ss:$8 sps:$4 sm:$0xff]   ;;  %p401_p13 = scmp.lt.s32.totalorder %s8089_s30, 1  ;;  %s388_s26 = sand.u32 1, %s8077_s27  }
  0x93   : > { %792 = vmatpush1.bf16.msra.mxu0 %v7415_v21  ;;  %v989_v50 = vld [vmem:[#allocation8 + $0x428] sm:$0xff]  ;;  %vm8348_vm5 = vmand %vm431_vm3, %vm432_vm4  ;;  %v864_v30 = vld [vmem:[#allocation8 + $0x40] sm:$0xff]  ;;  %s6228_s0 = sshll.u32 %s388_s26, 6  ;;  %p9492_p3 = scmp.ne.s32.totalorder %s9477_s17, 0 }
  0x94   : > { %751 = vmatpush1.bf16.msra.mxu1 %v7383_v13  ;;  %793 = vmatprep.subr.bf16.mxu0 %v7417_v23  ;;  %v420_v46 = vadd.f32 %v418_v41, %v413_v38  ;;  %v421_v48 = vadd.f32 %v419_v43, %v414_v39  ;;  %v6414_v54 = vcombine.high %v985_v49, %v989_v50  ;;  %v993_v59 = vld [vmem:[#allocation8 + $0x448] sm:$0xff]  ;;  %v860_v23 = vld [vmem:[#allocation8 + $0x20] sm:$0xff]  ;;  %s402_s14 = scalar_select %p401_p13, %s8089_s30, 1 }
  0x95   : > { %752 = vmatprep.subr.bf16.mxu1 %v7384_v14  ;;  %v997_v60 = vld [vmem:[#allocation8 + $0x468] sm:$0xff]  ;;  %v6413_v1 = vcombine.low %v985_v49, %v989_v50  ;;  %v868_v31 = vld [vmem:[#allocation8 + $0x60] sm:$0xff]  ;;  %s8884_s18 = scalar_lea.vmem [#allocation9], %s6228_s0  ;;  %v7788_v14 = vld [vmem:[%s9463_s7 + $0x734] ss:$8 sps:$4 sm:$0xff]   ;;  %s7169_s4 = sshll.u32 (%p9492_p3), %s8089_s30, 4 }
  0x96   : > { %v8337_v52 = vpack.c.bf16 %v421_v48, %v420_v46  ;;  %v7416_v61 = vld [vmem:[#allocation5 + $0xb0] ss:$8 sps:$4 sm:$0xff]   ;;  %v7419_v63 = vld [vmem:[#allocation5 + $0xc4] ss:$8 sps:$4 sm:$0xff]   ;;  %v6422_v2 = vcombine.high %v993_v59, %v997_v60  ;;  %v7422_v6 = vld [vmem:[#allocation5 + $0xc0] ss:$8 sps:$4 sm:$0xff]   ;;  %v6421_v8 = vcombine.low %v993_v59, %v997_v60  ;;  %v6292_v41 = vcombine.high %v864_v30, %v868_v31 }
  0x97   : > { %794 = vmatpush1.bf16.msra.mxu0 %v7421_v26  ;;  %v1001_v4 = vld [vmem:[#allocation8 + $0x488] sm:$0xff]  ;;  %v872_v39 = vld [vmem:[#allocation8 + $0x80] sm:$0xff]  ;;  %v6291_v46 = vcombine.low %v864_v30, %v868_v31  ;;  %s6233_s15 = sshll.u32 %s402_s14, 3 }
  0x98   : > { %753 = vmatpush1.bf16.msra.mxu1 %v7386_v17  ;;  %795 = vmatprep.subr.bf16.mxu0 %v7423_v27  ;;  %v424_v56 = vshrl.u32 %v8337_v52, 16  ;;  %v427_v57 = vshll.u32 %v8337_v52, 16  ;;  %v1005_v5 = vld [vmem:[#allocation8 + $0x4a8] sm:$0xff]  ;;  %v876_v40 = vld [vmem:[#allocation8 + $0xa0] sm:$0xff]  ;;  %s8532_s16 = scalar_lea.vmem %s9462_s6, %s6233_s15 }
  0x99   : > { %754 = vmatprep.subr.bf16.mxu1 %v7387_v20  ;;  %774 = vmatprep.mubr.bf16.mxu1 %v8337_v52  ;;  %v6430_v9 = vcombine.high %v1001_v4, %v1005_v5  ;;  %v7428_v10 = vld [vmem:[#allocation5 + $0xd0] ss:$8 sps:$4 sm:$0xff]   ;;  %v7431_v13 = vld [vmem:[#allocation5 + $0xe4] ss:$8 sps:$4 sm:$0xff]   ;;  %v6429_v15 = vcombine.low %v1001_v4, %v1005_v5  ;;  %v7434_v18 = vld [vmem:[#allocation5 + $0xe0] ss:$8 sps:$4 sm:$0xff]   ;;  %v6300_v49 = vcombine.high %v872_v39, %v876_v40 }
  0x9a   : > { %v435_v58 = vrot.slane %v427_v57, 1  ;;  %v1009_v11 = vld [vmem:[#allocation8 + $0x4c8] sm:$0xff]  ;;  %v7437_v20 = vld [vmem:[#allocation5 + $0xf4] ss:$8 sps:$4 sm:$0xff]   ;;  %v426_v21 = vrot.slane %v424_v56, 7  ;;  %v884_v48 = vld [vmem:[#allocation8 + $0xe0] sm:$0xff] }
  0x9b   : > { %796 = vmatpush1.bf16.msra.mxu0 %v7427_v29  ;;  %v1013_v12 = vld [vmem:[#allocation8 + $0x4e8] sm:$0xff] }
  0x9c   : > { %755 = vmatpush1.bf16.msra.mxu1 %v7389_v22  ;;  %797 = vmatprep.subr.bf16.mxu0 %v7429_v34  ;;  %v436_v0 = vor.u32 %v435_v58, %v424_v56  ;;  %v1017_v16 = vld [vmem:[#allocation8 + $0x508] sm:$0xff]  ;;  %v6438_v19 = vcombine.high %v1009_v11, %v1013_v12  ;;  %v856_v22 = vld [vmem:[#allocation8] sm:$0xff]  ;;  %v429_v29 = vor.u32 %v427_v57, %v426_v21 }
  0x9d   : > { %756 = vmatprep.subr.bf16.mxu1 %v7390_v24  ;;  %v1021_v17 = vld [vmem:[#allocation8 + $0x528] sm:$0xff]  ;;  %v6437_v24 = vcombine.low %v1009_v11, %v1013_v12  ;;  %v6283_v38 = vcombine.low %v856_v22, %v860_v23  ;;  %v892_v56 = vld [vmem:[#allocation8 + $0x120] sm:$0xff] }
  0x9e   : > { %v441_v3 = vsel %vm8342_vm2, %v436_v0, 0  ;;  %v1029_v26 = vld [vmem:[#allocation8 + $0x568] sm:$0xff]  ;;  %v434_v37 = vsel %vm8348_vm5, 0, %v429_v29  ;;  %v896_v0 = vld [vmem:[#allocation8 + $0x140] sm:$0xff] }
  0x9f   : > { %798 = vmatpush1.bf16.msra.mxu0 %v7433_v42  ;;  %v7440_v27 = vld [vmem:[#allocation5 + $0xf0] ss:$8 sps:$4 sm:$0xff]  }
  0xa0   : > { %757 = vmatpush1.bf16.msra.mxu1 %v7392_v25  ;;  %799 = vmatprep.subr.bf16.mxu0 %v7435_v45  ;;  %v1025_v25 = vld [vmem:[#allocation8 + $0x548] sm:$0xff] }
  0xa1   : > { %758 = vmatprep.subr.bf16.mxu1 %v7395_v28  ;;  %v6446_v28 = vcombine.high %v1017_v16, %v1021_v17  ;;  %v1033_v34 = vld [vmem:[#allocation8 + $0x588] sm:$0xff]  ;;  %v6454_v36 = vcombine.high %v1025_v25, %v1029_v26  ;;  %v6453_v42 = vcombine.low %v1025_v25, %v1029_v26  ;;  %v920_v25 = vld [vmem:[#allocation8 + $0x200] sm:$0xff] }
  0xa2   : > { %v1037_v35 = vld [vmem:[#allocation8 + $0x5a8] sm:$0xff]  ;;  %v924_v26 = vld [vmem:[#allocation8 + $0x220] sm:$0xff] }
  0xa3   : > { %800 = vmatpush1.bf16.msra.mxu0 %v7439_v51  ;;  %v1041_v43 = vld [vmem:[#allocation8 + $0x5c8] sm:$0xff]  ;;  %v6462_v45 = vcombine.high %v1033_v34, %v1037_v35  ;;  %v6461_v50 = vcombine.low %v1033_v34, %v1037_v35  ;;  %v932_v34 = vld [vmem:[#allocation8 + $0x260] sm:$0xff]  ;;  %v6348_v35 = vcombine.high %v920_v25, %v924_v26 }
  0xa4   : > { %759 = vmatpush1.bf16.msra.mxu1 %v7398_v32  ;;  %3374 = vmatprep.subr.bf16.mxu0 %v6414_v54  ;;  %v6284_v32 = vcombine.high %v856_v22, %v860_v23  ;;  %v1049_v51 = vld [vmem:[#allocation8 + $0x608] sm:$0xff]  ;;  %v6299_v54 = vcombine.low %v872_v39, %v876_v40  ;;  %v936_v39 = vld [vmem:[#allocation8 + $0x280] sm:$0xff] }
  0xa5   : > { %760 = vmatprep.subr.bf16.mxu1 %v7401_v33  ;;  %v6445_v33 = vcombine.low %v1017_v16, %v1021_v17  ;;  %v1053_v52 = vld [vmem:[#allocation8 + $0x628] sm:$0xff]  ;;  %v912_v17 = vld [vmem:[#allocation8 + $0x1c0] sm:$0xff] }
  0xa6   : > { %818 = vmatmul.mubr.bf16.vlgmr.msra.gmra.mrb[0].mxu0 %v441_v3  ;;  %v1057_v59 = vld [vmem:[#allocation8 + $0x648] sm:$0xff]  ;;  %v6477_v3 = vcombine.low %v1049_v51, %v1053_v52  ;;  %v940_v40 = vld [vmem:[#allocation8 + $0x2a0] sm:$0xff] }
  0xa7   : > { %3375 = vmatpush1.bf16.msra.mxu0 %v6413_v1  ;;  %v1061_v60 = vld [vmem:[#allocation8 + $0x668] sm:$0xff]  ;;  %v900_v1 = vld [vmem:[#allocation8 + $0x160] sm:$0xff] }
  0xa8   : > { %761 = vmatpush1.bf16.msra.mxu1 %v7404_v44  ;;  %3376 = vmatprep.subr.bf16.mxu0 %v6422_v2  ;;  %v1045_v44 = vld [vmem:[#allocation8 + $0x5e8] sm:$0xff]  ;;  %v6485_v11 = vcombine.low %v1057_v59, %v1061_v60  ;;  %v6323_v16 = vcombine.low %v896_v0, %v900_v1 }
  0xa9   : > { %762 = vmatprep.subr.bf16.mxu1 %v7407_v47  ;;  %v880_v47 = vld [vmem:[#allocation8 + $0xc0] sm:$0xff]  ;;  %v6469_v58 = vcombine.low %v1041_v43, %v1045_v44  ;;  %v1065_v4 = vld [vmem:[#allocation8 + $0x688] sm:$0xff] }
  0xaa   : > { %v6308_v57 = vcombine.high %v880_v47, %v884_v48  ;;  %v1069_v5 = vld [vmem:[#allocation8 + $0x6a8] sm:$0xff] }
  0xab   : > { %3377 = vmatpush1.bf16.msra.mxu0 %v6421_v8  ;;  %v904_v8 = vld [vmem:[#allocation8 + $0x180] sm:$0xff]  ;;  %v1073_v12 = vld [vmem:[#allocation8 + $0x6c8] sm:$0xff] }
  0xac   : > { %763 = vmatpush1.bf16.msra.mxu1 %v7410_v53  ;;  %3378 = vmatprep.subr.bf16.mxu0 %v6430_v9  ;;  %v6470_v53 = vcombine.high %v1041_v43, %v1045_v44  ;;  %v908_v9 = vld [vmem:[#allocation8 + $0x1a0] sm:$0xff]  ;;  %v1081_v21 = vld [vmem:[#allocation8 + $0x708] sm:$0xff] }
  0xad   : > { %764 = vmatprep.subr.bf16.mxu1 %v7413_v55  ;;  %v888_v55 = vld [vmem:[#allocation8 + $0x100] sm:$0xff]  ;;  %v1085_v22 = vld [vmem:[#allocation8 + $0x728] sm:$0xff] }
  0xae   : > { %v6316_v2 = vcombine.high %v888_v55, %v892_v56  ;;  %v1089_v29 = vld [vmem:[#allocation8 + $0x748] sm:$0xff]  ;;  %v6510_v31 = vcombine.high %v1081_v21, %v1085_v22  ;;  %v944_v44 = vld [vmem:[#allocation8 + $0x2c0] sm:$0xff] }
  0xaf   : > { %3379 = vmatpush1.bf16.msra.mxu0 %v6429_v15  ;;  %v6494_v15 = vcombine.high %v1065_v4, %v1069_v5  ;;  %v1093_v30 = vld [vmem:[#allocation8 + $0x768] sm:$0xff] }
  0xb0   : > { %765 = vmatpush1.bf16.msra.mxu1 %v7416_v61  ;;  %3380 = vmatprep.subr.bf16.mxu0 %v6438_v19  ;;  %v6478_v61 = vcombine.high %v1049_v51, %v1053_v52  ;;  %v6332_v19 = vcombine.high %v904_v8, %v908_v9  ;;  %v956_v51 = vld [vmem:[#allocation8 + $0x320] sm:$0xff] }
  0xb1   : > { %766 = vmatprep.subr.bf16.mxu1 %v7419_v63  ;;  %v6307_v63 = vcombine.low %v880_v47, %v884_v48  ;;  %v6363_v47 = vcombine.low %v936_v39, %v940_v40 }
  0xb3   : > { %3381 = vmatpush1.bf16.msra.mxu0 %v6437_v24  ;;  %v6331_v24 = vcombine.low %v904_v8, %v908_v9 }
  0xb4   : > { %767 = vmatpush1.bf16.msra.mxu1 %v7422_v6  ;;  %3382 = vmatprep.subr.bf16.mxu0 %v6446_v28  ;;  %v6486_v6 = vcombine.high %v1057_v59, %v1061_v60  ;;  %v964_v59 = vld [vmem:[#allocation8 + $0x360] sm:$0xff] }
  0xb5   : > { %768 = vmatprep.subr.bf16.mxu1 %v7425_v7  ;;  %v6315_v7 = vcombine.low %v888_v55, %v892_v56 }
  0xb7   : > { %3383 = vmatpush1.bf16.msra.mxu0 %v6445_v33  ;;  %v928_v33 = vld [vmem:[#allocation8 + $0x240] sm:$0xff] }
  0xb8   : > { %769 = vmatpush1.bf16.msra.mxu1 %v7428_v10  ;;  %3384 = vmatprep.subr.bf16.mxu0 %v6454_v36  ;;  %v6324_v10 = vcombine.high %v896_v0, %v900_v1  ;;  %v6509_v36 = vcombine.low %v1081_v21, %v1085_v22  ;;  %v6355_v43 = vcombine.low %v928_v33, %v932_v34 }
  0xb9   : > { %770 = vmatprep.subr.bf16.mxu1 %v7431_v13  ;;  %v1077_v13 = vld [vmem:[#allocation8 + $0x6e8] sm:$0xff] }
  0xba   : > { %v6502_v23 = vcombine.high %v1073_v12, %v1077_v13  ;;  %v6501_v28 = vcombine.low %v1073_v12, %v1077_v13  ;;  %v980_v12 = vld [vmem:[#allocation8 + $0x3e0] sm:$0xff] }
  0xbb   : > { %3385 = vmatpush1.bf16.msra.mxu0 %v6453_v42  ;;  %v6517_v42 = vcombine.low %v1089_v29, %v1093_v30 }
  0xbc   : > { %771 = vmatpush1.bf16.msra.mxu1 %v7434_v18  ;;  %3386 = vmatprep.subr.bf16.mxu0 %v6462_v45  ;;  %v916_v18 = vld [vmem:[#allocation8 + $0x1e0] sm:$0xff] }
  0xbd   : > { %772 = vmatprep.subr.bf16.mxu1 %v7437_v20  ;;  %v6493_v20 = vcombine.low %v1065_v4, %v1069_v5  ;;  %v948_v45 = vld [vmem:[#allocation8 + $0x2e0] sm:$0xff] }
  0xbe   : > { %v6372_v48 = vcombine.high %v944_v44, %v948_v45  ;;  %v972_v4 = vld [vmem:[#allocation8 + $0x3a0] sm:$0xff] }
  0xbf   : > { %3387 = vmatpush1.bf16.msra.mxu0 %v6461_v50  ;;  %v952_v50 = vld [vmem:[#allocation8 + $0x300] sm:$0xff] }
  0xc0   : > { %773 = vmatpush1.bf16.msra.mxu1 %v7440_v27  ;;  %3388 = vmatprep.subr.bf16.mxu0 %v6470_v53  ;;  %v6340_v27 = vcombine.high %v912_v17, %v916_v18  ;;  %v6380_v52 = vcombine.high %v952_v50, %v956_v51  ;;  %v1097_v53 = vld [vmem:[#allocation8 + $0x788] sm:$0xff]  ;;  %v6379_v55 = vcombine.low %v952_v50, %v956_v51 }
  0xc1   : > { %3202 = vmatprep.subr.bf16.mxu1 %v6284_v32  ;;  %v6339_v32 = vcombine.low %v912_v17, %v916_v18  ;;  %v8356_v17 = vld [vmem:[#allocation8 + $0x420] sm:$0xff] }
  0xc3   : > { %775 = vmatmul.mubr.bf16.vlgmr.msra.gmra.mrb[0].mxu1 %v434_v37  ;;  %3389 = vmatpush1.bf16.msra.mxu0 %v6469_v58  ;;  %v6518_v37 = vcombine.high %v1089_v29, %v1093_v30  ;;  %v960_v58 = vld [vmem:[#allocation8 + $0x340] sm:$0xff] }
  0xc4   : > { %3203 = vmatpush1.bf16.msra.mxu1 %v6283_v38  ;;  %3390 = vmatprep.subr.bf16.mxu0 %v6478_v61  ;;  %v6347_v38 = vcombine.low %v920_v25, %v924_v26  ;;  %v6388_v60 = vcombine.high %v960_v58, %v964_v59  ;;  %v1105_v61 = vld [vmem:[#allocation8 + $0x7c8] sm:$0xff]  ;;  %v6387_v0 = vcombine.low %v960_v58, %v964_v59  ;;  %v992_v59 = vld [vmem:[#allocation8 + $0x440] sm:$0xff] }
  0xc5   : > { %3204 = vmatprep.subr.bf16.mxu1 %v6292_v41  ;;  %v6356_v41 = vcombine.high %v928_v33, %v932_v34 }
  0xc7   : > { %3391 = vmatpush1.bf16.msra.mxu0 %v6477_v3  ;;  %v968_v3 = vld [vmem:[#allocation8 + $0x380] sm:$0xff] }
  0xc8   : > { %3205 = vmatpush1.bf16.msra.mxu1 %v6291_v46  ;;  %3392 = vmatprep.subr.bf16.mxu0 %v6486_v6  ;;  %v6364_v46 = vcombine.high %v936_v39, %v940_v40  ;;  %v6396_v5 = vcombine.high %v968_v3, %v972_v4  ;;  %v1113_v6 = vld [vmem:[#allocation8 + $0x808] sm:$0xff]  ;;  %v6395_v8 = vcombine.low %v968_v3, %v972_v4 }
  0xc9   : > { %3206 = vmatprep.subr.bf16.mxu1 %v6300_v49  ;;  %v6371_v49 = vcombine.low %v944_v44, %v948_v45  ;;  %v1125_v44 = vld [vmem:[#allocation8 + $0x868] sm:$0xff] }
  0xcb   : > { %3393 = vmatpush1.bf16.msra.mxu0 %v6485_v11  ;;  %v976_v11 = vld [vmem:[#allocation8 + $0x3c0] sm:$0xff] }
  0xcc   : > { %3207 = vmatpush1.bf16.msra.mxu1 %v6299_v54  ;;  %3394 = vmatprep.subr.bf16.mxu0 %v6494_v15  ;;  %v1101_v54 = vld [vmem:[#allocation8 + $0x7a8] sm:$0xff]  ;;  %v6403_v13 = vcombine.low %v976_v11, %v980_v12  ;;  %v6404_v15 = vcombine.high %v976_v11, %v980_v12 }
  0xcd   : > { %3208 = vmatprep.subr.bf16.mxu1 %v6308_v57  ;;  %v6526_v56 = vcombine.high %v1097_v53, %v1101_v54  ;;  %v6525_v57 = vcombine.low %v1097_v53, %v1101_v54  ;;  %v1129_v53 = vld [vmem:[#allocation8 + $0x888] sm:$0xff] }
  0xce   : > { %v1133_v54 = vld [vmem:[#allocation8 + $0x8a8] sm:$0xff] }
  0xcf   : > { %3395 = vmatpush1.bf16.msra.mxu0 %v6493_v20  ;;  %v1145_v11 = vld [vmem:[#allocation8 + $0x908] sm:$0xff] }
  0xd0   : > { %3209 = vmatpush1.bf16.msra.mxu1 %v6307_v63  ;;  %3396 = vmatprep.subr.bf16.mxu0 %v6502_v23  ;;  %v1109_v63 = vld [vmem:[#allocation8 + $0x7e8] sm:$0xff] }
  0xd1   : > { %3210 = vmatprep.subr.bf16.mxu1 %v6316_v2  ;;  %v6534_v1 = vcombine.high %v1105_v61, %v1109_v63  ;;  %v6533_v2 = vcombine.low %v1105_v61, %v1109_v63  ;;  %v1149_v12 = vld [vmem:[#allocation8 + $0x928] sm:$0xff] }
  0xd3   : > { %3397 = vmatpush1.bf16.msra.mxu0 %v6501_v28 }
  0xd4   : > { %3211 = vmatpush1.bf16.msra.mxu1 %v6315_v7  ;;  %3398 = vmatprep.subr.bf16.mxu0 %v6510_v31  ;;  %v1117_v7 = vld [vmem:[#allocation8 + $0x828] sm:$0xff] }
  0xd5   : > { %3212 = vmatprep.subr.bf16.mxu1 %v6324_v10  ;;  %v6542_v9 = vcombine.high %v1113_v6, %v1117_v7  ;;  %v6541_v10 = vcombine.low %v1113_v6, %v1117_v7 }
  0xd7   : > { %3399 = vmatpush1.bf16.msra.mxu0 %v6509_v36 }
  0xd8   : > { %3213 = vmatpush1.bf16.msra.mxu1 %v6323_v16  ;;  %3400 = vmatprep.subr.bf16.mxu0 %v6518_v37  ;;  %v8354_v16 = vld [vmem:[#allocation8 + $0x400] sm:$0xff] }
  0xd9   : > { %3214 = vmatprep.subr.bf16.mxu1 %v6332_v19  ;;  %v6412_v18 = vcombine.high %v8354_v16, %v8356_v17  ;;  %v6411_v19 = vcombine.low %v8354_v16, %v8356_v17 }
  0xdb   : > { %3401 = vmatpush1.bf16.msra.mxu0 %v6517_v42 }
  0xdc   : > { %3215 = vmatpush1.bf16.msra.mxu1 %v6331_v24  ;;  %3402 = vmatprep.subr.bf16.mxu0 %v6526_v56  ;;  %v492_v24 = vlaneseq }
  0xdd   : > { %3216 = vmatprep.subr.bf16.mxu1 %v6340_v27  ;;  %v490_v27 = vld [vmem:[#allocation6] sm:$0x3] }
  0xde   : > { %v8362_v25 = vshrl.u32 %v492_v24, 7  ;;  %v1157_v24 = vld [vmem:[#allocation8 + $0x968] sm:$0xff] }
  0xdf   : > { %3403 = vmatpush1.bf16.msra.mxu0 %v6525_v57 }
  0xe0   : > { %3217 = vmatpush1.bf16.msra.mxu1 %v6339_v32  ;;  %3404 = vmatprep.subr.bf16.mxu0 %v6534_v1  ;;  %v494_v26 = vsub.s32 0, %v8362_v25  ;;  %v498_v28 = vsub.s32 1, %v8362_v25  ;;  %v1137_v1 = vld [vmem:[#allocation8 + $0x8c8] sm:$0xff] }
  0xe1   : > { %3218 = vmatprep.subr.bf16.mxu1 %v6348_v35 }
  0xe2   : > { %v495_v29 = vrot.slane %v490_v27, %v494_v26  ;;  %v499_v30 = vrot.slane %v490_v27, %v498_v28 }
  0xe3   : > { %3405 = vmatpush1.bf16.msra.mxu0 %v6533_v2  ;;  %v1141_v2 = vld [vmem:[#allocation8 + $0x8e8] sm:$0xff] }
  0xe4   : > { %3219 = vmatpush1.bf16.msra.mxu1 %v6347_v38  ;;  %3417 = vmatprep.subr.bf16.mxu0 %v6542_v9  ;;  %v1000_v9 = vld [vmem:[#allocation8 + $0x480] sm:$0xff] }
  0xe5   : > { %3220 = vmatprep.subr.bf16.mxu1 %v6356_v41 }
  0xe8   : > { %3221 = vmatpush1.bf16.msra.mxu1 %v6355_v43  ;;  %v1121_v43 = vld [vmem:[#allocation8 + $0x848] sm:$0xff] }
  0xe9   : > { %3222 = vmatprep.subr.bf16.mxu1 %v6364_v46 }
  0xec   : > { %3223 = vmatpush1.bf16.msra.mxu1 %v6363_v47  ;;  %v6550_v47 = vcombine.high %v1121_v43, %v1125_v44 }
  0xed   : > { %3224 = vmatprep.subr.bf16.mxu1 %v6372_v48 }
  0xf0   : > { %3225 = vmatpush1.bf16.msra.mxu1 %v6371_v49 }
  0xf1   : > { %3226 = vmatprep.subr.bf16.mxu1 %v6380_v52 }
  0xf4   : > { %3227 = vmatpush1.bf16.msra.mxu1 %v6379_v55  ;;  %v6549_v55 = vcombine.low %v1121_v43, %v1125_v44 }
  0xf5   : > { %3228 = vmatprep.subr.bf16.mxu1 %v6388_v60  ;;  %v996_v60 = vld [vmem:[#allocation8 + $0x460] sm:$0xff] }
  0xf6   : > { %v6420_v6 = vcombine.high %v992_v59, %v996_v60 }
  0xf8   : > { %3229 = vmatpush1.bf16.msra.mxu1 %v6387_v0  ;;  %v6558_v0 = vcombine.high %v1129_v53, %v1133_v54 }
  0xf9   : > { %3230 = vmatprep.subr.bf16.mxu1 %v6396_v5  ;;  %v6557_v5 = vcombine.low %v1129_v53, %v1133_v54 }
  0xfc   : > { %3231 = vmatpush1.bf16.msra.mxu1 %v6395_v8  ;;  %v6566_v8 = vcombine.high %v1137_v1, %v1141_v2 }
  0xfd   : > { %3232 = vmatprep.subr.bf16.mxu1 %v6404_v15  ;;  %v6565_v15 = vcombine.low %v1137_v1, %v1141_v2  ;;  %v1048_v2 = vld [vmem:[#allocation8 + $0x600] sm:$0xff] }
 0x100   : > { %3233 = vmatpush1.bf16.msra.mxu1 %v6403_v13  ;;  %v6419_v13 = vcombine.low %v992_v59, %v996_v60  ;;  %v1185_v59 = vld [vmem:[#allocation8 + $0xa48] sm:$0xff] }
 0x101   : > { %3245 = vmatprep.subr.bf16.mxu1 %v6412_v18  ;;  %v1189_v60 = vld [vmem:[#allocation8 + $0xa68] sm:$0xff] }
 0x102   : > { %v6614_v1 = vcombine.high %v1185_v59, %v1189_v60 }
 0x179   : > { %v819_v20 = vpop.f32.mrb[0].mxu0 }
 0x17a   : > { %v821_v21 = vpop.f32.mrb[1].mxu0 }
 0x17b   : > { %v823_v22 = vpop.f32.mrb[2].mxu0 }
 0x17c   : > { %v825_v23 = vpop.f32.mrb[3].mxu0 }
 0x196   : > { %v776_v31 = vpop.f32.mrb[0].mxu1 }
 0x197   : > { %v777_v32 = vadd.f32 %v776_v31, %v495_v29  ;;  %v778_v33 = vpop.f32.mrb[1].mxu1  ;;  %v1161_v31 = vld [vmem:[#allocation8 + $0x988] sm:$0xff] }
 0x198   : > { %v779_v34 = vadd.f32 %v778_v33, %v499_v30  ;;  %v780_v35 = vpop.f32.mrb[2].mxu1 }
 0x199   : > { %v820_v36 = vadd.f32 %v819_v20, %v777_v32  ;;  %v781_v37 = vadd.f32 %v780_v35, %v495_v29  ;;  %v782_v38 = vpop.f32.mrb[3].mxu1  ;;  %v6574_v20 = vcombine.high %v1145_v11, %v1149_v12  ;;  %v6573_v29 = vcombine.low %v1145_v11, %v1149_v12  ;;  %v1165_v32 = vld [vmem:[#allocation8 + $0x9a8] sm:$0xff] }
 0x19a   : > { %v822_v39 = vadd.f32 %v821_v21, %v779_v34  ;;  %v783_v40 = vadd.f32 %v782_v38, %v499_v30  ;;  %v1008_v21 = vld [vmem:[#allocation8 + $0x4c0] sm:$0xff] }
 0x19b   : > { %v824_v41 = vadd.f32 %v823_v22, %v781_v37  ;;  %v1012_v22 = vld [vmem:[#allocation8 + $0x4e0] sm:$0xff] }
 0x19c   : > { %v826_v42 = vadd.f32 %v825_v23, %v783_v40  ;;  %v1153_v23 = vld [vmem:[#allocation8 + $0x948] sm:$0xff]  ;;  %v6436_v16 = vcombine.high %v1008_v21, %v1012_v22  ;;  %v1020_v30 = vld [vmem:[#allocation8 + $0x520] sm:$0xff]  ;;  %v6435_v33 = vcombine.low %v1008_v21, %v1012_v22 }
 0x19d   : > { %v8370_v45 = vpack.c.bf16 %v824_v41, %v820_v36  ;;  %v6582_v17 = vcombine.high %v1153_v23, %v1157_v24  ;;  %v6581_v34 = vcombine.low %v1153_v23, %v1157_v24  ;;  %v6590_v36 = vcombine.high %v1161_v31, %v1165_v32  ;;  %v1024_v37 = vld [vmem:[#allocation8 + $0x540] sm:$0xff]  ;;  %v1173_v40 = vld [vmem:[#allocation8 + $0x9e8] sm:$0xff] }
 0x19e   : > { %v8372_v46 = vpack.c.bf16 %v826_v42, %v822_v39  ;;  %v1028_v38 = vld [vmem:[#allocation8 + $0x560] sm:$0xff]  ;;  %v1169_v39 = vld [vmem:[#allocation8 + $0x9c8] sm:$0xff]  ;;  %v6589_v42 = vcombine.low %v1161_v31, %v1165_v32 }
 0x19f   : > { %v831_v48 = vshrl.u32 %v8370_v45, 16  ;;  %v834_v52 = vshll.u32 %v8370_v45, 16  ;;  %v6452_v43 = vcombine.high %v1024_v37, %v1028_v38  ;;  %v6598_v44 = vcombine.high %v1169_v39, %v1173_v40 }
 0x1a0   : > { %3406 = vmatprep.mubr.bf16.mxu0 %v8372_v46  ;;  %v838_v49 = vshrl.u32 %v8372_v46, 16  ;;  %v841_v50 = vshll.u32 %v8372_v46, 16  ;;  %v6451_v53 = vcombine.low %v1024_v37, %v1028_v38  ;;  %v6597_v54 = vcombine.low %v1169_v39, %v1173_v40 }
 0x1a1   : > { %3407 = vmatmul.mubr.bf16.vlgmr.msra.gmra.mrb[4].mxu0 %v8370_v45  ;;  %v833_v51 = vrot.slane %v831_v48, 7 }
 0x1a2   : > { %3418 = vmatpush1.bf16.msra.mxu0 %v6541_v10  ;;  %v840_v56 = vrot.slane %v838_v49, 7  ;;  %v850_v57 = vrot.slane %v841_v50, 1  ;;  %v1004_v10 = vld [vmem:[#allocation8 + $0x4a0] sm:$0xff] }
 0x1a3   : > { %3419 = vmatprep.subr.bf16.mxu0 %v6550_v47  ;;  %v836_v58 = vor.u32 %v834_v52, %v833_v51  ;;  %v6428_v18 = vcombine.high %v1000_v9, %v1004_v10  ;;  %v6427_v27 = vcombine.low %v1000_v9, %v1004_v10  ;;  %v1032_v47 = vld [vmem:[#allocation8 + $0x580] sm:$0xff]  ;;  %v1181_v51 = vld [vmem:[#allocation8 + $0xa28] sm:$0xff]  ;;  %v6613_v10 = vcombine.low %v1185_v59, %v1189_v60 }
 0x1a4   : > { %v843_v61 = vor.u32 %v841_v50, %v840_v56  ;;  %v851_v63 = vor.u32 %v850_v57, %v838_v49  ;;  %v1036_v49 = vld [vmem:[#allocation8 + $0x5a0] sm:$0xff]  ;;  %v1177_v50 = vld [vmem:[#allocation8 + $0xa08] sm:$0xff] }
 0x1a5   : > { %v8396_v7 = vsel %vm8348_vm5, 0, %v836_v58  ;;  %v6606_v56 = vcombine.high %v1177_v50, %v1181_v51  ;;  %v1040_v57 = vld [vmem:[#allocation8 + $0x5c0] sm:$0xff] }
 0x1a6   : > { %3420 = vmatpush1.bf16.msra.mxu0 %v6549_v55  ;;  %v8386_v3 = vsel %vm8348_vm5, 0, %v843_v61  ;;  %v8390_v4 = vsel %vm8342_vm2, %v851_v63, 0  ;;  %v6460_v55 = vcombine.high %v1032_v47, %v1036_v49  ;;  %v1044_v58 = vld [vmem:[#allocation8 + $0x5e0] sm:$0xff]  ;;  %v6459_v61 = vcombine.low %v1032_v47, %v1036_v49 }
 0x1a7   : > { %3234 = vmatprep.mubr.bf16.mxu1 %v8386_v3  ;;  %3449 = vmatprep.mubr.bf16.mxu0 %v8390_v4  ;;  %v6605_v63 = vcombine.low %v1177_v50, %v1181_v51  ;;  %v6467_v9 = vcombine.low %v1040_v57, %v1044_v58 }
 0x1a8   : > { %3235 = vmatmul.mubr.bf16.vlgmr.msra.gmra.mrb[4].mxu1 %v8396_v7  ;;  %3421 = vmatprep.subr.bf16.mxu0 %v6558_v0  ;;  %v6468_v0 = vcombine.high %v1040_v57, %v1044_v58 }
 0x1a9   : > { %3246 = vmatpush1.bf16.msra.mxu1 %v6411_v19  ;;  %3277 = vmatprep.mubr.bf16.mxu1 %v8372_v46  ;;  %v1016_v19 = vld [vmem:[#allocation8 + $0x500] sm:$0xff] }
 0x1aa   : > { %3422 = vmatpush1.bf16.msra.mxu0 %v6557_v5  ;;  %3247 = vmatprep.subr.bf16.mxu1 %v6420_v6  ;;  %v6444_v35 = vcombine.high %v1016_v19, %v1020_v30  ;;  %v6443_v41 = vcombine.low %v1016_v19, %v1020_v30  ;;  %v1052_v5 = vld [vmem:[#allocation8 + $0x620] sm:$0xff]  ;;  %v1193_v6 = vld [vmem:[#allocation8 + $0xa88] sm:$0xff] }
 0x1ab   : > { %3423 = vmatprep.subr.bf16.mxu0 %v6566_v8  ;;  %v1197_v8 = vld [vmem:[#allocation8 + $0xaa8] sm:$0xff]  ;;  %v6476_v11 = vcombine.high %v1048_v2, %v1052_v5  ;;  %v6475_v21 = vcombine.low %v1048_v2, %v1052_v5  ;;  %v863_v2 = vld [vmem:[#allocation8 + $0x38] sm:$0xff] }
 0x1ac   : > { %v6622_v12 = vcombine.high %v1193_v6, %v1197_v8  ;;  %v6621_v22 = vcombine.low %v1193_v6, %v1197_v8 }
 0x1ad   : > { %3248 = vmatpush1.bf16.msra.mxu1 %v6419_v13  ;;  %v1056_v13 = vld [vmem:[#allocation8 + $0x640] sm:$0xff] }
 0x1ae   : > { %3424 = vmatpush1.bf16.msra.mxu0 %v6565_v15  ;;  %3249 = vmatprep.subr.bf16.mxu1 %v6428_v18  ;;  %v1060_v15 = vld [vmem:[#allocation8 + $0x660] sm:$0xff]  ;;  %v1201_v18 = vld [vmem:[#allocation8 + $0xac8] sm:$0xff] }
 0x1af   : > { %3425 = vmatprep.subr.bf16.mxu0 %v6574_v20  ;;  %v1205_v20 = vld [vmem:[#allocation8 + $0xae8] sm:$0xff]  ;;  %v6484_v23 = vcombine.high %v1056_v13, %v1060_v15  ;;  %v6483_v19 = vcombine.low %v1056_v13, %v1060_v15  ;;  %v867_v13 = vld [vmem:[#allocation8 + $0x58] sm:$0xff] }
 0x1b0   : > { %v6630_v24 = vcombine.high %v1201_v18, %v1205_v20  ;;  %v6629_v30 = vcombine.low %v1201_v18, %v1205_v20  ;;  %v871_v15 = vld [vmem:[#allocation8 + $0x78] sm:$0xff] }
 0x1b1   : > { %3250 = vmatpush1.bf16.msra.mxu1 %v6427_v27  ;;  %v1064_v27 = vld [vmem:[#allocation8 + $0x680] sm:$0xff] }
 0x1b2   : > { %3426 = vmatpush1.bf16.msra.mxu0 %v6573_v29  ;;  %3251 = vmatprep.subr.bf16.mxu1 %v6436_v16  ;;  %v1068_v29 = vld [vmem:[#allocation8 + $0x6a0] sm:$0xff]  ;;  %v1209_v16 = vld [vmem:[#allocation8 + $0xb08] sm:$0xff] }
 0x1b3   : > { %3427 = vmatprep.subr.bf16.mxu0 %v6582_v17  ;;  %v1213_v17 = vld [vmem:[#allocation8 + $0xb28] sm:$0xff]  ;;  %v6492_v31 = vcombine.high %v1064_v27, %v1068_v29  ;;  %v6491_v37 = vcombine.low %v1064_v27, %v1068_v29  ;;  %v875_v27 = vld [vmem:[#allocation8 + $0x98] sm:$0xff] }
 0x1b4   : > { %v6638_v32 = vcombine.high %v1209_v16, %v1213_v17  ;;  %v6637_v38 = vcombine.low %v1209_v16, %v1213_v17  ;;  %v879_v29 = vld [vmem:[#allocation8 + $0xb8] sm:$0xff]  ;;  %v6297_v16 = vcombine.low %v867_v13, %v871_v15 }
 0x1b5   : > { %3252 = vmatpush1.bf16.msra.mxu1 %v6435_v33  ;;  %v1072_v33 = vld [vmem:[#allocation8 + $0x6c0] sm:$0xff] }
 0x1b6   : > { %3428 = vmatpush1.bf16.msra.mxu0 %v6581_v34  ;;  %3253 = vmatprep.subr.bf16.mxu1 %v6444_v35  ;;  %v1076_v34 = vld [vmem:[#allocation8 + $0x6e0] sm:$0xff]  ;;  %v1217_v35 = vld [vmem:[#allocation8 + $0xb48] sm:$0xff] }
 0x1b7   : > { %3429 = vmatprep.subr.bf16.mxu0 %v6590_v36  ;;  %v1221_v36 = vld [vmem:[#allocation8 + $0xb68] sm:$0xff]  ;;  %v6500_v39 = vcombine.high %v1072_v33, %v1076_v34  ;;  %v6499_v47 = vcombine.low %v1072_v33, %v1076_v34  ;;  %v887_v33 = vld [vmem:[#allocation8 + $0xf8] sm:$0xff] }
 0x1b8   : > { %v6646_v40 = vcombine.high %v1217_v35, %v1221_v36  ;;  %v6645_v49 = vcombine.low %v1217_v35, %v1221_v36  ;;  %v6305_v35 = vcombine.low %v875_v27, %v879_v29 }
 0x1b9   : > { %3254 = vmatpush1.bf16.msra.mxu1 %v6443_v41  ;;  %v1080_v41 = vld [vmem:[#allocation8 + $0x700] sm:$0xff] }
 0x1ba   : > { %3430 = vmatpush1.bf16.msra.mxu0 %v6589_v42  ;;  %3255 = vmatprep.subr.bf16.mxu1 %v6452_v43  ;;  %v1084_v42 = vld [vmem:[#allocation8 + $0x720] sm:$0xff]  ;;  %v1225_v43 = vld [vmem:[#allocation8 + $0xb88] sm:$0xff] }
 0x1bb   : > { %3431 = vmatprep.subr.bf16.mxu0 %v6598_v44  ;;  %v1229_v44 = vld [vmem:[#allocation8 + $0xba8] sm:$0xff]  ;;  %v6508_v50 = vcombine.high %v1080_v41, %v1084_v42  ;;  %v6507_v57 = vcombine.low %v1080_v41, %v1084_v42  ;;  %v895_v41 = vld [vmem:[#allocation8 + $0x138] sm:$0xff] }
 0x1bc   : > { %v6654_v51 = vcombine.high %v1225_v43, %v1229_v44  ;;  %v6653_v58 = vcombine.low %v1225_v43, %v1229_v44 }
 0x1bd   : > { %3256 = vmatpush1.bf16.msra.mxu1 %v6451_v53  ;;  %v1088_v53 = vld [vmem:[#allocation8 + $0x740] sm:$0xff] }
 0x1be   : > { %3432 = vmatpush1.bf16.msra.mxu0 %v6597_v54  ;;  %3257 = vmatprep.subr.bf16.mxu1 %v6460_v55  ;;  %v1092_v54 = vld [vmem:[#allocation8 + $0x760] sm:$0xff]  ;;  %v1233_v55 = vld [vmem:[#allocation8 + $0xbc8] sm:$0xff] }
 0x1bf   : > { %3433 = vmatprep.subr.bf16.mxu0 %v6606_v56  ;;  %v1237_v56 = vld [vmem:[#allocation8 + $0xbe8] sm:$0xff]  ;;  %v6516_v59 = vcombine.high %v1088_v53, %v1092_v54  ;;  %v6515_v5 = vcombine.low %v1088_v53, %v1092_v54  ;;  %v903_v53 = vld [vmem:[#allocation8 + $0x178] sm:$0xff] }
 0x1c0   : > { %v6662_v60 = vcombine.high %v1233_v55, %v1237_v56  ;;  %v6661_v6 = vcombine.low %v1233_v55, %v1237_v56 }
 0x1c1   : > { %3258 = vmatpush1.bf16.msra.mxu1 %v6459_v61  ;;  %v1096_v61 = vld [vmem:[#allocation8 + $0x780] sm:$0xff] }
 0x1c2   : > { %3434 = vmatpush1.bf16.msra.mxu0 %v6605_v63  ;;  %3259 = vmatprep.subr.bf16.mxu1 %v6468_v0  ;;  %v1100_v63 = vld [vmem:[#allocation8 + $0x7a0] sm:$0xff]  ;;  %v848_v0 = vrot.slane %v834_v52, 1 }
 0x1c3   : > { %3435 = vmatprep.subr.bf16.mxu0 %v6614_v1  ;;  %v859_v1 = vld [vmem:[#allocation8 + $0x18] sm:$0xff]  ;;  %v6524_v8 = vcombine.high %v1096_v61, %v1100_v63  ;;  %v6523_v18 = vcombine.low %v1096_v61, %v1100_v63 }
 0x1c4   : > { %v6289_v52 = vcombine.low %v859_v1, %v863_v2  ;;  %v911_v61 = vld [vmem:[#allocation8 + $0x1b8] sm:$0xff] }
 0x1c5   : > { %3260 = vmatpush1.bf16.msra.mxu1 %v6467_v9  ;;  %v6290_v9 = vcombine.high %v859_v1, %v863_v2 }
 0x1c6   : > { %3436 = vmatpush1.bf16.msra.mxu0 %v6613_v10  ;;  %3261 = vmatprep.subr.bf16.mxu1 %v6476_v11  ;;  %v1104_v10 = vld [vmem:[#allocation8 + $0x7c0] sm:$0xff]  ;;  %v849_v11 = vor.u32 %v848_v0, %v831_v48 }
 0x1c7   : > { %3437 = vmatprep.subr.bf16.mxu0 %v6622_v12  ;;  %v1108_v12 = vld [vmem:[#allocation8 + $0x7e0] sm:$0xff] }
 0x1c8   : > { %v6532_v20 = vcombine.high %v1104_v10, %v1108_v12  ;;  %v6531_v48 = vcombine.low %v1104_v10, %v1108_v12 }
 0x1c9   : > { %3262 = vmatpush1.bf16.msra.mxu1 %v6475_v21  ;;  %v6298_v21 = vcombine.high %v867_v13, %v871_v15  ;;  %v1160_v15 = vld [vmem:[#allocation8 + $0x980] sm:$0xff] }
 0x1ca   : > { %3438 = vmatpush1.bf16.msra.mxu0 %v6621_v22  ;;  %3263 = vmatprep.subr.bf16.mxu1 %v6484_v23  ;;  %v1112_v22 = vld [vmem:[#allocation8 + $0x800] sm:$0xff] }
 0x1cb   : > { %3439 = vmatprep.subr.bf16.mxu0 %v6630_v24  ;;  %v1116_v23 = vld [vmem:[#allocation8 + $0x820] sm:$0xff]  ;;  %v8409_v24 = vsel %vm8342_vm2, %v849_v11, 0 }
 0x1cc   : > { %v6540_v17 = vcombine.high %v1112_v22, %v1116_v23  ;;  %v6539_v34 = vcombine.low %v1112_v22, %v1116_v23 }
 0x1cd   : > { %3264 = vmatpush1.bf16.msra.mxu1 %v6483_v19  ;;  %v6306_v19 = vcombine.high %v875_v27, %v879_v29  ;;  %v1168_v29 = vld [vmem:[#allocation8 + $0x9c0] sm:$0xff] }
 0x1ce   : > { %3440 = vmatpush1.bf16.msra.mxu0 %v6629_v30  ;;  %3265 = vmatprep.subr.bf16.mxu1 %v6492_v31  ;;  %v1120_v30 = vld [vmem:[#allocation8 + $0x840] sm:$0xff] }
 0x1cf   : > { %3441 = vmatprep.subr.bf16.mxu0 %v6638_v32  ;;  %v1124_v31 = vld [vmem:[#allocation8 + $0x860] sm:$0xff]  ;;  %v883_v32 = vld [vmem:[#allocation8 + $0xd8] sm:$0xff] }
 0x1d0   : > { %v6548_v36 = vcombine.high %v1120_v30, %v1124_v31  ;;  %v6547_v42 = vcombine.low %v1120_v30, %v1124_v31  ;;  %v6313_v43 = vcombine.low %v883_v32, %v887_v33 }
 0x1d1   : > { %3266 = vmatpush1.bf16.msra.mxu1 %v6491_v37  ;;  %v6314_v37 = vcombine.high %v883_v32, %v887_v33  ;;  %v1176_v33 = vld [vmem:[#allocation8 + $0xa00] sm:$0xff] }
 0x1d2   : > { %3442 = vmatpush1.bf16.msra.mxu0 %v6637_v38  ;;  %3267 = vmatprep.subr.bf16.mxu1 %v6500_v39  ;;  %v1128_v38 = vld [vmem:[#allocation8 + $0x880] sm:$0xff] }
 0x1d3   : > { %3443 = vmatprep.subr.bf16.mxu0 %v6646_v40  ;;  %v1132_v39 = vld [vmem:[#allocation8 + $0x8a0] sm:$0xff]  ;;  %v891_v40 = vld [vmem:[#allocation8 + $0x118] sm:$0xff] }
 0x1d4   : > { %v6556_v44 = vcombine.high %v1128_v38, %v1132_v39  ;;  %v6555_v54 = vcombine.low %v1128_v38, %v1132_v39  ;;  %v6321_v55 = vcombine.low %v891_v40, %v895_v41 }
 0x1d5   : > { %3268 = vmatpush1.bf16.msra.mxu1 %v6499_v47  ;;  %v6322_v47 = vcombine.high %v891_v40, %v895_v41  ;;  %v1184_v41 = vld [vmem:[#allocation8 + $0xa40] sm:$0xff] }
 0x1d6   : > { %3444 = vmatpush1.bf16.msra.mxu0 %v6645_v49  ;;  %3269 = vmatprep.subr.bf16.mxu1 %v6508_v50  ;;  %v1136_v49 = vld [vmem:[#allocation8 + $0x8c0] sm:$0xff] }
 0x1d7   : > { %3445 = vmatprep.subr.bf16.mxu0 %v6654_v51  ;;  %v1140_v50 = vld [vmem:[#allocation8 + $0x8e0] sm:$0xff]  ;;  %v899_v51 = vld [vmem:[#allocation8 + $0x158] sm:$0xff] }
 0x1d8   : > { %v6564_v56 = vcombine.high %v1136_v49, %v1140_v50  ;;  %v6563_v63 = vcombine.low %v1136_v49, %v1140_v50  ;;  %v6329_v0 = vcombine.low %v899_v51, %v903_v53 }
 0x1d9   : > { %3270 = vmatpush1.bf16.msra.mxu1 %v6507_v57  ;;  %v6330_v57 = vcombine.high %v899_v51, %v903_v53  ;;  %v1192_v53 = vld [vmem:[#allocation8 + $0xa80] sm:$0xff] }
 0x1da   : > { %3446 = vmatpush1.bf16.msra.mxu0 %v6653_v58  ;;  %3271 = vmatprep.subr.bf16.mxu1 %v6516_v59  ;;  %v1144_v58 = vld [vmem:[#allocation8 + $0x900] sm:$0xff] }
 0x1db   : > { %3447 = vmatprep.subr.bf16.mxu0 %v6662_v60  ;;  %v1148_v59 = vld [vmem:[#allocation8 + $0x920] sm:$0xff]  ;;  %v907_v60 = vld [vmem:[#allocation8 + $0x198] sm:$0xff] }
 0x1dc   : > { %v6572_v1 = vcombine.high %v1144_v58, %v1148_v59  ;;  %v6338_v2 = vcombine.high %v907_v60, %v911_v61  ;;  %v6571_v10 = vcombine.low %v1144_v58, %v1148_v59  ;;  %v6337_v11 = vcombine.low %v907_v60, %v911_v61  ;;  %v1200_v61 = vld [vmem:[#allocation8 + $0xac0] sm:$0xff] }
 0x1dd   : > { %3272 = vmatpush1.bf16.msra.mxu1 %v6515_v5  ;;  %v1152_v5 = vld [vmem:[#allocation8 + $0x940] sm:$0xff] }
 0x1de   : > { %3448 = vmatpush1.bf16.msra.mxu0 %v6661_v6  ;;  %3273 = vmatprep.subr.bf16.mxu1 %v6524_v8  ;;  %v1156_v6 = vld [vmem:[#allocation8 + $0x960] sm:$0xff]  ;;  %v915_v8 = vld [vmem:[#allocation8 + $0x1d8] sm:$0xff] }
 0x1df   : > { %3589 = vmatprep.subr.bf16.mxu0 %v6290_v9  ;;  %v919_v9 = vld [vmem:[#allocation8 + $0x1f8] sm:$0xff]  ;;  %v6580_v12 = vcombine.high %v1152_v5, %v1156_v6 }
 0x1e0   : > { %v6346_v13 = vcombine.high %v915_v8, %v919_v9  ;;  %v6345_v22 = vcombine.low %v915_v8, %v919_v9  ;;  %v1208_v9 = vld [vmem:[#allocation8 + $0xb00] sm:$0xff] }
 0x1e1   : > { %3274 = vmatpush1.bf16.msra.mxu1 %v6523_v18  ;;  %3450 = vmatmul.mubr.bf16.vlgmr.msra.gmra.mrb[4].mxu0 %v8409_v24  ;;  %v1164_v18 = vld [vmem:[#allocation8 + $0x9a0] sm:$0xff] }
 0x1e2   : > { %3590 = vmatpush1.bf16.msra.mxu0 %v6289_v52  ;;  %3621 = vmatprep.mubr.bf16.mxu0 %v8386_v3  ;;  %v923_v52 = vld [vmem:[#allocation8 + $0x218] sm:$0xff]  ;;  %v6588_v23 = vcombine.high %v1160_v15, %v1164_v18 }
 0x1e3   : > { %3275 = vmatprep.subr.bf16.mxu1 %v6532_v20  ;;  %3591 = vmatprep.subr.bf16.mxu0 %v6298_v21  ;;  %v927_v20 = vld [vmem:[#allocation8 + $0x238] sm:$0xff]  ;;  %v6579_v21 = vcombine.low %v1152_v5, %v1156_v6 }
 0x1e4   : > { %v6354_v27 = vcombine.high %v923_v52, %v927_v20  ;;  %v6353_v30 = vcombine.low %v923_v52, %v927_v20  ;;  %v1216_v20 = vld [vmem:[#allocation8 + $0xb40] sm:$0xff] }
 0x1e5   : > { %3276 = vmatpush1.bf16.msra.mxu1 %v6531_v48  ;;  %v1172_v48 = vld [vmem:[#allocation8 + $0x9e0] sm:$0xff] }
 0x1e6   : > { %3592 = vmatpush1.bf16.msra.mxu0 %v6297_v16  ;;  %3288 = vmatprep.subr.bf16.mxu1 %v6540_v17  ;;  %v931_v16 = vld [vmem:[#allocation8 + $0x258] sm:$0xff]  ;;  %v6596_v31 = vcombine.high %v1168_v29, %v1172_v48 }
 0x1e7   : > { %3593 = vmatprep.subr.bf16.mxu0 %v6306_v19  ;;  %v935_v17 = vld [vmem:[#allocation8 + $0x278] sm:$0xff]  ;;  %v6587_v19 = vcombine.low %v1160_v15, %v1164_v18 }
 0x1e8   : > { %3278 = vmatmul.mubr.bf16.vlgmr.msra.gmra.mrb[4].mxu1 %v8370_v45  ;;  %v6362_v32 = vcombine.high %v931_v16, %v935_v17  ;;  %v6361_v38 = vcombine.low %v931_v16, %v935_v17  ;;  %v1224_v17 = vld [vmem:[#allocation8 + $0xb80] sm:$0xff] }
 0x1e9   : > { %3289 = vmatpush1.bf16.msra.mxu1 %v6539_v34  ;;  %3320 = vmatprep.mubr.bf16.mxu1 %v8390_v4  ;;  %v1180_v34 = vld [vmem:[#allocation8 + $0xa20] sm:$0xff] }
 0x1ea   : > { %3594 = vmatpush1.bf16.msra.mxu0 %v6305_v35  ;;  %3290 = vmatprep.subr.bf16.mxu1 %v6548_v36  ;;  %v939_v35 = vld [vmem:[#allocation8 + $0x298] sm:$0xff]  ;;  %v6604_v39 = vcombine.high %v1176_v33, %v1180_v34 }
 0x1eb   : > { %3595 = vmatprep.subr.bf16.mxu0 %v6314_v37  ;;  %v943_v36 = vld [vmem:[#allocation8 + $0x2b8] sm:$0xff]  ;;  %v6595_v37 = vcombine.low %v1168_v29, %v1172_v48 }
 0x1ec   : > { %v6370_v40 = vcombine.high %v939_v35, %v943_v36  ;;  %v6369_v49 = vcombine.low %v939_v35, %v943_v36  ;;  %v1232_v36 = vld [vmem:[#allocation8 + $0xbc0] sm:$0xff] }
 0x1ed   : > { %3291 = vmatpush1.bf16.msra.mxu1 %v6547_v42  ;;  %v1188_v42 = vld [vmem:[#allocation8 + $0xa60] sm:$0xff] }
 0x1ee   : > { %3596 = vmatpush1.bf16.msra.mxu0 %v6313_v43  ;;  %3292 = vmatprep.subr.bf16.mxu1 %v6556_v44  ;;  %v947_v43 = vld [vmem:[#allocation8 + $0x2d8] sm:$0xff]  ;;  %v6612_v50 = vcombine.high %v1184_v41, %v1188_v42 }
 0x1ef   : > { %3597 = vmatprep.subr.bf16.mxu0 %v6322_v47  ;;  %v951_v44 = vld [vmem:[#allocation8 + $0x2f8] sm:$0xff]  ;;  %v6603_v47 = vcombine.low %v1176_v33, %v1180_v34 }
 0x1f0   : > { %v6378_v51 = vcombine.high %v947_v43, %v951_v44  ;;  %v6377_v58 = vcombine.low %v947_v43, %v951_v44  ;;  %v857_v44 = vld [vmem:[#allocation8 + $0x8] sm:$0xff] }
 0x1f1   : > { %3293 = vmatpush1.bf16.msra.mxu1 %v6555_v54  ;;  %v1196_v54 = vld [vmem:[#allocation8 + $0xaa0] sm:$0xff] }
 0x1f2   : > { %3598 = vmatpush1.bf16.msra.mxu0 %v6321_v55  ;;  %3294 = vmatprep.subr.bf16.mxu1 %v6564_v56  ;;  %v955_v55 = vld [vmem:[#allocation8 + $0x318] sm:$0xff]  ;;  %v6620_v59 = vcombine.high %v1192_v53, %v1196_v54 }
 0x1f3   : > { %3599 = vmatprep.subr.bf16.mxu0 %v6330_v57  ;;  %v959_v56 = vld [vmem:[#allocation8 + $0x338] sm:$0xff]  ;;  %v6611_v57 = vcombine.low %v1184_v41, %v1188_v42 }
 0x1f4   : > { %v6386_v60 = vcombine.high %v955_v55, %v959_v56  ;;  %v6385_v5 = vcombine.low %v955_v55, %v959_v56  ;;  %v865_v56 = vld [vmem:[#allocation8 + $0x48] sm:$0xff] }
 0x1f5   : > { %3295 = vmatpush1.bf16.msra.mxu1 %v6563_v63  ;;  %v1204_v63 = vld [vmem:[#allocation8 + $0xae0] sm:$0xff] }
 0x1f6   : > { %3600 = vmatpush1.bf16.msra.mxu0 %v6329_v0  ;;  %3296 = vmatprep.subr.bf16.mxu1 %v6572_v1  ;;  %v963_v0 = vld [vmem:[#allocation8 + $0x358] sm:$0xff]  ;;  %v6628_v6 = vcombine.high %v1200_v61, %v1204_v63 }
 0x1f7   : > { %3601 = vmatprep.subr.bf16.mxu0 %v6338_v2  ;;  %v967_v1 = vld [vmem:[#allocation8 + $0x378] sm:$0xff]  ;;  %v6619_v2 = vcombine.low %v1192_v53, %v1196_v54 }
 0x1f8   : > { %v6394_v8 = vcombine.high %v963_v0, %v967_v1  ;;  %v6393_v15 = vcombine.low %v963_v0, %v967_v1  ;;  %v873_v1 = vld [vmem:[#allocation8 + $0x88] sm:$0xff] }
 0x1f9   : > { %3297 = vmatpush1.bf16.msra.mxu1 %v6571_v10  ;;  %v1212_v10 = vld [vmem:[#allocation8 + $0xb20] sm:$0xff] }
 0x1fa   : > { %3602 = vmatpush1.bf16.msra.mxu0 %v6337_v11  ;;  %3298 = vmatprep.subr.bf16.mxu1 %v6580_v12  ;;  %v971_v11 = vld [vmem:[#allocation8 + $0x398] sm:$0xff]  ;;  %v6636_v18 = vcombine.high %v1208_v9, %v1212_v10 }
 0x1fb   : > { %3603 = vmatprep.subr.bf16.mxu0 %v6346_v13  ;;  %v975_v12 = vld [vmem:[#allocation8 + $0x3b8] sm:$0xff]  ;;  %v6627_v13 = vcombine.low %v1200_v61, %v1204_v63 }
 0x1fc   : > { %v6402_v52 = vcombine.high %v971_v11, %v975_v12  ;;  %v6401_v29 = vcombine.low %v971_v11, %v975_v12  ;;  %v881_v12 = vld [vmem:[#allocation8 + $0xc8] sm:$0xff] }
 0x1fd   : > { %3299 = vmatpush1.bf16.msra.mxu1 %v6579_v21  ;;  %v1220_v21 = vld [vmem:[#allocation8 + $0xb60] sm:$0xff] }
 0x1fe   : > { %3604 = vmatpush1.bf16.msra.mxu0 %v6345_v22  ;;  %3300 = vmatprep.subr.bf16.mxu1 %v6588_v23  ;;  %v979_v22 = vld [vmem:[#allocation8 + $0x3d8] sm:$0xff]  ;;  %v6644_v48 = vcombine.high %v1216_v20, %v1220_v21 }
 0x1ff   : > { %3605 = vmatprep.subr.bf16.mxu0 %v6354_v27  ;;  %v983_v23 = vld [vmem:[#allocation8 + $0x3f8] sm:$0xff]  ;;  %v6635_v27 = vcombine.low %v1208_v9, %v1212_v10 }
 0x200   : > { %v6410_v16 = vcombine.high %v979_v22, %v983_v23  ;;  %v6409_v33 = vcombine.low %v979_v22, %v983_v23  ;;  %v889_v23 = vld [vmem:[#allocation8 + $0x108] sm:$0xff] }
 0x201   : > { %3301 = vmatpush1.bf16.msra.mxu1 %v6587_v19  ;;  %v1228_v19 = vld [vmem:[#allocation8 + $0xba0] sm:$0xff] }
 0x202   : > { %3606 = vmatpush1.bf16.msra.mxu0 %v6353_v30  ;;  %3302 = vmatprep.subr.bf16.mxu1 %v6596_v31  ;;  %v987_v30 = vld [vmem:[#allocation8 + $0x418] sm:$0xff]  ;;  %v6652_v34 = vcombine.high %v1224_v17, %v1228_v19 }
 0x203   : > { %3607 = vmatprep.subr.bf16.mxu0 %v6362_v32  ;;  %v991_v31 = vld [vmem:[#allocation8 + $0x438] sm:$0xff]  ;;  %v6643_v32 = vcombine.low %v1216_v20, %v1220_v21 }
 0x204   : > { %v6418_v35 = vcombine.high %v987_v30, %v991_v31  ;;  %v6417_v41 = vcombine.low %v987_v30, %v991_v31  ;;  %v897_v31 = vld [vmem:[#allocation8 + $0x148] sm:$0xff] }
 0x205   : > { %3303 = vmatpush1.bf16.msra.mxu1 %v6595_v37  ;;  %v1236_v37 = vld [vmem:[#allocation8 + $0xbe0] sm:$0xff] }
 0x206   : > { %3608 = vmatpush1.bf16.msra.mxu0 %v6361_v38  ;;  %3304 = vmatprep.subr.bf16.mxu1 %v6604_v39  ;;  %v995_v38 = vld [vmem:[#allocation8 + $0x458] sm:$0xff]  ;;  %v6660_v42 = vcombine.high %v1232_v36, %v1236_v37 }
 0x207   : > { %3609 = vmatprep.subr.bf16.mxu0 %v6370_v40  ;;  %v999_v39 = vld [vmem:[#allocation8 + $0x478] sm:$0xff]  ;;  %v6651_v40 = vcombine.low %v1224_v17, %v1228_v19 }
 0x208   : > { %v6426_v43 = vcombine.high %v995_v38, %v999_v39  ;;  %v6425_v53 = vcombine.low %v995_v38, %v999_v39  ;;  %v905_v39 = vld [vmem:[#allocation8 + $0x188] sm:$0xff] }
 0x209   : > { %3305 = vmatpush1.bf16.msra.mxu1 %v6603_v47  ;;  %v861_v47 = vld [vmem:[#allocation8 + $0x28] sm:$0xff] }
 0x20a   : > { %3610 = vmatpush1.bf16.msra.mxu0 %v6369_v49  ;;  %3306 = vmatprep.subr.bf16.mxu1 %v6612_v50  ;;  %v1003_v49 = vld [vmem:[#allocation8 + $0x498] sm:$0xff]  ;;  %v6286_v54 = vcombine.high %v857_v44, %v861_v47 }
 0x20b   : > { %3611 = vmatprep.subr.bf16.mxu0 %v6378_v51  ;;  %v1007_v50 = vld [vmem:[#allocation8 + $0x4b8] sm:$0xff]  ;;  %v6659_v51 = vcombine.low %v1232_v36, %v1236_v37 }
 0x20c   : > { %v6434_v55 = vcombine.high %v1003_v49, %v1007_v50  ;;  %v6433_v61 = vcombine.low %v1003_v49, %v1007_v50  ;;  %v913_v50 = vld [vmem:[#allocation8 + $0x1c8] sm:$0xff] }
 0x20d   : > { %3307 = vmatpush1.bf16.msra.mxu1 %v6611_v57  ;;  %v869_v57 = vld [vmem:[#allocation8 + $0x68] sm:$0xff] }
 0x20e   : > { %3612 = vmatpush1.bf16.msra.mxu0 %v6377_v58  ;;  %3308 = vmatprep.subr.bf16.mxu1 %v6620_v59  ;;  %v1011_v58 = vld [vmem:[#allocation8 + $0x4d8] sm:$0xff]  ;;  %v6294_v63 = vcombine.high %v865_v56, %v869_v57 }
 0x20f   : > { %3613 = vmatprep.subr.bf16.mxu0 %v6386_v60  ;;  %v1015_v59 = vld [vmem:[#allocation8 + $0x4f8] sm:$0xff]  ;;  %v6285_v60 = vcombine.low %v857_v44, %v861_v47 }
 0x210   : > { %v6442_v0 = vcombine.high %v1011_v58, %v1015_v59  ;;  %v6441_v9 = vcombine.low %v1011_v58, %v1015_v59  ;;  %v921_v59 = vld [vmem:[#allocation8 + $0x208] sm:$0xff] }
 0x211   : > { %3309 = vmatpush1.bf16.msra.mxu1 %v6619_v2  ;;  %v877_v2 = vld [vmem:[#allocation8 + $0xa8] sm:$0xff] }
 0x212   : > { %3614 = vmatpush1.bf16.msra.mxu0 %v6385_v5  ;;  %3310 = vmatprep.subr.bf16.mxu1 %v6628_v6  ;;  %v1019_v5 = vld [vmem:[#allocation8 + $0x518] sm:$0xff]  ;;  %v6302_v10 = vcombine.high %v873_v1, %v877_v2 }
 0x213   : > { %3615 = vmatprep.subr.bf16.mxu0 %v6394_v8  ;;  %v1023_v6 = vld [vmem:[#allocation8 + $0x538] sm:$0xff]  ;;  %v6293_v8 = vcombine.low %v865_v56, %v869_v57 }
 0x214   : > { %v6450_v11 = vcombine.high %v1019_v5, %v1023_v6  ;;  %v6449_v20 = vcombine.low %v1019_v5, %v1023_v6  ;;  %v929_v6 = vld [vmem:[#allocation8 + $0x248] sm:$0xff] }
 0x215   : > { %3311 = vmatpush1.bf16.msra.mxu1 %v6627_v13  ;;  %v885_v13 = vld [vmem:[#allocation8 + $0xe8] sm:$0xff] }
 0x216   : > { %3616 = vmatpush1.bf16.msra.mxu0 %v6393_v15  ;;  %3312 = vmatprep.subr.bf16.mxu1 %v6636_v18  ;;  %v1027_v15 = vld [vmem:[#allocation8 + $0x558] sm:$0xff]  ;;  %v6310_v21 = vcombine.high %v881_v12, %v885_v13 }
 0x217   : > { %3617 = vmatprep.subr.bf16.mxu0 %v6402_v52  ;;  %v1031_v18 = vld [vmem:[#allocation8 + $0x578] sm:$0xff]  ;;  %v6301_v52 = vcombine.low %v873_v1, %v877_v2 }
 0x218   : > { %v6458_v22 = vcombine.high %v1027_v15, %v1031_v18  ;;  %v6457_v17 = vcombine.low %v1027_v15, %v1031_v18  ;;  %v937_v18 = vld [vmem:[#allocation8 + $0x288] sm:$0xff] }
 0x219   : > { %3313 = vmatpush1.bf16.msra.mxu1 %v6635_v27  ;;  %v893_v27 = vld [vmem:[#allocation8 + $0x128] sm:$0xff] }
 0x21a   : > { %3618 = vmatpush1.bf16.msra.mxu0 %v6401_v29  ;;  %3314 = vmatprep.subr.bf16.mxu1 %v6644_v48  ;;  %v1035_v29 = vld [vmem:[#allocation8 + $0x598] sm:$0xff]  ;;  %v6318_v19 = vcombine.high %v889_v23, %v893_v27 }
 0x21b   : > { %3619 = vmatprep.subr.bf16.mxu0 %v6410_v16  ;;  %v1039_v48 = vld [vmem:[#allocation8 + $0x5b8] sm:$0xff]  ;;  %v6309_v16 = vcombine.low %v881_v12, %v885_v13 }
 0x21c   : > { %v6466_v30 = vcombine.high %v1035_v29, %v1039_v48  ;;  %v6465_v36 = vcombine.low %v1035_v29, %v1039_v48  ;;  %v945_v48 = vld [vmem:[#allocation8 + $0x2c8] sm:$0xff] }
 0x21d   : > { %3315 = vmatpush1.bf16.msra.mxu1 %v6643_v32  ;;  %v901_v32 = vld [vmem:[#allocation8 + $0x168] sm:$0xff] }
 0x21e   : > { %3620 = vmatpush1.bf16.msra.mxu0 %v6409_v33  ;;  %3316 = vmatprep.subr.bf16.mxu1 %v6652_v34  ;;  %v1043_v33 = vld [vmem:[#allocation8 + $0x5d8] sm:$0xff]  ;;  %v6326_v37 = vcombine.high %v897_v31, %v901_v32 }
 0x21f   : > { %3632 = vmatprep.subr.bf16.mxu0 %v6418_v35  ;;  %v1047_v34 = vld [vmem:[#allocation8 + $0x5f8] sm:$0xff]  ;;  %v6317_v35 = vcombine.low %v889_v23, %v893_v27 }
 0x220   : > { %v6474_v38 = vcombine.high %v1043_v33, %v1047_v34  ;;  %v6473_v44 = vcombine.low %v1043_v33, %v1047_v34  ;;  %v953_v34 = vld [vmem:[#allocation8 + $0x308] sm:$0xff] }
 0x221   : > { %3317 = vmatpush1.bf16.msra.mxu1 %v6651_v40  ;;  %3622 = vmatmul.mubr.bf16.vlgmr.msra.gmra.mrb[8].mxu0 %v8396_v7  ;;  %v909_v40 = vld [vmem:[#allocation8 + $0x1a8] sm:$0xff] }
 0x222   : > { %3633 = vmatpush1.bf16.msra.mxu0 %v6417_v41  ;;  %3664 = vmatprep.mubr.bf16.mxu0 %v8372_v46  ;;  %v1051_v41 = vld [vmem:[#allocation8 + $0x618] sm:$0xff]  ;;  %v6334_v47 = vcombine.high %v905_v39, %v909_v40 }
 0x223   : > { %3318 = vmatprep.subr.bf16.mxu1 %v6660_v42  ;;  %3634 = vmatprep.subr.bf16.mxu0 %v6426_v43  ;;  %v1055_v42 = vld [vmem:[#allocation8 + $0x638] sm:$0xff]  ;;  %v6325_v43 = vcombine.low %v897_v31, %v901_v32 }
 0x224   : > { %v6482_v49 = vcombine.high %v1051_v41, %v1055_v42  ;;  %v6481_v56 = vcombine.low %v1051_v41, %v1055_v42  ;;  %v961_v42 = vld [vmem:[#allocation8 + $0x348] sm:$0xff] }
 0x225   : > { %3319 = vmatpush1.bf16.msra.mxu1 %v6659_v51  ;;  %v917_v51 = vld [vmem:[#allocation8 + $0x1e8] sm:$0xff] }
 0x226   : > { %3635 = vmatpush1.bf16.msra.mxu0 %v6425_v53  ;;  %3331 = vmatprep.subr.bf16.mxu1 %v6286_v54  ;;  %v1059_v53 = vld [vmem:[#allocation8 + $0x658] sm:$0xff]  ;;  %v6342_v57 = vcombine.high %v913_v50, %v917_v51 }
 0x227   : > { %3636 = vmatprep.subr.bf16.mxu0 %v6434_v55  ;;  %v1063_v54 = vld [vmem:[#allocation8 + $0x678] sm:$0xff]  ;;  %v6333_v55 = vcombine.low %v905_v39, %v909_v40 }
 0x228   : > { %3321 = vmatmul.mubr.bf16.vlgmr.msra.gmra.mrb[4].mxu1 %v8409_v24  ;;  %v6490_v58 = vcombine.high %v1059_v53, %v1063_v54  ;;  %v6489_v1 = vcombine.low %v1059_v53, %v1063_v54  ;;  %v969_v54 = vld [vmem:[#allocation8 + $0x388] sm:$0xff] }
 0x229   : > { %3332 = vmatpush1.bf16.msra.mxu1 %v6285_v60  ;;  %3363 = vmatprep.mubr.bf16.mxu1 %v8386_v3  ;;  %v925_v60 = vld [vmem:[#allocation8 + $0x228] sm:$0xff] }
 0x22a   : > { %3637 = vmatpush1.bf16.msra.mxu0 %v6433_v61  ;;  %3333 = vmatprep.subr.bf16.mxu1 %v6294_v63  ;;  %v1067_v61 = vld [vmem:[#allocation8 + $0x698] sm:$0xff]  ;;  %v6350_v2 = vcombine.high %v921_v59, %v925_v60 }
 0x22b   : > { %3638 = vmatprep.subr.bf16.mxu0 %v6442_v0  ;;  %v1071_v63 = vld [vmem:[#allocation8 + $0x6b8] sm:$0xff]  ;;  %v6341_v0 = vcombine.low %v913_v50, %v917_v51 }
 0x22c   : > { %v6498_v5 = vcombine.high %v1067_v61, %v1071_v63  ;;  %v6497_v12 = vcombine.low %v1067_v61, %v1071_v63  ;;  %v977_v63 = vld [vmem:[#allocation8 + $0x3c8] sm:$0xff] }
 0x22d   : > { %3334 = vmatpush1.bf16.msra.mxu1 %v6293_v8  ;;  %v933_v8 = vld [vmem:[#allocation8 + $0x268] sm:$0xff] }
 0x22e   : > { %3639 = vmatpush1.bf16.msra.mxu0 %v6441_v9  ;;  %3335 = vmatprep.subr.bf16.mxu1 %v6302_v10  ;;  %v1075_v9 = vld [vmem:[#allocation8 + $0x6d8] sm:$0xff]  ;;  %v6358_v13 = vcombine.high %v929_v6, %v933_v8 }
 0x22f   : > { %3640 = vmatprep.subr.bf16.mxu0 %v6450_v11  ;;  %v1079_v10 = vld [vmem:[#allocation8 + $0x6f8] sm:$0xff]  ;;  %v6349_v11 = vcombine.low %v921_v59, %v925_v60 }
 0x230   : > { %v6506_v15 = vcombine.high %v1075_v9, %v1079_v10  ;;  %v6505_v23 = vcombine.low %v1075_v9, %v1079_v10  ;;  %v858_v10 = vld [vmem:[#allocation8 + $0x10] sm:$0xff] }
 0x231   : > { %3336 = vmatpush1.bf16.msra.mxu1 %v6301_v52  ;;  %v941_v52 = vld [vmem:[#allocation8 + $0x2a8] sm:$0xff] }
 0x232   : > { %3641 = vmatpush1.bf16.msra.mxu0 %v6449_v20  ;;  %3337 = vmatprep.subr.bf16.mxu1 %v6310_v21  ;;  %v1083_v20 = vld [vmem:[#allocation8 + $0x718] sm:$0xff]  ;;  %v6366_v27 = vcombine.high %v937_v18, %v941_v52 }
 0x233   : > { %3642 = vmatprep.subr.bf16.mxu0 %v6458_v22  ;;  %v1087_v21 = vld [vmem:[#allocation8 + $0x738] sm:$0xff]  ;;  %v6357_v22 = vcombine.low %v929_v6, %v933_v8 }
 0x234   : > { %v6514_v29 = vcombine.high %v1083_v20, %v1087_v21  ;;  %v6513_v31 = vcombine.low %v1083_v20, %v1087_v21  ;;  %v866_v21 = vld [vmem:[#allocation8 + $0x50] sm:$0xff] }
 0x235   : > { %3338 = vmatpush1.bf16.msra.mxu1 %v6309_v16  ;;  %v949_v16 = vld [vmem:[#allocation8 + $0x2e8] sm:$0xff] }
 0x236   : > { %3643 = vmatpush1.bf16.msra.mxu0 %v6457_v17  ;;  %3339 = vmatprep.subr.bf16.mxu1 %v6318_v19  ;;  %v1091_v17 = vld [vmem:[#allocation8 + $0x758] sm:$0xff]  ;;  %v6374_v32 = vcombine.high %v945_v48, %v949_v16 }
 0x237   : > { %3644 = vmatprep.subr.bf16.mxu0 %v6466_v30  ;;  %v1095_v19 = vld [vmem:[#allocation8 + $0x778] sm:$0xff]  ;;  %v6365_v30 = vcombine.low %v937_v18, %v941_v52 }
 0x238   : > { %v6522_v33 = vcombine.high %v1091_v17, %v1095_v19  ;;  %v6521_v39 = vcombine.low %v1091_v17, %v1095_v19  ;;  %v874_v19 = vld [vmem:[#allocation8 + $0x90] sm:$0xff] }
 0x239   : > { %3340 = vmatpush1.bf16.msra.mxu1 %v6317_v35  ;;  %v957_v35 = vld [vmem:[#allocation8 + $0x328] sm:$0xff] }
 0x23a   : > { %3645 = vmatpush1.bf16.msra.mxu0 %v6465_v36  ;;  %3341 = vmatprep.subr.bf16.mxu1 %v6326_v37  ;;  %v1099_v36 = vld [vmem:[#allocation8 + $0x798] sm:$0xff]  ;;  %v6382_v40 = vcombine.high %v953_v34, %v957_v35 }
 0x23b   : > { %3646 = vmatprep.subr.bf16.mxu0 %v6474_v38  ;;  %v1103_v37 = vld [vmem:[#allocation8 + $0x7b8] sm:$0xff]  ;;  %v6373_v38 = vcombine.low %v945_v48, %v949_v16 }
 0x23c   : > { %v6530_v41 = vcombine.high %v1099_v36, %v1103_v37  ;;  %v6529_v50 = vcombine.low %v1099_v36, %v1103_v37  ;;  %v882_v37 = vld [vmem:[#allocation8 + $0xd0] sm:$0xff] }
 0x23d   : > { %3342 = vmatpush1.bf16.msra.mxu1 %v6325_v43  ;;  %v965_v43 = vld [vmem:[#allocation8 + $0x368] sm:$0xff] }
 0x23e   : > { %3647 = vmatpush1.bf16.msra.mxu0 %v6473_v44  ;;  %3343 = vmatprep.subr.bf16.mxu1 %v6334_v47  ;;  %v1107_v44 = vld [vmem:[#allocation8 + $0x7d8] sm:$0xff]  ;;  %v6390_v51 = vcombine.high %v961_v42, %v965_v43 }
 0x23f   : > { %3648 = vmatprep.subr.bf16.mxu0 %v6482_v49  ;;  %v1111_v47 = vld [vmem:[#allocation8 + $0x7f8] sm:$0xff]  ;;  %v6381_v49 = vcombine.low %v953_v34, %v957_v35 }
 0x240   : > { %v6538_v53 = vcombine.high %v1107_v44, %v1111_v47  ;;  %v6537_v59 = vcombine.low %v1107_v44, %v1111_v47  ;;  %v894_v47 = vld [vmem:[#allocation8 + $0x130] sm:$0xff] }
 0x241   : > { %3344 = vmatpush1.bf16.msra.mxu1 %v6333_v55  ;;  %v973_v55 = vld [vmem:[#allocation8 + $0x3a8] sm:$0xff] }
 0x242   : > { %3649 = vmatpush1.bf16.msra.mxu0 %v6481_v56  ;;  %3345 = vmatprep.subr.bf16.mxu1 %v6342_v57  ;;  %v1115_v56 = vld [vmem:[#allocation8 + $0x818] sm:$0xff]  ;;  %v6398_v60 = vcombine.high %v969_v54, %v973_v55 }
 0x243   : > { %3650 = vmatprep.subr.bf16.mxu0 %v6490_v58  ;;  %v1119_v57 = vld [vmem:[#allocation8 + $0x838] sm:$0xff]  ;;  %v6389_v58 = vcombine.low %v961_v42, %v965_v43 }
 0x244   : > { %v6546_v61 = vcombine.high %v1115_v56, %v1119_v57  ;;  %v6545_v6 = vcombine.low %v1115_v56, %v1119_v57  ;;  %v898_v56 = vld [vmem:[#allocation8 + $0x150] sm:$0xff] }
 0x245   : > { %3346 = vmatpush1.bf16.msra.mxu1 %v6341_v0  ;;  %v981_v0 = vld [vmem:[#allocation8 + $0x3e8] sm:$0xff]  ;;  %v902_v57 = vld [vmem:[#allocation8 + $0x170] sm:$0xff] }
 0x246   : > { %3651 = vmatpush1.bf16.msra.mxu0 %v6489_v1  ;;  %3347 = vmatprep.subr.bf16.mxu1 %v6350_v2  ;;  %v1123_v1 = vld [vmem:[#allocation8 + $0x858] sm:$0xff]  ;;  %v6406_v8 = vcombine.high %v977_v63, %v981_v0 }
 0x247   : > { %3652 = vmatprep.subr.bf16.mxu0 %v6498_v5  ;;  %v1127_v2 = vld [vmem:[#allocation8 + $0x878] sm:$0xff]  ;;  %v6397_v5 = vcombine.low %v969_v54, %v973_v55 }
 0x248   : > { %v6554_v9 = vcombine.high %v1123_v1, %v1127_v2  ;;  %v6553_v18 = vcombine.low %v1123_v1, %v1127_v2  ;;  %v906_v1 = vld [vmem:[#allocation8 + $0x190] sm:$0xff] }
 0x249   : > { %3348 = vmatpush1.bf16.msra.mxu1 %v6349_v11  ;;  %v862_v11 = vld [vmem:[#allocation8 + $0x30] sm:$0xff] }
 0x24a   : > { %3653 = vmatpush1.bf16.msra.mxu0 %v6497_v12  ;;  %3349 = vmatprep.subr.bf16.mxu1 %v6358_v13  ;;  %v1131_v12 = vld [vmem:[#allocation8 + $0x898] sm:$0xff]  ;;  %v6288_v52 = vcombine.high %v858_v10, %v862_v11  ;;  %v910_v2 = vld [vmem:[#allocation8 + $0x1b0] sm:$0xff] }
 0x24b   : > { %3654 = vmatprep.subr.bf16.mxu0 %v6506_v15  ;;  %v1135_v13 = vld [vmem:[#allocation8 + $0x8b8] sm:$0xff]  ;;  %v6405_v15 = vcombine.low %v977_v63, %v981_v0  ;;  %v6328_v63 = vcombine.high %v898_v56, %v902_v57 }
 0x24c   : > { %v6562_v20 = vcombine.high %v1131_v12, %v1135_v13  ;;  %v6561_v48 = vcombine.low %v1131_v12, %v1135_v13  ;;  %v914_v12 = vld [vmem:[#allocation8 + $0x1d0] sm:$0xff] }
 0x24d   : > { %3350 = vmatpush1.bf16.msra.mxu1 %v6357_v22  ;;  %v870_v22 = vld [vmem:[#allocation8 + $0x70] sm:$0xff] }
 0x24e   : > { %3655 = vmatpush1.bf16.msra.mxu0 %v6505_v23  ;;  %3351 = vmatprep.subr.bf16.mxu1 %v6366_v27  ;;  %v1139_v23 = vld [vmem:[#allocation8 + $0x8d8] sm:$0xff]  ;;  %v6296_v16 = vcombine.high %v866_v21, %v870_v22  ;;  %v918_v13 = vld [vmem:[#allocation8 + $0x1f0] sm:$0xff] }
 0x24f   : > { %3656 = vmatprep.subr.bf16.mxu0 %v6514_v29  ;;  %v1143_v27 = vld [vmem:[#allocation8 + $0x8f8] sm:$0xff]  ;;  %v6287_v29 = vcombine.low %v858_v10, %v862_v11  ;;  %v6336_v10 = vcombine.high %v906_v1, %v910_v2 }
 0x250   : > { %v6570_v17 = vcombine.high %v1139_v23, %v1143_v27  ;;  %v6569_v34 = vcombine.low %v1139_v23, %v1143_v27  ;;  %v922_v23 = vld [vmem:[#allocation8 + $0x210] sm:$0xff] }
 0x251   : > { %3352 = vmatpush1.bf16.msra.mxu1 %v6365_v30  ;;  %v878_v30 = vld [vmem:[#allocation8 + $0xb0] sm:$0xff] }
 0x252   : > { %3657 = vmatpush1.bf16.msra.mxu0 %v6513_v31  ;;  %3353 = vmatprep.subr.bf16.mxu1 %v6374_v32  ;;  %v1147_v31 = vld [vmem:[#allocation8 + $0x918] sm:$0xff]  ;;  %v6304_v35 = vcombine.high %v874_v19, %v878_v30  ;;  %v926_v27 = vld [vmem:[#allocation8 + $0x230] sm:$0xff] }
 0x253   : > { %3658 = vmatprep.subr.bf16.mxu0 %v6522_v33  ;;  %v1151_v32 = vld [vmem:[#allocation8 + $0x938] sm:$0xff]  ;;  %v6295_v33 = vcombine.low %v866_v21, %v870_v22  ;;  %v6344_v21 = vcombine.high %v914_v12, %v918_v13 }
 0x254   : > { %v6578_v36 = vcombine.high %v1147_v31, %v1151_v32  ;;  %v6577_v42 = vcombine.low %v1147_v31, %v1151_v32  ;;  %v930_v31 = vld [vmem:[#allocation8 + $0x250] sm:$0xff] }
 0x255   : > { %3354 = vmatpush1.bf16.msra.mxu1 %v6373_v38  ;;  %v886_v38 = vld [vmem:[#allocation8 + $0xf0] sm:$0xff] }
 0x256   : > { %3659 = vmatpush1.bf16.msra.mxu0 %v6521_v39  ;;  %3355 = vmatprep.subr.bf16.mxu1 %v6382_v40  ;;  %v1155_v39 = vld [vmem:[#allocation8 + $0x958] sm:$0xff]  ;;  %v6312_v43 = vcombine.high %v882_v37, %v886_v38  ;;  %v934_v32 = vld [vmem:[#allocation8 + $0x270] sm:$0xff] }
 0x257   : > { %3660 = vmatprep.subr.bf16.mxu0 %v6530_v41  ;;  %v1159_v40 = vld [vmem:[#allocation8 + $0x978] sm:$0xff]  ;;  %v6303_v41 = vcombine.low %v874_v19, %v878_v30  ;;  %v6352_v19 = vcombine.high %v922_v23, %v926_v27 }
 0x258   : > { %v6586_v44 = vcombine.high %v1155_v39, %v1159_v40 }
 0x259   : > { %3356 = vmatpush1.bf16.msra.mxu1 %v6381_v49  ;;  %v1163_v49 = vld [vmem:[#allocation8 + $0x998] sm:$0xff] }
 0x25a   : > { %3661 = vmatpush1.bf16.msra.mxu0 %v6529_v50  ;;  %3357 = vmatprep.subr.bf16.mxu1 %v6390_v51  ;;  %v1167_v50 = vld [vmem:[#allocation8 + $0x9b8] sm:$0xff]  ;;  %v6311_v51 = vcombine.low %v882_v37, %v886_v38  ;;  %v6360_v37 = vcombine.high %v930_v31, %v934_v32 }
 0x25b   : > { %3662 = vmatprep.subr.bf16.mxu0 %v6538_v53  ;;  %v6585_v53 = vcombine.low %v1155_v39, %v1159_v40  ;;  %v6594_v55 = vcombine.high %v1163_v49, %v1167_v50  ;;  %v938_v39 = vld [vmem:[#allocation8 + $0x290] sm:$0xff] }
 0x25c   : > { %v942_v40 = vld [vmem:[#allocation8 + $0x2b0] sm:$0xff] }
 0x25d   : > { %3358 = vmatpush1.bf16.msra.mxu1 %v6389_v58  ;;  %v1171_v58 = vld [vmem:[#allocation8 + $0x9d8] sm:$0xff] }
 0x25e   : > { %3663 = vmatpush1.bf16.msra.mxu0 %v6537_v59  ;;  %3359 = vmatprep.subr.bf16.mxu1 %v6398_v60  ;;  %v1175_v59 = vld [vmem:[#allocation8 + $0x9f8] sm:$0xff] }
 0x25f   : > { %3675 = vmatprep.subr.bf16.mxu0 %v6546_v61  ;;  %v6593_v61 = vcombine.low %v1163_v49, %v1167_v50  ;;  %v6602_v0 = vcombine.high %v1171_v58, %v1175_v59  ;;  %v946_v49 = vld [vmem:[#allocation8 + $0x2d0] sm:$0xff] }
 0x260   : > { %v950_v50 = vld [vmem:[#allocation8 + $0x2f0] sm:$0xff] }
 0x261   : > { %3360 = vmatpush1.bf16.msra.mxu1 %v6397_v5  ;;  %3665 = vmatmul.mubr.bf16.vlgmr.msra.gmra.mrb[8].mxu0 %v8370_v45  ;;  %v1179_v5 = vld [vmem:[#allocation8 + $0xa18] sm:$0xff] }
 0x262   : > { %3676 = vmatpush1.bf16.msra.mxu0 %v6545_v6  ;;  %3707 = vmatprep.mubr.bf16.mxu0 %v8390_v4  ;;  %v1183_v6 = vld [vmem:[#allocation8 + $0xa38] sm:$0xff] }
 0x263   : > { %3361 = vmatprep.subr.bf16.mxu1 %v6406_v8  ;;  %3677 = vmatprep.subr.bf16.mxu0 %v6554_v9  ;;  %v6327_v8 = vcombine.low %v898_v56, %v902_v57  ;;  %v6601_v9 = vcombine.low %v1171_v58, %v1175_v59  ;;  %v6610_v11 = vcombine.high %v1179_v5, %v1183_v6  ;;  %v954_v58 = vld [vmem:[#allocation8 + $0x310] sm:$0xff] }
 0x264   : > { %v6376_v56 = vcombine.high %v946_v49, %v950_v50  ;;  %v958_v59 = vld [vmem:[#allocation8 + $0x330] sm:$0xff] }
 0x265   : > { %3362 = vmatpush1.bf16.msra.mxu1 %v6405_v15  ;;  %v1187_v15 = vld [vmem:[#allocation8 + $0xa58] sm:$0xff] }
 0x266   : > { %3678 = vmatpush1.bf16.msra.mxu0 %v6553_v18  ;;  %3460 = vmatprep.subr.bf16.mxu1 %v6288_v52  ;;  %v1191_v18 = vld [vmem:[#allocation8 + $0xa78] sm:$0xff]  ;;  %v6335_v52 = vcombine.low %v906_v1, %v910_v2  ;;  %v6384_v1 = vcombine.high %v954_v58, %v958_v59 }
 0x267   : > { %3679 = vmatprep.subr.bf16.mxu0 %v6562_v20  ;;  %v6609_v20 = vcombine.low %v1179_v5, %v1183_v6  ;;  %v6618_v22 = vcombine.high %v1187_v15, %v1191_v18  ;;  %v962_v5 = vld [vmem:[#allocation8 + $0x350] sm:$0xff] }
 0x268   : > { %3364 = vmatmul.mubr.bf16.vlgmr.msra.gmra.mrb[8].mxu1 %v8396_v7  ;;  %v966_v6 = vld [vmem:[#allocation8 + $0x370] sm:$0xff] }
 0x269   : > { %3461 = vmatpush1.bf16.msra.mxu1 %v6287_v29  ;;  %3492 = vmatprep.mubr.bf16.mxu1 %v8386_v3  ;;  %v890_v3 = vld [vmem:[#allocation8 + $0x110] sm:$0xff]  ;;  %v1195_v29 = vld [vmem:[#allocation8 + $0xa98] sm:$0xff] }
 0x26a   : > { %3680 = vmatpush1.bf16.msra.mxu0 %v6561_v48  ;;  %3462 = vmatprep.subr.bf16.mxu1 %v6296_v16  ;;  %v6320_v54 = vcombine.high %v890_v3, %v894_v47  ;;  %v6319_v60 = vcombine.low %v890_v3, %v894_v47  ;;  %v1199_v48 = vld [vmem:[#allocation8 + $0xab8] sm:$0xff]  ;;  %v6343_v16 = vcombine.low %v914_v12, %v918_v13 }
 0x26b   : > { %3681 = vmatprep.subr.bf16.mxu0 %v6570_v17  ;;  %v6617_v17 = vcombine.low %v1187_v15, %v1191_v18  ;;  %v6626_v30 = vcombine.high %v1195_v29, %v1199_v48  ;;  %v6368_v3 = vcombine.high %v938_v39, %v942_v40  ;;  %v6392_v12 = vcombine.high %v962_v5, %v966_v6  ;;  %v970_v15 = vld [vmem:[#allocation8 + $0x390] sm:$0xff] }
 0x26c   : > { %v974_v18 = vld [vmem:[#allocation8 + $0x3b0] sm:$0xff] }
 0x26d   : > { %3463 = vmatpush1.bf16.msra.mxu1 %v6295_v33  ;;  %v1203_v33 = vld [vmem:[#allocation8 + $0xad8] sm:$0xff] }
 0x26e   : > { %3682 = vmatpush1.bf16.msra.mxu0 %v6569_v34  ;;  %3464 = vmatprep.subr.bf16.mxu1 %v6304_v35  ;;  %v1207_v34 = vld [vmem:[#allocation8 + $0xaf8] sm:$0xff]  ;;  %v6351_v35 = vcombine.low %v922_v23, %v926_v27  ;;  %v982_v23 = vld [vmem:[#allocation8 + $0x3f0] sm:$0xff]  ;;  %v7443_v27 = vld [vmem:[%s9463_s7 + $0x4] ss:$8 sps:$4 sm:$0xff]  }
 0x26f   : > { %3683 = vmatprep.subr.bf16.mxu0 %v6578_v36  ;;  %v6625_v36 = vcombine.low %v1195_v29, %v1199_v48  ;;  %v6634_v38 = vcombine.high %v1203_v33, %v1207_v34  ;;  %v6399_v29 = vcombine.low %v970_v15, %v974_v18 }
 0x271   : > { %3465 = vmatpush1.bf16.msra.mxu1 %v6303_v41  ;;  %v1211_v41 = vld [vmem:[#allocation8 + $0xb18] sm:$0xff] }
 0x272   : > { %3684 = vmatpush1.bf16.msra.mxu0 %v6577_v42  ;;  %3466 = vmatprep.subr.bf16.mxu1 %v6312_v43  ;;  %v1215_v42 = vld [vmem:[#allocation8 + $0xb38] sm:$0xff]  ;;  %v6359_v43 = vcombine.low %v930_v31, %v934_v32 }
 0x273   : > { %3685 = vmatprep.subr.bf16.mxu0 %v6586_v44  ;;  %v6633_v44 = vcombine.low %v1203_v33, %v1207_v34  ;;  %v6642_v47 = vcombine.high %v1211_v41, %v1215_v42  ;;  %v7444_v33 = vld [vmem:[%s9463_s7 + $0x10] ss:$8 sps:$4 sm:$0xff]  }
 0x274   : > { %v994_v34 = vld [vmem:[#allocation8 + $0x450] sm:$0xff] }
 0x275   : > { %3467 = vmatpush1.bf16.msra.mxu1 %v6311_v51  ;;  %v1219_v51 = vld [vmem:[#allocation8 + $0xb58] sm:$0xff] }
 0x276   : > { %3686 = vmatpush1.bf16.msra.mxu0 %v6585_v53  ;;  %3468 = vmatprep.subr.bf16.mxu1 %v6320_v54  ;;  %v1223_v53 = vld [vmem:[#allocation8 + $0xb78] sm:$0xff]  ;;  %v6367_v54 = vcombine.low %v938_v39, %v942_v40  ;;  %v1002_v40 = vld [vmem:[#allocation8 + $0x490] sm:$0xff] }
 0x277   : > { %3687 = vmatprep.subr.bf16.mxu0 %v6594_v55  ;;  %v6641_v55 = vcombine.low %v1211_v41, %v1215_v42  ;;  %v6650_v57 = vcombine.high %v1219_v51, %v1223_v53  ;;  %v7447_v39 = vld [vmem:[%s9463_s7 + $0x20] ss:$8 sps:$4 sm:$0xff]   ;;  %v1006_v41 = vld [vmem:[#allocation8 + $0x4b0] sm:$0xff] }
 0x278   : > { %v7452_v42 = vld [vmem:[%s9463_s7 + $0x34] ss:$8 sps:$4 sm:$0xff]  }
 0x279   : > { %3469 = vmatpush1.bf16.msra.mxu1 %v6319_v60  ;;  %v1227_v60 = vld [vmem:[#allocation8 + $0xb98] sm:$0xff] }
 0x27a   : > { %3688 = vmatpush1.bf16.msra.mxu0 %v6593_v61  ;;  %3470 = vmatprep.subr.bf16.mxu1 %v6328_v63  ;;  %v1231_v61 = vld [vmem:[#allocation8 + $0xbb8] sm:$0xff]  ;;  %v6375_v63 = vcombine.low %v946_v49, %v950_v50  ;;  %v1014_v49 = vld [vmem:[#allocation8 + $0x4f0] sm:$0xff]  ;;  %v7455_v50 = vld [vmem:[%s9463_s7 + $0x44] ss:$8 sps:$4 sm:$0xff]  }
 0x27b   : > { %3689 = vmatprep.subr.bf16.mxu0 %v6602_v0  ;;  %v6649_v0 = vcombine.low %v1219_v51, %v1223_v53  ;;  %v6658_v2 = vcombine.high %v1227_v60, %v1231_v61  ;;  %v1018_v53 = vld [vmem:[#allocation8 + $0x510] sm:$0xff] }
 0x27d   : > { %3471 = vmatpush1.bf16.msra.mxu1 %v6327_v8  ;;  %v1235_v8 = vld [vmem:[#allocation8 + $0xbd8] sm:$0xff] }
 0x27e   : > { %3690 = vmatpush1.bf16.msra.mxu0 %v6601_v9  ;;  %3472 = vmatprep.subr.bf16.mxu1 %v6336_v10  ;;  %v1239_v9 = vld [vmem:[#allocation8 + $0xbf8] sm:$0xff]  ;;  %v6383_v10 = vcombine.low %v954_v58, %v958_v59  ;;  %v1026_v59 = vld [vmem:[#allocation8 + $0x550] sm:$0xff] }
 0x27f   : > { %3691 = vmatprep.subr.bf16.mxu0 %v6610_v11  ;;  %v6657_v11 = vcombine.low %v1227_v60, %v1231_v61  ;;  %v6666_v13 = vcombine.high %v1235_v8, %v1239_v9  ;;  %v7456_v58 = vld [vmem:[%s9463_s7 + $0x50] ss:$8 sps:$4 sm:$0xff]   ;;  %v7461_v61 = vld [vmem:[%s9463_s7 + $0x64] ss:$8 sps:$4 sm:$0xff]  }
 0x280   : > { %v1030_v60 = vld [vmem:[#allocation8 + $0x570] sm:$0xff] }
 0x281   : > { %3473 = vmatpush1.bf16.msra.mxu1 %v6335_v52  ;;  %v6391_v52 = vcombine.low %v962_v5, %v966_v6  ;;  %v1038_v5 = vld [vmem:[#allocation8 + $0x5b0] sm:$0xff] }
 0x282   : > { %3692 = vmatpush1.bf16.msra.mxu0 %v6609_v20  ;;  %3474 = vmatprep.subr.bf16.mxu1 %v6344_v21  ;;  %v6665_v20 = vcombine.low %v1235_v8, %v1239_v9  ;;  %v6400_v21 = vcombine.high %v970_v15, %v974_v18  ;;  %v7464_v6 = vld [vmem:[%s9463_s7 + $0x74] ss:$8 sps:$4 sm:$0xff]   ;;  %v6455_v8 = vcombine.low %v1026_v59, %v1030_v60 }
 0x283   : > { %3693 = vmatprep.subr.bf16.mxu0 %v6618_v22  ;;  %v978_v22 = vld [vmem:[#allocation8 + $0x3d0] sm:$0xff] }
 0x284   : > { %v6408_v48 = vcombine.high %v978_v22, %v982_v23  ;;  %v6407_v31 = vcombine.low %v978_v22, %v982_v23  ;;  %v7470_v22 = vld [vmem:[%s9463_s7 + $0x94] ss:$8 sps:$4 sm:$0xff]  }
 0x285   : > { %3475 = vmatpush1.bf16.msra.mxu1 %v6343_v16  ;;  %v7441_v16 = vld [vmem:[%s9463_s7] ss:$8 sps:$4 sm:$0xff]  }
 0x286   : > { %3694 = vmatpush1.bf16.msra.mxu0 %v6617_v17  ;;  %3476 = vmatprep.subr.bf16.mxu1 %v6352_v19  ;;  %v986_v17 = vld [vmem:[#allocation8 + $0x410] sm:$0xff] }
 0x287   : > { %3695 = vmatprep.subr.bf16.mxu0 %v6626_v30  ;;  %v990_v19 = vld [vmem:[#allocation8 + $0x430] sm:$0xff] }
 0x288   : > { %v7446_v30 = vld [vmem:[%s9463_s7 + $0x14] ss:$8 sps:$4 sm:$0xff]   ;;  %v6416_v32 = vcombine.high %v986_v17, %v990_v19 }
 0x289   : > { %3477 = vmatpush1.bf16.msra.mxu1 %v6351_v35  ;;  %v998_v35 = vld [vmem:[#allocation8 + $0x470] sm:$0xff] }
 0x28a   : > { %3696 = vmatpush1.bf16.msra.mxu0 %v6625_v36  ;;  %3478 = vmatprep.subr.bf16.mxu1 %v6360_v37  ;;  %v7449_v36 = vld [vmem:[%s9463_s7 + $0x24] ss:$8 sps:$4 sm:$0xff]   ;;  %v6415_v37 = vcombine.low %v986_v17, %v990_v19 }
 0x28b   : > { %3697 = vmatprep.subr.bf16.mxu0 %v6634_v38  ;;  %v6424_v38 = vcombine.high %v994_v34, %v998_v35  ;;  %v7473_v17 = vld [vmem:[%s9463_s7 + $0xa4] ss:$8 sps:$4 sm:$0xff]  }
 0x28d   : > { %3479 = vmatpush1.bf16.msra.mxu1 %v6359_v43  ;;  %v6423_v43 = vcombine.low %v994_v34, %v998_v35  ;;  %v7476_v34 = vld [vmem:[%s9463_s7 + $0xb4] ss:$8 sps:$4 sm:$0xff]  }
 0x28e   : > { %3698 = vmatpush1.bf16.msra.mxu0 %v6633_v44  ;;  %3480 = vmatprep.subr.bf16.mxu1 %v6368_v3  ;;  %v6432_v44 = vcombine.high %v1002_v40, %v1006_v41  ;;  %v7450_v3 = vld [vmem:[%s9463_s7 + $0x30] ss:$8 sps:$4 sm:$0xff]  }
 0x28f   : > { %3699 = vmatprep.subr.bf16.mxu0 %v6642_v47  ;;  %v1010_v47 = vld [vmem:[#allocation8 + $0x4d0] sm:$0xff] }
 0x290   : > { %v6440_v51 = vcombine.high %v1010_v47, %v1014_v49 }
 0x291   : > { %3481 = vmatpush1.bf16.msra.mxu1 %v6367_v54  ;;  %v1022_v54 = vld [vmem:[#allocation8 + $0x530] sm:$0xff] }
 0x292   : > { %3700 = vmatpush1.bf16.msra.mxu0 %v6641_v55  ;;  %3482 = vmatprep.subr.bf16.mxu1 %v6376_v56  ;;  %v7458_v55 = vld [vmem:[%s9463_s7 + $0x54] ss:$8 sps:$4 sm:$0xff]   ;;  %v6439_v56 = vcombine.low %v1010_v47, %v1014_v49 }
 0x293   : > { %3701 = vmatprep.subr.bf16.mxu0 %v6650_v57  ;;  %v6448_v57 = vcombine.high %v1018_v53, %v1022_v54  ;;  %v7482_v47 = vld [vmem:[%s9463_s7 + $0xd4] ss:$8 sps:$4 sm:$0xff]  }
 0x295   : > { %3483 = vmatpush1.bf16.msra.mxu1 %v6375_v63  ;;  %v6447_v63 = vcombine.low %v1018_v53, %v1022_v54  ;;  %v7485_v53 = vld [vmem:[%s9463_s7 + $0xe4] ss:$8 sps:$4 sm:$0xff]  }
 0x296   : > { %3702 = vmatpush1.bf16.msra.mxu0 %v6649_v0  ;;  %3484 = vmatprep.subr.bf16.mxu1 %v6384_v1  ;;  %v6456_v0 = vcombine.high %v1026_v59, %v1030_v60  ;;  %v7459_v1 = vld [vmem:[%s9463_s7 + $0x60] ss:$8 sps:$4 sm:$0xff]   ;;  %v7488_v59 = vld [vmem:[%s9463_s7 + $0xf4] ss:$8 sps:$4 sm:$0xff]  }
 0x297   : > { %3703 = vmatprep.subr.bf16.mxu0 %v6658_v2  ;;  %v1034_v2 = vld [vmem:[#allocation8 + $0x590] sm:$0xff] }
 0x298   : > { %v6464_v9 = vcombine.high %v1034_v2, %v1038_v5  ;;  %v6463_v15 = vcombine.low %v1034_v2, %v1038_v5  ;;  %v7491_v2 = vld [vmem:[%s9463_s7 + $0x104] ss:$8 sps:$4 sm:$0xff]  }
 0x299   : > { %3485 = vmatpush1.bf16.msra.mxu1 %v6383_v10  ;;  %v7462_v10 = vld [vmem:[%s9463_s7 + $0x70] ss:$8 sps:$4 sm:$0xff]  }
 0x29a   : > { %3704 = vmatpush1.bf16.msra.mxu0 %v6657_v11  ;;  %3486 = vmatprep.subr.bf16.mxu1 %v6392_v12  ;;  %v1042_v11 = vld [vmem:[#allocation8 + $0x5d0] sm:$0xff] }
 0x29b   : > { %3705 = vmatprep.subr.bf16.mxu0 %v6666_v13  ;;  %v1046_v12 = vld [vmem:[#allocation8 + $0x5f0] sm:$0xff]  ;;  %v7467_v13 = vld [vmem:[%s9463_s7 + $0x84] ss:$8 sps:$4 sm:$0xff]  }
 0x29c   : > { %v6472_v18 = vcombine.high %v1042_v11, %v1046_v12  ;;  %v6471_v23 = vcombine.low %v1042_v11, %v1046_v12  ;;  %v1122_v12 = vld [vmem:[#allocation8 + $0x850] sm:$0xff] }
 0x29d   : > { %3487 = vmatpush1.bf16.msra.mxu1 %v6391_v52  ;;  %v7465_v52 = vld [vmem:[%s9463_s7 + $0x80] ss:$8 sps:$4 sm:$0xff]  }
 0x29e   : > { %3706 = vmatpush1.bf16.msra.mxu0 %v6665_v20  ;;  %3488 = vmatprep.subr.bf16.mxu1 %v6400_v21  ;;  %v1050_v20 = vld [vmem:[#allocation8 + $0x610] sm:$0xff] }
 0x29f   : > { %4350 = vmatprep.subr.bf16.mxu0 %v7443_v27  ;;  %v1054_v21 = vld [vmem:[#allocation8 + $0x630] sm:$0xff] }
 0x2a0   : > { %v6480_v27 = vcombine.high %v1050_v20, %v1054_v21  ;;  %v6479_v19 = vcombine.low %v1050_v20, %v1054_v21  ;;  %v1134_v20 = vld [vmem:[#allocation8 + $0x8b0] sm:$0xff] }
 0x2a1   : > { %3489 = vmatpush1.bf16.msra.mxu1 %v6399_v29  ;;  %3708 = vmatmul.mubr.bf16.vlgmr.msra.gmra.mrb[8].mxu0 %v8409_v24  ;;  %v7468_v29 = vld [vmem:[%s9463_s7 + $0x90] ss:$8 sps:$4 sm:$0xff]  }
 0x2a2   : > { %3490 = vmatprep.subr.bf16.mxu1 %v6408_v48  ;;  %4351 = vmatpush1.bf16.msra.mxu0 %v7441_v16  ;;  %v1058_v48 = vld [vmem:[#allocation8 + $0x650] sm:$0xff] }
 0x2a3   : > { %4352 = vmatprep.subr.bf16.mxu0 %v7446_v30  ;;  %v1062_v16 = vld [vmem:[#allocation8 + $0x670] sm:$0xff] }
 0x2a4   : > { %v6488_v30 = vcombine.high %v1058_v48, %v1062_v16  ;;  %v6487_v35 = vcombine.low %v1058_v48, %v1062_v16  ;;  %v1146_v16 = vld [vmem:[#allocation8 + $0x910] sm:$0xff] }
 0x2a5   : > { %3491 = vmatpush1.bf16.msra.mxu1 %v6407_v31  ;;  %v7471_v31 = vld [vmem:[%s9463_s7 + $0xa0] ss:$8 sps:$4 sm:$0xff]  }
 0x2a6   : > { %3503 = vmatprep.subr.bf16.mxu1 %v6416_v32  ;;  %4353 = vmatpush1.bf16.msra.mxu0 %v7444_v33  ;;  %v1066_v32 = vld [vmem:[#allocation8 + $0x690] sm:$0xff] }
 0x2a7   : > { %4354 = vmatprep.subr.bf16.mxu0 %v7449_v36  ;;  %v1070_v33 = vld [vmem:[#allocation8 + $0x6b0] sm:$0xff] }
 0x2a8   : > { %3493 = vmatmul.mubr.bf16.vlgmr.msra.gmra.mrb[12].mxu1 %v8396_v7  ;;  %v6431_v7 = vcombine.low %v1002_v40, %v1006_v41  ;;  %v6496_v36 = vcombine.high %v1066_v32, %v1070_v33  ;;  %v7479_v40 = vld [vmem:[%s9463_s7 + $0xc4] ss:$8 sps:$4 sm:$0xff]   ;;  %v6495_v41 = vcombine.low %v1066_v32, %v1070_v33 }
 0x2a9   : > { %3504 = vmatpush1.bf16.msra.mxu1 %v6415_v37  ;;  %3535 = vmatprep.mubr.bf16.mxu1 %v8372_v46  ;;  %v7453_v46 = vld [vmem:[%s9463_s7 + $0x40] ss:$8 sps:$4 sm:$0xff]   ;;  %v7474_v37 = vld [vmem:[%s9463_s7 + $0xb0] ss:$8 sps:$4 sm:$0xff]  }
 0x2aa   : > { %3505 = vmatprep.subr.bf16.mxu1 %v6424_v38  ;;  %4355 = vmatpush1.bf16.msra.mxu0 %v7447_v39  ;;  %v1074_v38 = vld [vmem:[#allocation8 + $0x6d0] sm:$0xff]  ;;  %v8535_v32 = vld [vmem:[%s8532_s16] sm:$0xff] }
 0x2ab   : > { %4356 = vmatprep.subr.bf16.mxu0 %v7452_v42  ;;  %v1078_v39 = vld [vmem:[#allocation8 + $0x6f0] sm:$0xff] }
 0x2ac   : > { %v6504_v42 = vcombine.high %v1074_v38, %v1078_v39  ;;  %v6503_v49 = vcombine.low %v1074_v38, %v1078_v39 }
 0x2ad   : > { %3506 = vmatpush1.bf16.msra.mxu1 %v6423_v43  ;;  %v7477_v43 = vld [vmem:[%s9463_s7 + $0xc0] ss:$8 sps:$4 sm:$0xff]  }
 0x2ae   : > { %3507 = vmatprep.subr.bf16.mxu1 %v6432_v44  ;;  %4357 = vmatpush1.bf16.msra.mxu0 %v7450_v3  ;;  %v1082_v44 = vld [vmem:[#allocation8 + $0x710] sm:$0xff] }
 0x2af   : > { %4358 = vmatprep.subr.bf16.mxu0 %v7455_v50  ;;  %v1086_v3 = vld [vmem:[#allocation8 + $0x730] sm:$0xff] }
 0x2b0   : > { %v6512_v50 = vcombine.high %v1082_v44, %v1086_v3  ;;  %v6511_v54 = vcombine.low %v1082_v44, %v1086_v3 }
 0x2b1   : > { %3508 = vmatpush1.bf16.msra.mxu1 %v6431_v7  ;;  %v7480_v7 = vld [vmem:[%s9463_s7 + $0xd0] ss:$8 sps:$4 sm:$0xff]  }
 0x2b2   : > { %3509 = vmatprep.subr.bf16.mxu1 %v6440_v51  ;;  %4359 = vmatpush1.bf16.msra.mxu0 %v7453_v46  ;;  %v1090_v51 = vld [vmem:[#allocation8 + $0x750] sm:$0xff] }
 0x2b3   : > { %4360 = vmatprep.subr.bf16.mxu0 %v7458_v55  ;;  %v1094_v46 = vld [vmem:[#allocation8 + $0x770] sm:$0xff] }
 0x2b4   : > { %v6520_v55 = vcombine.high %v1090_v51, %v1094_v46  ;;  %v6519_v60 = vcombine.low %v1090_v51, %v1094_v46 }
 0x2b5   : > { %3510 = vmatpush1.bf16.msra.mxu1 %v6439_v56  ;;  %v7483_v56 = vld [vmem:[%s9463_s7 + $0xe0] ss:$8 sps:$4 sm:$0xff]  }
 0x2b6   : > { %3511 = vmatprep.subr.bf16.mxu1 %v6448_v57  ;;  %4361 = vmatpush1.bf16.msra.mxu0 %v7456_v58  ;;  %v1098_v57 = vld [vmem:[#allocation8 + $0x790] sm:$0xff] }
 0x2b7   : > { %4362 = vmatprep.subr.bf16.mxu0 %v7461_v61  ;;  %v1102_v58 = vld [vmem:[#allocation8 + $0x7b0] sm:$0xff] }
 0x2b8   : > { %v6528_v61 = vcombine.high %v1098_v57, %v1102_v58  ;;  %v6527_v5 = vcombine.low %v1098_v57, %v1102_v58 }
 0x2b9   : > { %3512 = vmatpush1.bf16.msra.mxu1 %v6447_v63  ;;  %v7486_v63 = vld [vmem:[%s9463_s7 + $0xf0] ss:$8 sps:$4 sm:$0xff]  }
 0x2ba   : > { %3513 = vmatprep.subr.bf16.mxu1 %v6456_v0  ;;  %4363 = vmatpush1.bf16.msra.mxu0 %v7459_v1  ;;  %v1106_v0 = vld [vmem:[#allocation8 + $0x7d0] sm:$0xff] }
 0x2bb   : > { %4364 = vmatprep.subr.bf16.mxu0 %v7464_v6  ;;  %v1110_v1 = vld [vmem:[#allocation8 + $0x7f0] sm:$0xff] }
 0x2bc   : > { %v6536_v6 = vcombine.high %v1106_v0, %v1110_v1 }
 0x2bd   : > { %3514 = vmatpush1.bf16.msra.mxu1 %v6455_v8  ;;  %v1114_v8 = vld [vmem:[#allocation8 + $0x810] sm:$0xff] }
 0x2be   : > { %3515 = vmatprep.subr.bf16.mxu1 %v6464_v9  ;;  %4365 = vmatpush1.bf16.msra.mxu0 %v7462_v10  ;;  %v1118_v9 = vld [vmem:[#allocation8 + $0x830] sm:$0xff]  ;;  %v6535_v10 = vcombine.low %v1106_v0, %v1110_v1 }
 0x2bf   : > { %4366 = vmatprep.subr.bf16.mxu0 %v7467_v13  ;;  %v6544_v11 = vcombine.high %v1114_v8, %v1118_v9  ;;  %v1126_v13 = vld [vmem:[#allocation8 + $0x870] sm:$0xff] }
 0x2c0   : > { %v6551_v21 = vcombine.low %v1122_v12, %v1126_v13  ;;  %v1194_v0 = vld [vmem:[#allocation8 + $0xa90] sm:$0xff] }
 0x2c1   : > { %3516 = vmatpush1.bf16.msra.mxu1 %v6463_v15  ;;  %v6543_v15 = vcombine.low %v1114_v8, %v1118_v9  ;;  %v1198_v1 = vld [vmem:[#allocation8 + $0xab0] sm:$0xff] }
 0x2c2   : > { %3517 = vmatprep.subr.bf16.mxu1 %v6472_v18  ;;  %4367 = vmatpush1.bf16.msra.mxu0 %v7465_v52  ;;  %v6552_v18 = vcombine.high %v1122_v12, %v1126_v13  ;;  %v1130_v52 = vld [vmem:[#allocation8 + $0x890] sm:$0xff] }
 0x2c3   : > { %4368 = vmatprep.subr.bf16.mxu0 %v7470_v22  ;;  %v6560_v22 = vcombine.high %v1130_v52, %v1134_v20 }
 0x2c5   : > { %3518 = vmatpush1.bf16.msra.mxu1 %v6471_v23  ;;  %v1138_v23 = vld [vmem:[#allocation8 + $0x8d0] sm:$0xff] }
 0x2c6   : > { %3519 = vmatprep.subr.bf16.mxu1 %v6480_v27  ;;  %4369 = vmatpush1.bf16.msra.mxu0 %v7468_v29  ;;  %v1142_v27 = vld [vmem:[#allocation8 + $0x8f0] sm:$0xff]  ;;  %v6559_v29 = vcombine.low %v1130_v52, %v1134_v20  ;;  %v6623_v52 = vcombine.low %v1194_v0, %v1198_v1 }
 0x2c7   : > { %4370 = vmatprep.subr.bf16.mxu0 %v7473_v17  ;;  %v6568_v48 = vcombine.high %v1138_v23, %v1142_v27  ;;  %v1150_v17 = vld [vmem:[#allocation8 + $0x930] sm:$0xff] }
 0x2c9   : > { %3520 = vmatpush1.bf16.msra.mxu1 %v6479_v19  ;;  %v6567_v19 = vcombine.low %v1138_v23, %v1142_v27  ;;  %v1214_v23 = vld [vmem:[#allocation8 + $0xb30] sm:$0xff] }
 0x2ca   : > { %3521 = vmatprep.subr.bf16.mxu1 %v6488_v30  ;;  %4371 = vmatpush1.bf16.msra.mxu0 %v7471_v31  ;;  %v1158_v30 = vld [vmem:[#allocation8 + $0x970] sm:$0xff]  ;;  %v6575_v31 = vcombine.low %v1146_v16, %v1150_v17 }
 0x2cb   : > { %4372 = vmatprep.subr.bf16.mxu0 %v7476_v34  ;;  %v1162_v34 = vld [vmem:[#allocation8 + $0x990] sm:$0xff] }
 0x2cd   : > { %3522 = vmatpush1.bf16.msra.mxu1 %v6487_v35  ;;  %v1166_v35 = vld [vmem:[#allocation8 + $0x9b0] sm:$0xff] }
 0x2ce   : > { %3523 = vmatprep.subr.bf16.mxu1 %v6496_v36  ;;  %4373 = vmatpush1.bf16.msra.mxu0 %v7474_v37  ;;  %v1245_v36 = vrot.slane %v8535_v32, %v494_v26  ;;  %v1249_v37 = vrot.slane %v8535_v32, %v498_v28  ;;  %v6592_v39 = vcombine.high %v1162_v34, %v1166_v35 }
 0x2cf   : > { %4374 = vmatprep.subr.bf16.mxu0 %v7479_v40 }
 0x2d1   : > { %3524 = vmatpush1.bf16.msra.mxu1 %v6495_v41  ;;  %v1170_v41 = vld [vmem:[#allocation8 + $0x9d0] sm:$0xff] }
 0x2d2   : > { %3525 = vmatprep.subr.bf16.mxu1 %v6504_v42  ;;  %4375 = vmatpush1.bf16.msra.mxu0 %v7477_v43  ;;  %v1174_v42 = vld [vmem:[#allocation8 + $0x9f0] sm:$0xff] }
 0x2d3   : > { %4376 = vmatprep.subr.bf16.mxu0 %v7482_v47  ;;  %v6600_v28 = vcombine.high %v1170_v41, %v1174_v42  ;;  %v6599_v57 = vcombine.low %v1170_v41, %v1174_v42  ;;  %v1234_v41 = vld [vmem:[#allocation8 + $0xbd0] sm:$0xff] }
 0x2d4   : > { %v1238_v42 = vld [vmem:[#allocation8 + $0xbf0] sm:$0xff] }
 0x2d5   : > { %3526 = vmatpush1.bf16.msra.mxu1 %v6503_v49  ;;  %v6591_v49 = vcombine.low %v1162_v34, %v1166_v35 }
 0x2d6   : > { %3527 = vmatprep.subr.bf16.mxu1 %v6512_v50  ;;  %4377 = vmatpush1.bf16.msra.mxu0 %v7480_v7 }
 0x2d7   : > { %4378 = vmatprep.subr.bf16.mxu0 %v7485_v53  ;;  %v1178_v53 = vld [vmem:[#allocation8 + $0xa10] sm:$0xff] }
 0x2d9   : > { %3528 = vmatpush1.bf16.msra.mxu1 %v6511_v54  ;;  %v1182_v54 = vld [vmem:[#allocation8 + $0xa30] sm:$0xff] }
 0x2da   : > { %3529 = vmatprep.subr.bf16.mxu1 %v6520_v55  ;;  %4379 = vmatpush1.bf16.msra.mxu0 %v7483_v56  ;;  %v6608_v58 = vcombine.high %v1178_v53, %v1182_v54 }
 0x2db   : > { %4380 = vmatprep.subr.bf16.mxu0 %v7488_v59  ;;  %v1186_v59 = vld [vmem:[#allocation8 + $0xa50] sm:$0xff] }
 0x2dd   : > { %3530 = vmatpush1.bf16.msra.mxu1 %v6519_v60  ;;  %v1190_v60 = vld [vmem:[#allocation8 + $0xa70] sm:$0xff] }
 0x2de   : > { %3531 = vmatprep.subr.bf16.mxu1 %v6528_v61  ;;  %4381 = vmatpush1.bf16.msra.mxu0 %v7486_v63  ;;  %v6607_v61 = vcombine.low %v1178_v53, %v1182_v54  ;;  %v6616_v63 = vcombine.high %v1186_v59, %v1190_v60 }
 0x2df   : > { %4393 = vmatprep.subr.bf16.mxu0 %v7491_v2  ;;  %v6615_v2 = vcombine.low %v1186_v59, %v1190_v60  ;;  %v7489_v59 = vld [vmem:[%s9463_s7 + $0x100] ss:$8 sps:$4 sm:$0xff]  }
 0x2e1   : > { %3532 = vmatpush1.bf16.msra.mxu1 %v6527_v5 }
 0x2e2   : > { %3533 = vmatprep.subr.bf16.mxu1 %v6536_v6  ;;  %v6624_v6 = vcombine.high %v1194_v0, %v1198_v1  ;;  %v7585_v0 = vld [vmem:[%s9463_s7 + $0x300] ss:$8 sps:$4 sm:$0xff]   ;;  %v7587_v1 = vld [vmem:[%s9463_s7 + $0x304] ss:$8 sps:$4 sm:$0xff]  }
 0x2e5   : > { %3534 = vmatpush1.bf16.msra.mxu1 %v6535_v10  ;;  %v1202_v10 = vld [vmem:[#allocation8 + $0xad0] sm:$0xff] }
 0x2e6   : > { %3546 = vmatprep.subr.bf16.mxu1 %v6544_v11  ;;  %v1206_v11 = vld [vmem:[#allocation8 + $0xaf0] sm:$0xff] }
 0x2e7   : > { %v6631_v27 = vcombine.low %v1202_v10, %v1206_v11 }
 0x2e8   : > { %3536 = vmatmul.mubr.bf16.vlgmr.msra.gmra.mrb[12].mxu1 %v8370_v45  ;;  %v6576_v45 = vcombine.high %v1146_v16, %v1150_v17  ;;  %v1222_v16 = vld [vmem:[#allocation8 + $0xb70] sm:$0xff] }
 0x2e9   : > { %3547 = vmatpush1.bf16.msra.mxu1 %v6543_v15  ;;  %3578 = vmatprep.mubr.bf16.mxu1 %v8390_v4  ;;  %v1154_v4 = vld [vmem:[#allocation8 + $0x950] sm:$0xff] }
 0x2ea   : > { %3548 = vmatprep.subr.bf16.mxu1 %v6552_v18  ;;  %v6584_v33 = vcombine.high %v1154_v4, %v1158_v30  ;;  %v6583_v38 = vcombine.low %v1154_v4, %v1158_v30  ;;  %v1226_v4 = vld [vmem:[#allocation8 + $0xb90] sm:$0xff] }
 0x2eb   : > { %v1230_v30 = vld [vmem:[#allocation8 + $0xbb0] sm:$0xff] }
 0x2ed   : > { %3549 = vmatpush1.bf16.msra.mxu1 %v6551_v21  ;;  %v6632_v21 = vcombine.high %v1202_v10, %v1206_v11  ;;  %v7500_v10 = vld [vmem:[%s9463_s7 + $0x134] ss:$8 sps:$4 sm:$0xff]   ;;  %v7591_v11 = vld [vmem:[%s9463_s7 + $0x320] ss:$8 sps:$4 sm:$0xff]  }
 0x2ee   : > { %3550 = vmatprep.subr.bf16.mxu1 %v6560_v22  ;;  %v1210_v22 = vld [vmem:[#allocation8 + $0xb10] sm:$0xff] }
 0x2ef   : > { %v6639_v17 = vcombine.low %v1210_v22, %v1214_v23 }
 0x2f1   : > { %3551 = vmatpush1.bf16.msra.mxu1 %v6559_v29  ;;  %v6640_v29 = vcombine.high %v1210_v22, %v1214_v23  ;;  %v7597_v22 = vld [vmem:[%s9463_s7 + $0x340] ss:$8 sps:$4 sm:$0xff]   ;;  %v7504_v23 = vld [vmem:[%s9463_s7 + $0x150] ss:$8 sps:$4 sm:$0xff]  }
 0x2f2   : > { %3552 = vmatprep.subr.bf16.mxu1 %v6568_v48  ;;  %v1218_v48 = vld [vmem:[#allocation8 + $0xb50] sm:$0xff] }
 0x2f3   : > { %v6647_v34 = vcombine.low %v1218_v48, %v1222_v16 }
 0x2f5   : > { %3553 = vmatpush1.bf16.msra.mxu1 %v6567_v19  ;;  %v6648_v19 = vcombine.high %v1218_v48, %v1222_v16  ;;  %v7600_v16 = vld [vmem:[%s9463_s7 + $0x350] ss:$8 sps:$4 sm:$0xff]  }
 0x2f6   : > { %3554 = vmatprep.subr.bf16.mxu1 %v6576_v45 }
 0x2f9   : > { %3555 = vmatpush1.bf16.msra.mxu1 %v6575_v31 }
 0x2fa   : > { %3556 = vmatprep.subr.bf16.mxu1 %v6584_v33 }
 0x2fb   : > { %v3322_v40 = vpop.f32.mrb[4].mxu1 }
 0x2fc   : > { %v8543_v43 = vadd.f32 %v3322_v40, %v1245_v36  ;;  %v3324_v44 = vpop.f32.mrb[5].mxu1 }
 0x2fd   : > { %v8545_v3 = vadd.f32 %v3324_v44, %v1249_v37  ;;  %v3326_v47 = vpop.f32.mrb[6].mxu1  ;;  %3557 = vmatpush1.bf16.msra.mxu1 %v6583_v38  ;;  %v6656_v38 = vcombine.high %v1226_v4, %v1230_v30 }
 0x2fe   : > { %v6667_v26 = vmul.f32 -1.442695, %v8543_v43  ;;  %v8548_v50 = vadd.f32 %v3326_v47, %v1245_v36  ;;  %v3328_v7 = vpop.f32.mrb[7].mxu1  ;;  %3558 = vmatprep.subr.bf16.mxu1 %v6592_v39 }
 0x2ff   : > { %v6668_v51 = vmul.f32 -1.442695, %v8545_v3  ;;  %v8551_v46 = vadd.f32 %v3328_v7, %v1249_v37  ;;  %v6664_v7 = vcombine.high %v1234_v41, %v1238_v42 }
 0x300   : > { %7873 = vpow2.f32 %v6667_v26  ;;  %v6669_v55 = vmul.f32 -1.442695, %v8548_v50 }
 0x301   : > { %7875 = vpow2.f32 %v6668_v51  ;;  %v6670_v56 = vmul.f32 -1.442695, %v8551_v46  ;;  %3559 = vmatpush1.bf16.msra.mxu1 %v6591_v49  ;;  %v6655_v49 = vcombine.low %v1226_v4, %v1230_v30  ;;  %v7512_v4 = vld [vmem:[%s9463_s7 + $0x174] ss:$8 sps:$4 sm:$0xff]  }
 0x302   : > { %7877 = vpow2.f32 %v6669_v55  ;;  %3560 = vmatprep.subr.bf16.mxu1 %v6600_v28 }
 0x303   : > { %7879 = vpow2.f32 %v6670_v56 }
 0x305   : > { %3561 = vmatpush1.bf16.msra.mxu1 %v6599_v57 }
 0x306   : > { %3562 = vmatprep.subr.bf16.mxu1 %v6608_v58 }
 0x309   : > { %3563 = vmatpush1.bf16.msra.mxu1 %v6607_v61  ;;  %v7494_v61 = vld [vmem:[%s9463_s7 + $0x114] ss:$8 sps:$4 sm:$0xff]  }
 0x30a   : > { %v7874_v5 = vpop.eup %7873  ;;  %3564 = vmatprep.subr.bf16.mxu1 %v6616_v63 }
 0x30b   : > { %v7876_v8 = vpop.eup %7875  ;;  %v3730_v9 = vadd.f32 1.0, %v7874_v5  ;;  %v7590_v5 = vld [vmem:[%s9463_s7 + $0x314] ss:$8 sps:$4 sm:$0xff]  }
 0x30c   : > { %v7878_v12 = vpop.eup %7877  ;;  %v3731_v13 = vadd.f32 1.0, %v7876_v8  ;;  %v7495_v8 = vld [vmem:[%s9463_s7 + $0x120] ss:$8 sps:$4 sm:$0xff]  }
 0x30d   : > { %v7880_v15 = vpop.eup %7879  ;;  %7881 = vrcp.f32 %v3730_v9  ;;  %v3732_v18 = vadd.f32 1.0, %v7878_v12  ;;  %3565 = vmatpush1.bf16.msra.mxu1 %v6615_v2  ;;  %v7492_v2 = vld [vmem:[%s9463_s7 + $0x110] ss:$8 sps:$4 sm:$0xff]   ;;  %v7593_v9 = vld [vmem:[%s9463_s7 + $0x324] ss:$8 sps:$4 sm:$0xff]  }
 0x30e   : > { %7883 = vrcp.f32 %v3731_v13  ;;  %v3733_v20 = vadd.f32 1.0, %v7880_v15  ;;  %3566 = vmatprep.subr.bf16.mxu1 %v6624_v6  ;;  %v7497_v6 = vld [vmem:[%s9463_s7 + $0x124] ss:$8 sps:$4 sm:$0xff]   ;;  %v7498_v12 = vld [vmem:[%s9463_s7 + $0x130] ss:$8 sps:$4 sm:$0xff]  }
 0x30f   : > { %7885 = vrcp.f32 %v3732_v18  ;;  %v7596_v13 = vld [vmem:[%s9463_s7 + $0x334] ss:$8 sps:$4 sm:$0xff]   ;;  %v7503_v15 = vld [vmem:[%s9463_s7 + $0x144] ss:$8 sps:$4 sm:$0xff]   ;;  %v7594_v18 = vld [vmem:[%s9463_s7 + $0x330] ss:$8 sps:$4 sm:$0xff]  }
 0x310   : > { %7887 = vrcp.f32 %v3733_v20  ;;  %v7599_v20 = vld [vmem:[%s9463_s7 + $0x344] ss:$8 sps:$4 sm:$0xff]  }
 0x311   : > { %3567 = vmatpush1.bf16.msra.mxu1 %v6623_v52  ;;  %v7501_v52 = vld [vmem:[%s9463_s7 + $0x140] ss:$8 sps:$4 sm:$0xff]  }
 0x312   : > { %3568 = vmatprep.subr.bf16.mxu1 %v6632_v21  ;;  %v7506_v21 = vld [vmem:[%s9463_s7 + $0x154] ss:$8 sps:$4 sm:$0xff]  }
 0x315   : > { %3569 = vmatpush1.bf16.msra.mxu1 %v6631_v27  ;;  %v7602_v27 = vld [vmem:[%s9463_s7 + $0x354] ss:$8 sps:$4 sm:$0xff]  }
 0x316   : > { %3570 = vmatprep.subr.bf16.mxu1 %v6640_v29  ;;  %v7509_v29 = vld [vmem:[%s9463_s7 + $0x164] ss:$8 sps:$4 sm:$0xff]  }
 0x317   : > { %v7882_v45 = vpop.eup %7881 }
 0x318   : > { %v7884_v31 = vpop.eup %7883  ;;  %v3742_v36 = vmul.f32 %v7882_v45, %v8543_v43 }
 0x319   : > { %v7886_v33 = vpop.eup %7885  ;;  %3571 = vmatpush1.bf16.msra.mxu1 %v6639_v17  ;;  %v3743_v39 = vmul.f32 %v7884_v31, %v8545_v3  ;;  %v6663_v3 = vcombine.low %v1234_v41, %v1238_v42  ;;  %v7510_v31 = vld [vmem:[%s9463_s7 + $0x170] ss:$8 sps:$4 sm:$0xff]   ;;  %v7527_v41 = vld [vmem:[%s9463_s7 + $0x1c4] ss:$8 sps:$4 sm:$0xff]   ;;  %v7525_v42 = vld [vmem:[%s9463_s7 + $0x1c0] ss:$8 sps:$4 sm:$0xff]  }
 0x31a   : > { %v7888_v35 = vpop.eup %7887  ;;  %v3744_v37 = vmul.f32 %v7886_v33, %v8548_v50  ;;  %3572 = vmatprep.subr.bf16.mxu1 %v6648_v19  ;;  %v7507_v19 = vld [vmem:[%s9463_s7 + $0x160] ss:$8 sps:$4 sm:$0xff]   ;;  %v7515_v33 = vld [vmem:[%s9463_s7 + $0x184] ss:$8 sps:$4 sm:$0xff]  }
 0x31b   : > { %v3745_v40 = vmul.f32 %v7888_v35, %v8551_v46  ;;  %v7518_v35 = vld [vmem:[%s9463_s7 + $0x194] ss:$8 sps:$4 sm:$0xff]  }
 0x31c   : > { %v8559_v44 = vpack.c.bf16 %v3744_v37, %v3742_v36  ;;  %v7516_v36 = vld [vmem:[%s9463_s7 + $0x190] ss:$8 sps:$4 sm:$0xff]   ;;  %v7521_v37 = vld [vmem:[%s9463_s7 + $0x1a4] ss:$8 sps:$4 sm:$0xff]  }
 0x31d   : > { %v3747_v47 = vpack.c.bf16 %v3745_v40, %v3743_v39  ;;  %3573 = vmatpush1.bf16.msra.mxu1 %v6647_v34  ;;  %v7513_v34 = vld [vmem:[%s9463_s7 + $0x180] ss:$8 sps:$4 sm:$0xff]   ;;  %v7524_v39 = vld [vmem:[%s9463_s7 + $0x1b4] ss:$8 sps:$4 sm:$0xff]   ;;  %v7522_v40 = vld [vmem:[%s9463_s7 + $0x1b0] ss:$8 sps:$4 sm:$0xff]  }
 0x31e   : > { %v3749_v26 = vshrl.u32 %v8559_v44, 16  ;;  %3574 = vmatprep.subr.bf16.mxu1 %v6656_v38  ;;  %v3752_v43 = vshll.u32 %v8559_v44, 16  ;;  %v7519_v38 = vld [vmem:[%s9463_s7 + $0x1a0] ss:$8 sps:$4 sm:$0xff]  }
 0x31f   : > { %v3756_v50 = vshrl.u32 %v3747_v47, 16  ;;  %v3759_v28 = vshll.u32 %v3747_v47, 16 }
 0x320   : > { %v3751_v51 = vrot.slane %v3749_v26, 7  ;;  %v3766_v53 = vrot.slane %v3752_v43, 1 }
 0x321   : > { %3575 = vmatpush1.bf16.msra.mxu1 %v6655_v49  ;;  %v3758_v46 = vrot.slane %v3756_v50, 7  ;;  %v3768_v54 = vrot.slane %v3759_v28, 1  ;;  %v7528_v49 = vld [vmem:[%s9463_s7 + $0x1d0] ss:$8 sps:$4 sm:$0xff]  }
 0x322   : > { %3576 = vmatprep.subr.bf16.mxu1 %v6664_v7  ;;  %v3754_v55 = vor.u32 %v3752_v43, %v3751_v51  ;;  %v8563_v56 = vor.u32 %v3766_v53, %v3749_v26  ;;  %v7533_v26 = vld [vmem:[%s9463_s7 + $0x1e4] ss:$8 sps:$4 sm:$0xff]   ;;  %v7531_v7 = vld [vmem:[%s9463_s7 + $0x1e0] ss:$8 sps:$4 sm:$0xff]   ;;  %v7536_v43 = vld [vmem:[%s9463_s7 + $0x1f4] ss:$8 sps:$4 sm:$0xff]  }
 0x323   : > { %v3761_v57 = vor.u32 %v3759_v28, %v3758_v46  ;;  %v8565_v58 = vor.u32 %v3768_v54, %v3756_v50  ;;  %v7534_v50 = vld [vmem:[%s9463_s7 + $0x1f0] ss:$8 sps:$4 sm:$0xff]   ;;  %v7539_v28 = vld [vmem:[%s9463_s7 + $0x204] ss:$8 sps:$4 sm:$0xff]   ;;  %v7537_v51 = vld [vmem:[%s9463_s7 + $0x200] ss:$8 sps:$4 sm:$0xff]  }
 0x324   : > { %v3764_v63 = vsel %vm8348_vm5, 0, %v3754_v55  ;;  %v7542_v53 = vld [vmem:[%s9463_s7 + $0x214] ss:$8 sps:$4 sm:$0xff]   ;;  %v7540_v46 = vld [vmem:[%s9463_s7 + $0x210] ss:$8 sps:$4 sm:$0xff]  }
 0x325   : > { %3577 = vmatpush1.bf16.msra.mxu1 %v6663_v3  ;;  %v3765_v60 = vsel %vm8348_vm5, 0, %v3761_v57  ;;  %v3773_v3 = vsel %vm8342_vm2, %v8565_v58, 0  ;;  %v7545_v54 = vld [vmem:[%s9463_s7 + $0x224] ss:$8 sps:$4 sm:$0xff]   ;;  %v7548_v55 = vld [vmem:[%s9463_s7 + $0x234] ss:$8 sps:$4 sm:$0xff]  }
 0x326   : > { %4382 = vmatprep.mubr.bf16.mxu0 %v3765_v60  ;;  %5116 = vmatprep.subr.bf16.mxu1 %v7587_v1  ;;  %v7546_v57 = vld [vmem:[%s9463_s7 + $0x230] ss:$8 sps:$4 sm:$0xff]   ;;  %v7551_v58 = vld [vmem:[%s9463_s7 + $0x244] ss:$8 sps:$4 sm:$0xff]   ;;  %v7554_v60 = vld [vmem:[%s9463_s7 + $0x254] ss:$8 sps:$4 sm:$0xff]  }
 0x327   : > { %4383 = vmatmul.mubr.bf16.vlgmr.msra.gmra.mrb[4].mxu0 %v3764_v63  ;;  %v7557_v63 = vld [vmem:[%s9463_s7 + $0x264] ss:$8 sps:$4 sm:$0xff]   ;;  %v7560_v1 = vld [vmem:[%s9463_s7 + $0x274] ss:$8 sps:$4 sm:$0xff]  }
 0x328   : > { %4394 = vmatpush1.bf16.msra.mxu0 %v7489_v59  ;;  %3579 = vmatmul.mubr.bf16.vlgmr.msra.gmra.mrb[12].mxu1 %v8409_v24  ;;  %v7588_v24 = vld [vmem:[%s9463_s7 + $0x310] ss:$8 sps:$4 sm:$0xff]   ;;  %v7549_v59 = vld [vmem:[%s9463_s7 + $0x240] ss:$8 sps:$4 sm:$0xff]  }
 0x329   : > { %4425 = vmatprep.mubr.bf16.mxu0 %v3747_v47  ;;  %4395 = vmatprep.subr.bf16.mxu0 %v7494_v61  ;;  %v7530_v47 = vld [vmem:[%s9463_s7 + $0x1d4] ss:$8 sps:$4 sm:$0xff]   ;;  %v7552_v61 = vld [vmem:[%s9463_s7 + $0x250] ss:$8 sps:$4 sm:$0xff]  }
 0x32a   : > { %5117 = vmatpush1.bf16.msra.mxu1 %v7585_v0  ;;  %v7555_v0 = vld [vmem:[%s9463_s7 + $0x260] ss:$8 sps:$4 sm:$0xff]  }
 0x32b   : > { %5118 = vmatprep.subr.bf16.mxu1 %v7590_v5  ;;  %v7563_v5 = vld [vmem:[%s9463_s7 + $0x284] ss:$8 sps:$4 sm:$0xff]  }
 0x32c   : > { %4396 = vmatpush1.bf16.msra.mxu0 %v7492_v2  ;;  %v7558_v2 = vld [vmem:[%s9463_s7 + $0x270] ss:$8 sps:$4 sm:$0xff]  }
 0x32d   : > { %4397 = vmatprep.subr.bf16.mxu0 %v7497_v6  ;;  %v7561_v6 = vld [vmem:[%s9463_s7 + $0x280] ss:$8 sps:$4 sm:$0xff]  }
 0x32e   : > { %5119 = vmatpush1.bf16.msra.mxu1 %v7588_v24  ;;  %v7566_v24 = vld [vmem:[%s9463_s7 + $0x294] ss:$8 sps:$4 sm:$0xff]  }
 0x32f   : > { %5120 = vmatprep.subr.bf16.mxu1 %v7593_v9  ;;  %v7569_v9 = vld [vmem:[%s9463_s7 + $0x2a4] ss:$8 sps:$4 sm:$0xff]  }
 0x330   : > { %4398 = vmatpush1.bf16.msra.mxu0 %v7495_v8  ;;  %v7564_v8 = vld [vmem:[%s9463_s7 + $0x290] ss:$8 sps:$4 sm:$0xff]  }
 0x331   : > { %4399 = vmatprep.subr.bf16.mxu0 %v7500_v10  ;;  %v7567_v10 = vld [vmem:[%s9463_s7 + $0x2a0] ss:$8 sps:$4 sm:$0xff]  }
 0x332   : > { %5121 = vmatpush1.bf16.msra.mxu1 %v7591_v11  ;;  %v7572_v11 = vld [vmem:[%s9463_s7 + $0x2b4] ss:$8 sps:$4 sm:$0xff]  }
 0x333   : > { %5122 = vmatprep.subr.bf16.mxu1 %v7596_v13  ;;  %v7575_v13 = vld [vmem:[%s9463_s7 + $0x2c4] ss:$8 sps:$4 sm:$0xff]  }
 0x334   : > { %4400 = vmatpush1.bf16.msra.mxu0 %v7498_v12  ;;  %v7570_v12 = vld [vmem:[%s9463_s7 + $0x2b0] ss:$8 sps:$4 sm:$0xff]  }
 0x335   : > { %4401 = vmatprep.subr.bf16.mxu0 %v7503_v15  ;;  %v7573_v15 = vld [vmem:[%s9463_s7 + $0x2c0] ss:$8 sps:$4 sm:$0xff]  }
 0x336   : > { %5123 = vmatpush1.bf16.msra.mxu1 %v7594_v18  ;;  %v7578_v18 = vld [vmem:[%s9463_s7 + $0x2d4] ss:$8 sps:$4 sm:$0xff]  }
 0x337   : > { %5124 = vmatprep.subr.bf16.mxu1 %v7599_v20  ;;  %v7581_v20 = vld [vmem:[%s9463_s7 + $0x2e4] ss:$8 sps:$4 sm:$0xff]  }
 0x338   : > { %4402 = vmatpush1.bf16.msra.mxu0 %v7501_v52  ;;  %v7576_v52 = vld [vmem:[%s9463_s7 + $0x2d0] ss:$8 sps:$4 sm:$0xff]  }
 0x339   : > { %4403 = vmatprep.subr.bf16.mxu0 %v7506_v21  ;;  %v7579_v21 = vld [vmem:[%s9463_s7 + $0x2e0] ss:$8 sps:$4 sm:$0xff]  }
 0x33a   : > { %5125 = vmatpush1.bf16.msra.mxu1 %v7597_v22  ;;  %v7584_v22 = vld [vmem:[%s9463_s7 + $0x2f4] ss:$8 sps:$4 sm:$0xff]  }
 0x33b   : > { %v8641_v48 = vpop.f32.mrb[8].mxu1  ;;  %5126 = vmatprep.subr.bf16.mxu1 %v7602_v27  ;;  %v3772_v27 = vsel %vm8342_vm2, %v8563_v56, 0  ;;  %v7611_v56 = vld [vmem:[%s9463_s7 + $0x384] ss:$8 sps:$4 sm:$0xff]  }
 0x33c   : > { %4404 = vmatpush1.bf16.msra.mxu0 %v7504_v23  ;;  %v8646_v17 = vpop.f32.mrb[9].mxu1  ;;  %v7582_v23 = vld [vmem:[%s9463_s7 + $0x2f0] ss:$8 sps:$4 sm:$0xff]  }
 0x33d   : > { %v8651_v45 = vpop.f32.mrb[10].mxu1  ;;  %4405 = vmatprep.subr.bf16.mxu0 %v7509_v29  ;;  %v7605_v29 = vld [vmem:[%s9463_s7 + $0x364] ss:$8 sps:$4 sm:$0xff]  }
 0x33e   : > { %v8656_v30 = vpop.f32.mrb[11].mxu1  ;;  %5127 = vmatpush1.bf16.msra.mxu1 %v7600_v16  ;;  %v7603_v16 = vld [vmem:[%s9463_s7 + $0x360] ss:$8 sps:$4 sm:$0xff]  }
 0x33f   : > { %5128 = vmatprep.subr.bf16.mxu1 %v7605_v29 }
 0x340   : > { %4406 = vmatpush1.bf16.msra.mxu0 %v7507_v19  ;;  %v7608_v19 = vld [vmem:[%s9463_s7 + $0x374] ss:$8 sps:$4 sm:$0xff]  }
 0x341   : > { %4407 = vmatprep.subr.bf16.mxu0 %v7512_v4  ;;  %v7606_v4 = vld [vmem:[%s9463_s7 + $0x370] ss:$8 sps:$4 sm:$0xff]  }
 0x342   : > { %5129 = vmatpush1.bf16.msra.mxu1 %v7603_v16 }
 0x343   : > { %5130 = vmatprep.subr.bf16.mxu1 %v7608_v19 }
 0x344   : > { %4408 = vmatpush1.bf16.msra.mxu0 %v7510_v31  ;;  %v7609_v31 = vld [vmem:[%s9463_s7 + $0x380] ss:$8 sps:$4 sm:$0xff]  }
 0x345   : > { %4409 = vmatprep.subr.bf16.mxu0 %v7515_v33  ;;  %v7614_v33 = vld [vmem:[%s9463_s7 + $0x394] ss:$8 sps:$4 sm:$0xff]  }
 0x346   : > { %5131 = vmatpush1.bf16.msra.mxu1 %v7606_v4 }
 0x347   : > { %5132 = vmatprep.subr.bf16.mxu1 %v7611_v56 }
 0x348   : > { %4410 = vmatpush1.bf16.msra.mxu0 %v7513_v34  ;;  %v7612_v34 = vld [vmem:[%s9463_s7 + $0x390] ss:$8 sps:$4 sm:$0xff]  }
 0x349   : > { %4411 = vmatprep.subr.bf16.mxu0 %v7518_v35  ;;  %v7617_v35 = vld [vmem:[%s9463_s7 + $0x3a4] ss:$8 sps:$4 sm:$0xff]  }
 0x34a   : > { %5133 = vmatpush1.bf16.msra.mxu1 %v7609_v31 }
 0x34b   : > { %5134 = vmatprep.subr.bf16.mxu1 %v7614_v33 }
 0x34c   : > { %4412 = vmatpush1.bf16.msra.mxu0 %v7516_v36  ;;  %v7615_v36 = vld [vmem:[%s9463_s7 + $0x3a0] ss:$8 sps:$4 sm:$0xff]  }
 0x34d   : > { %4413 = vmatprep.subr.bf16.mxu0 %v7521_v37  ;;  %v7620_v37 = vld [vmem:[%s9463_s7 + $0x3b4] ss:$8 sps:$4 sm:$0xff]  }
 0x34e   : > { %5135 = vmatpush1.bf16.msra.mxu1 %v7612_v34 }
 0x34f   : > { %5136 = vmatprep.subr.bf16.mxu1 %v7617_v35 }
 0x350   : > { %4414 = vmatpush1.bf16.msra.mxu0 %v7519_v38  ;;  %v7618_v38 = vld [vmem:[%s9463_s7 + $0x3b0] ss:$8 sps:$4 sm:$0xff]  }
 0x351   : > { %4415 = vmatprep.subr.bf16.mxu0 %v7524_v39  ;;  %v7623_v39 = vld [vmem:[%s9463_s7 + $0x3c4] ss:$8 sps:$4 sm:$0xff]  }
 0x352   : > { %5137 = vmatpush1.bf16.msra.mxu1 %v7615_v36 }
 0x353   : > { %5138 = vmatprep.subr.bf16.mxu1 %v7620_v37  ;;  %v7633_v37 = vld [vmem:[%s9463_s7 + $0x400] ss:$8 sps:$4 sm:$0xff]  }
 0x354   : > { %4416 = vmatpush1.bf16.msra.mxu0 %v7522_v40  ;;  %v7621_v40 = vld [vmem:[%s9463_s7 + $0x3c0] ss:$8 sps:$4 sm:$0xff]  }
 0x355   : > { %4417 = vmatprep.subr.bf16.mxu0 %v7527_v41  ;;  %v7626_v41 = vld [vmem:[%s9463_s7 + $0x3d4] ss:$8 sps:$4 sm:$0xff]  }
 0x356   : > { %5139 = vmatpush1.bf16.msra.mxu1 %v7618_v38 }
 0x357   : > { %5140 = vmatprep.subr.bf16.mxu1 %v7623_v39  ;;  %v7638_v39 = vld [vmem:[%s9463_s7 + $0x414] ss:$8 sps:$4 sm:$0xff]  }
 0x358   : > { %4418 = vmatpush1.bf16.msra.mxu0 %v7525_v42  ;;  %v7624_v42 = vld [vmem:[%s9463_s7 + $0x3d0] ss:$8 sps:$4 sm:$0xff]  }
 0x359   : > { %4419 = vmatprep.subr.bf16.mxu0 %v7530_v47  ;;  %v7629_v47 = vld [vmem:[%s9463_s7 + $0x3e4] ss:$8 sps:$4 sm:$0xff]  }
 0x35a   : > { %5141 = vmatpush1.bf16.msra.mxu1 %v7621_v40 }
 0x35b   : > { %5142 = vmatprep.subr.bf16.mxu1 %v7626_v41  ;;  %v7729_v41 = vld [vmem:[%s9463_s7 + $0x600] ss:$8 sps:$4 sm:$0xff]  }
 0x35c   : > { %4420 = vmatpush1.bf16.msra.mxu0 %v7528_v49  ;;  %v7627_v49 = vld [vmem:[%s9463_s7 + $0x3e0] ss:$8 sps:$4 sm:$0xff]  }
 0x35d   : > { %4421 = vmatprep.subr.bf16.mxu0 %v7533_v26  ;;  %v7632_v26 = vld [vmem:[%s9463_s7 + $0x3f4] ss:$8 sps:$4 sm:$0xff]  }
 0x35e   : > { %5143 = vmatpush1.bf16.msra.mxu1 %v7624_v42  ;;  %v7731_v42 = vld [vmem:[%s9463_s7 + $0x604] ss:$8 sps:$4 sm:$0xff]  }
 0x35f   : > { %5144 = vmatprep.subr.bf16.mxu1 %v7629_v47  ;;  %v7636_v47 = vld [vmem:[%s9463_s7 + $0x410] ss:$8 sps:$4 sm:$0xff]  }
 0x360   : > { %4422 = vmatpush1.bf16.msra.mxu0 %v7531_v7  ;;  %v7630_v7 = vld [vmem:[%s9463_s7 + $0x3f0] ss:$8 sps:$4 sm:$0xff]  }
 0x361   : > { %4423 = vmatprep.subr.bf16.mxu0 %v7536_v43  ;;  %v7635_v43 = vld [vmem:[%s9463_s7 + $0x404] ss:$8 sps:$4 sm:$0xff]  }
 0x362   : > { %5145 = vmatpush1.bf16.msra.mxu1 %v7627_v49  ;;  %v7734_v49 = vld [vmem:[%s9463_s7 + $0x614] ss:$8 sps:$4 sm:$0xff]  }
 0x363   : > { %5146 = vmatprep.subr.bf16.mxu1 %v7632_v26  ;;  %v7641_v26 = vld [vmem:[%s9463_s7 + $0x424] ss:$8 sps:$4 sm:$0xff]  }
 0x364   : > { %4424 = vmatpush1.bf16.msra.mxu0 %v7534_v50  ;;  %v1252_v50 = vsub.s32 2, %v8362_v25 }
 0x365   : > { %4436 = vmatprep.subr.bf16.mxu0 %v7539_v28  ;;  %v1256_v28 = vsub.s32 3, %v8362_v25 }
 0x366   : > { %5147 = vmatpush1.bf16.msra.mxu1 %v7630_v7  ;;  %v7732_v7 = vld [vmem:[%s9463_s7 + $0x610] ss:$8 sps:$4 sm:$0xff]  }
 0x367   : > { %4426 = vmatmul.mubr.bf16.vlgmr.msra.gmra.mrb[4].mxu0 %v8559_v44  ;;  %v7543_v44 = vld [vmem:[%s9463_s7 + $0x220] ss:$8 sps:$4 sm:$0xff]   ;;  %5159 = vmatprep.subr.bf16.mxu1 %v7635_v43  ;;  %v7737_v43 = vld [vmem:[%s9463_s7 + $0x624] ss:$8 sps:$4 sm:$0xff]  }
 0x368   : > { %4437 = vmatpush1.bf16.msra.mxu0 %v7537_v51  ;;  %4468 = vmatprep.mubr.bf16.mxu0 %v3773_v3  ;;  %v1253_v51 = vrot.slane %v8535_v32, %v1252_v50  ;;  %v7639_v50 = vld [vmem:[%s9463_s7 + $0x420] ss:$8 sps:$4 sm:$0xff]  }
 0x369   : > { %4438 = vmatprep.subr.bf16.mxu0 %v7542_v53  ;;  %v1257_v53 = vrot.slane %v8535_v32, %v1256_v28  ;;  %v7644_v28 = vld [vmem:[%s9463_s7 + $0x434] ss:$8 sps:$4 sm:$0xff]  }
 0x36a   : > { %v3366_v3 = vadd.f32 %v8641_v48, %v1253_v51 }
 0x36c   : > { %4439 = vmatpush1.bf16.msra.mxu0 %v7540_v46  ;;  %v3368_v46 = vadd.f32 %v8646_v17, %v1257_v53 }
 0x36d   : > { %4440 = vmatprep.subr.bf16.mxu0 %v7545_v54 }
 0x370   : > { %4441 = vmatpush1.bf16.msra.mxu0 %v7543_v44  ;;  %v3370_v44 = vadd.f32 %v8651_v45, %v1253_v51  ;;  %v7735_v51 = vld [vmem:[%s9463_s7 + $0x620] ss:$8 sps:$4 sm:$0xff]  }
 0x371   : > { %4442 = vmatprep.subr.bf16.mxu0 %v7548_v55 }
 0x374   : > { %4443 = vmatpush1.bf16.msra.mxu0 %v7546_v57 }
 0x375   : > { %4444 = vmatprep.subr.bf16.mxu0 %v7551_v58  ;;  %v3372_v58 = vadd.f32 %v8656_v30, %v1257_v53  ;;  %v7740_v53 = vld [vmem:[%s9463_s7 + $0x634] ss:$8 sps:$4 sm:$0xff]  }
 0x378   : > { %4445 = vmatpush1.bf16.msra.mxu0 %v7549_v59 }
 0x379   : > { %4446 = vmatprep.subr.bf16.mxu0 %v7554_v60 }
 0x37c   : > { %4447 = vmatpush1.bf16.msra.mxu0 %v7552_v61 }
 0x37d   : > { %4448 = vmatprep.subr.bf16.mxu0 %v7557_v63 }
 0x380   : > { %4449 = vmatpush1.bf16.msra.mxu0 %v7555_v0 }
 0x381   : > { %4450 = vmatprep.subr.bf16.mxu0 %v7560_v1 }
 0x384   : > { %4451 = vmatpush1.bf16.msra.mxu0 %v7558_v2 }
 0x385   : > { %4452 = vmatprep.subr.bf16.mxu0 %v7563_v5 }
 0x388   : > { %4453 = vmatpush1.bf16.msra.mxu0 %v7561_v6 }
 0x389   : > { %4454 = vmatprep.subr.bf16.mxu0 %v7566_v24 }
 0x38c   : > { %4455 = vmatpush1.bf16.msra.mxu0 %v7564_v8 }
 0x38d   : > { %4456 = vmatprep.subr.bf16.mxu0 %v7569_v9 }
 0x390   : > { %4457 = vmatpush1.bf16.msra.mxu0 %v7567_v10 }
 0x391   : > { %4458 = vmatprep.subr.bf16.mxu0 %v7572_v11 }
 0x394   : > { %4459 = vmatpush1.bf16.msra.mxu0 %v7570_v12 }
 0x395   : > { %4460 = vmatprep.subr.bf16.mxu0 %v7575_v13 }
 0x398   : > { %4461 = vmatpush1.bf16.msra.mxu0 %v7573_v15 }
 0x399   : > { %4462 = vmatprep.subr.bf16.mxu0 %v7578_v18 }
 0x39c   : > { %4463 = vmatpush1.bf16.msra.mxu0 %v7576_v52 }
 0x39d   : > { %4464 = vmatprep.subr.bf16.mxu0 %v7581_v20 }
 0x3a0   : > { %4465 = vmatpush1.bf16.msra.mxu0 %v7579_v21 }
 0x3a1   : > { %4466 = vmatprep.subr.bf16.mxu0 %v7584_v22 }
 0x3a4   : > { %4467 = vmatpush1.bf16.msra.mxu0 %v7582_v23 }
 0x3a5   : > { %5878 = vmatprep.subr.bf16.mxu0 %v7731_v42  ;;  %v7708_v42 = vld [vmem:[%s9463_s7 + $0x590] ss:$8 sps:$4 sm:$0xff]  }
 0x3a7   : > { %4469 = vmatmul.mubr.bf16.vlgmr.msra.gmra.mrb[4].mxu0 %v3772_v27 }
 0x3a8   : > { %5879 = vmatpush1.bf16.msra.mxu0 %v7729_v41  ;;  %v7710_v41 = vld [vmem:[%s9463_s7 + $0x594] ss:$8 sps:$4 sm:$0xff]  }
 0x3a9   : > { %5880 = vmatprep.subr.bf16.mxu0 %v7734_v49  ;;  %v7711_v49 = vld [vmem:[%s9463_s7 + $0x5a0] ss:$8 sps:$4 sm:$0xff]  }
 0x3ac   : > { %5881 = vmatpush1.bf16.msra.mxu0 %v7732_v7  ;;  %v7714_v7 = vld [vmem:[%s9463_s7 + $0x5b0] ss:$8 sps:$4 sm:$0xff]  }
 0x3ad   : > { %5882 = vmatprep.subr.bf16.mxu0 %v7737_v43  ;;  %v7719_v43 = vld [vmem:[%s9463_s7 + $0x5c4] ss:$8 sps:$4 sm:$0xff]  }
 0x3b0   : > { %5883 = vmatpush1.bf16.msra.mxu0 %v7735_v51  ;;  %v7720_v51 = vld [vmem:[%s9463_s7 + $0x5d0] ss:$8 sps:$4 sm:$0xff]  }
 0x3b1   : > { %5884 = vmatprep.subr.bf16.mxu0 %v7740_v53  ;;  %v7725_v53 = vld [vmem:[%s9463_s7 + $0x5e4] ss:$8 sps:$4 sm:$0xff]  }
 0x47a   : > { %v4470_v54 = vpop.f32.mrb[4].mxu0 }
 0x47b   : > { %v7188_v55 = vadd.f32 %v4470_v54, %v3366_v3  ;;  %v4472_v57 = vpop.f32.mrb[5].mxu0  ;;  %v7642_v3 = vld [vmem:[%s9463_s7 + $0x430] ss:$8 sps:$4 sm:$0xff]  }
 0x47c   : > { %v7190_v59 = vadd.f32 %v4472_v57, %v3368_v46  ;;  %v4474_v60 = vpop.f32.mrb[6].mxu0  ;;  %v7647_v46 = vld [vmem:[%s9463_s7 + $0x444] ss:$8 sps:$4 sm:$0xff]   ;;  %v7738_v54 = vld [vmem:[%s9463_s7 + $0x630] ss:$8 sps:$4 sm:$0xff]  }
 0x47d   : > { %v6767_v61 = vmul.f32 -1.442695, %v7188_v55  ;;  %v7192_v63 = vadd.f32 %v4474_v60, %v3370_v44  ;;  %v4476_v0 = vpop.f32.mrb[7].mxu0  ;;  %v7743_v44 = vld [vmem:[%s9463_s7 + $0x644] ss:$8 sps:$4 sm:$0xff]   ;;  %5885 = vmatpush1.bf16.msra.mxu0 %v7738_v54 }
 0x47e   : > { %v6768_v1 = vmul.f32 -1.442695, %v7190_v59  ;;  %v7194_v2 = vadd.f32 %v4476_v0, %v3372_v58  ;;  %v7650_v57 = vld [vmem:[%s9463_s7 + $0x454] ss:$8 sps:$4 sm:$0xff]   ;;  %v7741_v58 = vld [vmem:[%s9463_s7 + $0x640] ss:$8 sps:$4 sm:$0xff]   ;;  %5886 = vmatprep.subr.bf16.mxu0 %v7743_v44 }
 0x47f   : > { %7889 = vpow2.f32 %v6767_v61  ;;  %v6769_v32 = vmul.f32 -1.442695, %v7192_v63  ;;  %v7648_v60 = vld [vmem:[%s9463_s7 + $0x450] ss:$8 sps:$4 sm:$0xff]   ;;  %v7653_v61 = vld [vmem:[%s9463_s7 + $0x464] ss:$8 sps:$4 sm:$0xff]  }
 0x480   : > { %7891 = vpow2.f32 %v6768_v1  ;;  %v6770_v48 = vmul.f32 -1.442695, %v7194_v2  ;;  %v7651_v0 = vld [vmem:[%s9463_s7 + $0x460] ss:$8 sps:$4 sm:$0xff]   ;;  %v7656_v1 = vld [vmem:[%s9463_s7 + $0x474] ss:$8 sps:$4 sm:$0xff]  }
 0x481   : > { %7893 = vpow2.f32 %v6769_v32  ;;  %5887 = vmatpush1.bf16.msra.mxu0 %v7741_v58  ;;  %v7659_v32 = vld [vmem:[%s9463_s7 + $0x484] ss:$8 sps:$4 sm:$0xff]   ;;  %v7726_v54 = vld [vmem:[%s9463_s7 + $0x5f0] ss:$8 sps:$4 sm:$0xff]   ;;  %v7752_v58 = vld [vmem:[%s9463_s7 + $0x674] ss:$8 sps:$4 sm:$0xff]  }
 0x482   : > { %7895 = vpow2.f32 %v6770_v48  ;;  %v7657_v48 = vld [vmem:[%s9463_s7 + $0x480] ss:$8 sps:$4 sm:$0xff]  }
 0x489   : > { %v7890_v17 = vpop.eup %7889 }
 0x48a   : > { %v7892_v45 = vpop.eup %7891  ;;  %v4491_v5 = vadd.f32 1.0, %v7890_v17  ;;  %v7662_v17 = vld [vmem:[%s9463_s7 + $0x494] ss:$8 sps:$4 sm:$0xff]  }
 0x48b   : > { %v7894_v6 = vpop.eup %7893  ;;  %v4492_v24 = vadd.f32 1.0, %v7892_v45  ;;  %v7660_v45 = vld [vmem:[%s9463_s7 + $0x490] ss:$8 sps:$4 sm:$0xff]  }
 0x48c   : > { %v7896_v30 = vpop.eup %7895  ;;  %7897 = vrcp.f32 %v4491_v5  ;;  %v4493_v8 = vadd.f32 1.0, %v7894_v6  ;;  %v7665_v5 = vld [vmem:[%s9463_s7 + $0x4a4] ss:$8 sps:$4 sm:$0xff]   ;;  %v7663_v6 = vld [vmem:[%s9463_s7 + $0x4a0] ss:$8 sps:$4 sm:$0xff]  }
 0x48d   : > { %7899 = vrcp.f32 %v4492_v24  ;;  %v4494_v9 = vadd.f32 1.0, %v7896_v30  ;;  %v7668_v24 = vld [vmem:[%s9463_s7 + $0x4b4] ss:$8 sps:$4 sm:$0xff]   ;;  %v7666_v30 = vld [vmem:[%s9463_s7 + $0x4b0] ss:$8 sps:$4 sm:$0xff]  }
 0x48e   : > { %7901 = vrcp.f32 %v4493_v8  ;;  %v7671_v8 = vld [vmem:[%s9463_s7 + $0x4c4] ss:$8 sps:$4 sm:$0xff]  }
 0x48f   : > { %7903 = vrcp.f32 %v4494_v9  ;;  %v7669_v9 = vld [vmem:[%s9463_s7 + $0x4c0] ss:$8 sps:$4 sm:$0xff]  }
 0x496   : > { %v7898_v10 = vpop.eup %7897 }
 0x497   : > { %v7900_v11 = vpop.eup %7899  ;;  %v4503_v12 = vmul.f32 %v7898_v10, %v7188_v55  ;;  %v7645_v55 = vld [vmem:[%s9463_s7 + $0x440] ss:$8 sps:$4 sm:$0xff]   ;;  %v7674_v10 = vld [vmem:[%s9463_s7 + $0x4d4] ss:$8 sps:$4 sm:$0xff]  }
 0x498   : > { %v7902_v13 = vpop.eup %7901  ;;  %v4504_v15 = vmul.f32 %v7900_v11, %v7190_v59  ;;  %v7746_v59 = vld [vmem:[%s9463_s7 + $0x654] ss:$8 sps:$4 sm:$0xff]   ;;  %v7672_v11 = vld [vmem:[%s9463_s7 + $0x4d0] ss:$8 sps:$4 sm:$0xff]  }
 0x499   : > { %v7904_v18 = vpop.eup %7903  ;;  %4507 = vst [vmem:[%s8884_s18] sm:$0xff] %v4503_v12  ;;  %v4505_v52 = vmul.f32 %v7902_v13, %v7192_v63  ;;  %v7744_v63 = vld [vmem:[%s9463_s7 + $0x650] ss:$8 sps:$4 sm:$0xff]   ;;  %5888 = vmatprep.subr.bf16.mxu0 %v7746_v59  ;;  %v7675_v13 = vld [vmem:[%s9463_s7 + $0x4e0] ss:$8 sps:$4 sm:$0xff]  }
 0x49a   : > { %4508 = vst [vmem:[%s8884_s18 + $0x8] sm:$0xff] %v4504_v15  ;;  %v4506_v20 = vmul.f32 %v7904_v18, %v7194_v2  ;;  %5889 = vmatpush1.bf16.msra.mxu0 %v7744_v63  ;;  %v7654_v2 = vld [vmem:[%s9463_s7 + $0x470] ss:$8 sps:$4 sm:$0xff]  }
 0x49b   : > { %4509 = vst [vmem:[%s8884_s18 + $0x10] sm:$0xff] %v4505_v52  ;;  %v8889_v21 = vpack.c.bf16 %v4505_v52, %v4503_v12  ;;  %v7677_v12 = vld [vmem:[%s9463_s7 + $0x4e4] ss:$8 sps:$4 sm:$0xff]   ;;  %v7678_v18 = vld [vmem:[%s9463_s7 + $0x4f0] ss:$8 sps:$4 sm:$0xff]  }
 0x49c   : > { %4510 = vst [vmem:[%s8884_s18 + $0x18] sm:$0xff] %v4506_v20  ;;  %v4512_v22 = vpack.c.bf16 %v4506_v20, %v4504_v15  ;;  %v7680_v15 = vld [vmem:[%s9463_s7 + $0x4f4] ss:$8 sps:$4 sm:$0xff]   ;;  %v7683_v52 = vld [vmem:[%s9463_s7 + $0x504] ss:$8 sps:$4 sm:$0xff]  }
 0x49d   : > { %v4514_v23 = vshrl.u32 %v8889_v21, 16  ;;  %v4517_v27 = vshll.u32 %v8889_v21, 16  ;;  %v7681_v20 = vld [vmem:[%s9463_s7 + $0x500] ss:$8 sps:$4 sm:$0xff]   ;;  %v7750_v59 = vld [vmem:[%s9463_s7 + $0x670] ss:$8 sps:$4 sm:$0xff]  }
 0x49e   : > { %v4521_v29 = vshrl.u32 %v4512_v22, 16  ;;  %v4524_v16 = vshll.u32 %v4512_v22, 16  ;;  %v7756_v63 = vld [vmem:[%s9463_s7 + $0x690] ss:$8 sps:$4 sm:$0xff]  }
 0x49f   : > { %v4516_v19 = vrot.slane %v4514_v23, 7  ;;  %v4531_v4 = vrot.slane %v4517_v27, 1 }
 0x4a0   : > { %v4523_v56 = vrot.slane %v4521_v29, 7  ;;  %v4533_v31 = vrot.slane %v4524_v16, 1 }
 0x4a1   : > { %v4519_v33 = vor.u32 %v4517_v27, %v4516_v19  ;;  %v8894_v34 = vor.u32 %v4531_v4, %v4514_v23  ;;  %v7684_v27 = vld [vmem:[%s9463_s7 + $0x510] ss:$8 sps:$4 sm:$0xff]   ;;  %v7695_v4 = vld [vmem:[%s9463_s7 + $0x544] ss:$8 sps:$4 sm:$0xff]  }
 0x4a2   : > { %v4526_v35 = vor.u32 %v4524_v16, %v4523_v56  ;;  %v8896_v36 = vor.u32 %v4533_v31, %v4521_v29  ;;  %v7689_v29 = vld [vmem:[%s9463_s7 + $0x524] ss:$8 sps:$4 sm:$0xff]   ;;  %v7692_v16 = vld [vmem:[%s9463_s7 + $0x534] ss:$8 sps:$4 sm:$0xff]   ;;  %v7690_v19 = vld [vmem:[%s9463_s7 + $0x530] ss:$8 sps:$4 sm:$0xff]  }
 0x4a3   : > { %v4529_v40 = vsel %vm8348_vm5, 0, %v4519_v33  ;;  %v7693_v56 = vld [vmem:[%s9463_s7 + $0x540] ss:$8 sps:$4 sm:$0xff]   ;;  %v7698_v31 = vld [vmem:[%s9463_s7 + $0x554] ss:$8 sps:$4 sm:$0xff]   ;;  %v4537_v44 = vsel %vm8342_vm2, %v8894_v34, 0 }
 0x4a4   : > { %v4530_v38 = vsel %vm8348_vm5, 0, %v4526_v35  ;;  %v4538_v23 = vsel %vm8342_vm2, %v8896_v36, 0  ;;  %v7696_v33 = vld [vmem:[%s9463_s7 + $0x550] ss:$8 sps:$4 sm:$0xff]   ;;  %v7701_v35 = vld [vmem:[%s9463_s7 + $0x564] ss:$8 sps:$4 sm:$0xff]  }
 0x4a5   : > { %5148 = vmatprep.mubr.bf16.mxu1 %v4530_v38  ;;  %v7699_v36 = vld [vmem:[%s9463_s7 + $0x560] ss:$8 sps:$4 sm:$0xff]   ;;  %v7702_v38 = vld [vmem:[%s9463_s7 + $0x570] ss:$8 sps:$4 sm:$0xff]   ;;  %v7755_v34 = vld [vmem:[%s9463_s7 + $0x684] ss:$8 sps:$4 sm:$0xff]  }
 0x4a6   : > { %5149 = vmatmul.mubr.bf16.vlgmr.msra.gmra.mrb[12].mxu1 %v4529_v40  ;;  %v7705_v40 = vld [vmem:[%s9463_s7 + $0x580] ss:$8 sps:$4 sm:$0xff]  }
 0x4a7   : > { %5160 = vmatpush1.bf16.msra.mxu1 %v7633_v37  ;;  %5191 = vmatprep.mubr.bf16.mxu1 %v4512_v22  ;;  %v7686_v22 = vld [vmem:[%s9463_s7 + $0x514] ss:$8 sps:$4 sm:$0xff]  }
 0x4a8   : > { %5161 = vmatprep.subr.bf16.mxu1 %v7638_v39  ;;  %v7704_v37 = vld [vmem:[%s9463_s7 + $0x574] ss:$8 sps:$4 sm:$0xff]   ;;  %v7707_v39 = vld [vmem:[%s9463_s7 + $0x584] ss:$8 sps:$4 sm:$0xff]  }
 0x4ab   : > { %5162 = vmatpush1.bf16.msra.mxu1 %v7636_v47  ;;  %v7713_v47 = vld [vmem:[%s9463_s7 + $0x5a4] ss:$8 sps:$4 sm:$0xff]  }
 0x4ac   : > { %5163 = vmatprep.subr.bf16.mxu1 %v7641_v26  ;;  %v7716_v26 = vld [vmem:[%s9463_s7 + $0x5b4] ss:$8 sps:$4 sm:$0xff]  }
 0x4af   : > { %5164 = vmatpush1.bf16.msra.mxu1 %v7639_v50  ;;  %v7717_v50 = vld [vmem:[%s9463_s7 + $0x5c0] ss:$8 sps:$4 sm:$0xff]  }
 0x4b0   : > { %5165 = vmatprep.subr.bf16.mxu1 %v7644_v28  ;;  %v7722_v28 = vld [vmem:[%s9463_s7 + $0x5d4] ss:$8 sps:$4 sm:$0xff]  }
 0x4b3   : > { %5166 = vmatpush1.bf16.msra.mxu1 %v7642_v3  ;;  %v7723_v3 = vld [vmem:[%s9463_s7 + $0x5e0] ss:$8 sps:$4 sm:$0xff]  }
 0x4b4   : > { %5167 = vmatprep.subr.bf16.mxu1 %v7647_v46  ;;  %v7728_v46 = vld [vmem:[%s9463_s7 + $0x5f4] ss:$8 sps:$4 sm:$0xff]  }
 0x4b7   : > { %5168 = vmatpush1.bf16.msra.mxu1 %v7645_v55  ;;  %v7749_v55 = vld [vmem:[%s9463_s7 + $0x664] ss:$8 sps:$4 sm:$0xff]  }
 0x4b8   : > { %5169 = vmatprep.subr.bf16.mxu1 %v7650_v57  ;;  %v7747_v57 = vld [vmem:[%s9463_s7 + $0x660] ss:$8 sps:$4 sm:$0xff]   ;;  %5890 = vmatprep.subr.bf16.mxu0 %v7749_v55 }
 0x4b9   : > { %5891 = vmatpush1.bf16.msra.mxu0 %v7747_v57 }
 0x4ba   : > { %5892 = vmatprep.subr.bf16.mxu0 %v7752_v58 }
 0x4bb   : > { %5170 = vmatpush1.bf16.msra.mxu1 %v7648_v60  ;;  %v7753_v60 = vld [vmem:[%s9463_s7 + $0x680] ss:$8 sps:$4 sm:$0xff]  }
 0x4bc   : > { %5171 = vmatprep.subr.bf16.mxu1 %v7653_v61  ;;  %v7758_v61 = vld [vmem:[%s9463_s7 + $0x694] ss:$8 sps:$4 sm:$0xff]  }
 0x4bd   : > { %5893 = vmatpush1.bf16.msra.mxu0 %v7750_v59 }
 0x4be   : > { %5894 = vmatprep.subr.bf16.mxu0 %v7755_v34 }
 0x4bf   : > { %5172 = vmatpush1.bf16.msra.mxu1 %v7651_v0  ;;  %v7761_v0 = vld [vmem:[%s9463_s7 + $0x6a4] ss:$8 sps:$4 sm:$0xff]  }
 0x4c0   : > { %5173 = vmatprep.subr.bf16.mxu1 %v7656_v1  ;;  %v7759_v1 = vld [vmem:[%s9463_s7 + $0x6a0] ss:$8 sps:$4 sm:$0xff]  }
 0x4c1   : > { %5895 = vmatpush1.bf16.msra.mxu0 %v7753_v60 }
 0x4c2   : > { %5896 = vmatprep.subr.bf16.mxu0 %v7758_v61 }
 0x4c3   : > { %5174 = vmatpush1.bf16.msra.mxu1 %v7654_v2  ;;  %v7764_v2 = vld [vmem:[%s9463_s7 + $0x6b4] ss:$8 sps:$4 sm:$0xff]  }
 0x4c4   : > { %5175 = vmatprep.subr.bf16.mxu1 %v7659_v32  ;;  %v7762_v32 = vld [vmem:[%s9463_s7 + $0x6b0] ss:$8 sps:$4 sm:$0xff]  }
 0x4c5   : > { %5897 = vmatpush1.bf16.msra.mxu0 %v7756_v63  ;;  %v7777_v63 = vld [vmem:[%s9463_s7 + $0x700] ss:$8 sps:$4 sm:$0xff]  }
 0x4c6   : > { %5898 = vmatprep.subr.bf16.mxu0 %v7761_v0 }
 0x4c7   : > { %5176 = vmatpush1.bf16.msra.mxu1 %v7657_v48  ;;  %v7767_v48 = vld [vmem:[%s9463_s7 + $0x6c4] ss:$8 sps:$4 sm:$0xff]  }
 0x4c8   : > { %5177 = vmatprep.subr.bf16.mxu1 %v7662_v17  ;;  %v7765_v17 = vld [vmem:[%s9463_s7 + $0x6c0] ss:$8 sps:$4 sm:$0xff]  }
 0x4c9   : > { %5899 = vmatpush1.bf16.msra.mxu0 %v7759_v1  ;;  %v7782_v1 = vld [vmem:[%s9463_s7 + $0x714] ss:$8 sps:$4 sm:$0xff]  }
 0x4ca   : > { %5900 = vmatprep.subr.bf16.mxu0 %v7764_v2 }
 0x4cb   : > { %5178 = vmatpush1.bf16.msra.mxu1 %v7660_v45  ;;  %v7770_v45 = vld [vmem:[%s9463_s7 + $0x6d4] ss:$8 sps:$4 sm:$0xff]  }
 0x4cc   : > { %5179 = vmatprep.subr.bf16.mxu1 %v7665_v5  ;;  %v7768_v5 = vld [vmem:[%s9463_s7 + $0x6d0] ss:$8 sps:$4 sm:$0xff]  }
 0x4cd   : > { %5901 = vmatpush1.bf16.msra.mxu0 %v7762_v32  ;;  %v7780_v32 = vld [vmem:[%s9463_s7 + $0x710] ss:$8 sps:$4 sm:$0xff]  }
 0x4ce   : > { %5902 = vmatprep.subr.bf16.mxu0 %v7767_v48  ;;  %v7785_v48 = vld [vmem:[%s9463_s7 + $0x724] ss:$8 sps:$4 sm:$0xff]  }
 0x4cf   : > { %5180 = vmatpush1.bf16.msra.mxu1 %v7663_v6  ;;  %v7773_v6 = vld [vmem:[%s9463_s7 + $0x6e4] ss:$8 sps:$4 sm:$0xff]  }
 0x4d0   : > { %5181 = vmatprep.subr.bf16.mxu1 %v7668_v24  ;;  %v7771_v24 = vld [vmem:[%s9463_s7 + $0x6e0] ss:$8 sps:$4 sm:$0xff]  }
 0x4d1   : > { %5903 = vmatpush1.bf16.msra.mxu0 %v7765_v17  ;;  %v7783_v17 = vld [vmem:[%s9463_s7 + $0x720] ss:$8 sps:$4 sm:$0xff]  }
 0x4d2   : > { %5904 = vmatprep.subr.bf16.mxu0 %v7770_v45  ;;  %v7786_v45 = vld [vmem:[%s9463_s7 + $0x730] ss:$8 sps:$4 sm:$0xff]  }
 0x4d3   : > { %5182 = vmatpush1.bf16.msra.mxu1 %v7666_v30  ;;  %v7776_v30 = vld [vmem:[%s9463_s7 + $0x6f4] ss:$8 sps:$4 sm:$0xff]  }
 0x4d4   : > { %5183 = vmatprep.subr.bf16.mxu1 %v7671_v8  ;;  %v7774_v8 = vld [vmem:[%s9463_s7 + $0x6f0] ss:$8 sps:$4 sm:$0xff]  }
 0x4d5   : > { %5905 = vmatpush1.bf16.msra.mxu0 %v7768_v5  ;;  %v7791_v5 = vld [vmem:[%s9463_s7 + $0x744] ss:$8 sps:$4 sm:$0xff]  }
 0x4d6   : > { %5906 = vmatprep.subr.bf16.mxu0 %v7773_v6  ;;  %v7789_v6 = vld [vmem:[%s9463_s7 + $0x740] ss:$8 sps:$4 sm:$0xff]  }
 0x4d7   : > { %5184 = vmatpush1.bf16.msra.mxu1 %v7669_v9  ;;  %v7779_v9 = vld [vmem:[%s9463_s7 + $0x704] ss:$8 sps:$4 sm:$0xff]  }
 0x4d8   : > { %5185 = vmatprep.subr.bf16.mxu1 %v7674_v10  ;;  %v1260_v10 = vsub.s32 4, %v8362_v25 }
 0x4d9   : > { %5907 = vmatpush1.bf16.msra.mxu0 %v7771_v24  ;;  %v7794_v24 = vld [vmem:[%s9463_s7 + $0x754] ss:$8 sps:$4 sm:$0xff]  }
 0x4da   : > { %5908 = vmatprep.subr.bf16.mxu0 %v7776_v30  ;;  %v7792_v30 = vld [vmem:[%s9463_s7 + $0x750] ss:$8 sps:$4 sm:$0xff]  }
 0x4db   : > { %5186 = vmatpush1.bf16.msra.mxu1 %v7672_v11  ;;  %v1264_v11 = vsub.s32 5, %v8362_v25 }
 0x4dc   : > { %5187 = vmatprep.subr.bf16.mxu1 %v7677_v12  ;;  %v9200_v12 = vld [vmem:[%s8532_s16] sm:$0xff]  ;;  %s7168_s16 = sshll.u32 (%p9492_p3), %s8085_s29, 2 }
 0x4dd   : > { %5909 = vmatpush1.bf16.msra.mxu0 %v7774_v8  ;;  %v7797_v8 = vld [vmem:[%s9463_s7 + $0x764] ss:$8 sps:$4 sm:$0xff]   ;;  %s6049_s14 = sadd.s32 (%p9492_p3), %s7169_s4, %s7168_s16 }
 0x4de   : > { %5921 = vmatprep.subr.bf16.mxu0 %v7779_v9  ;;  %v7795_v9 = vld [vmem:[%s9463_s7 + $0x760] ss:$8 sps:$4 sm:$0xff]   ;;  %s7170_s17 = sshll.u32 (%p9492_p3), %s6049_s14, 3 }
 0x4df   : > { %5188 = vmatpush1.bf16.msra.mxu1 %v7675_v13  ;;  %v1261_v13 = vrot.slane %v9200_v12, %v1260_v10  ;;  %v7800_v10 = vld [vmem:[%s9463_s7 + $0x774] ss:$8 sps:$4 sm:$0xff]   ;;  %s6051_s10 = scalar_lea.vmem (%p9492_p3), %s9464_s8, %s7170_s17 }
 0x4e0   : > { %5189 = vmatprep.subr.bf16.mxu1 %v7680_v15  ;;  %v1265_v15 = vrot.slane %v9200_v12, %v1264_v11  ;;  %v7798_v11 = vld [vmem:[%s9463_s7 + $0x770] ss:$8 sps:$4 sm:$0xff]  }
 0x4e3   : > { %5190 = vmatpush1.bf16.msra.mxu1 %v7678_v18 }
 0x4e4   : > { %5202 = vmatprep.subr.bf16.mxu1 %v7683_v52 }
 0x4e6   : > { %5192 = vmatmul.mubr.bf16.vlgmr.msra.gmra.mrb[12].mxu1 %v8889_v21  ;;  %v7687_v21 = vld [vmem:[%s9463_s7 + $0x520] ss:$8 sps:$4 sm:$0xff]  }
 0x4e7   : > { %5203 = vmatpush1.bf16.msra.mxu1 %v7681_v20  ;;  %5234 = vmatprep.mubr.bf16.mxu1 %v4538_v23 }
 0x4e8   : > { %5204 = vmatprep.subr.bf16.mxu1 %v7686_v22 }
 0x4eb   : > { %5205 = vmatpush1.bf16.msra.mxu1 %v7684_v27 }
 0x4ec   : > { %5206 = vmatprep.subr.bf16.mxu1 %v7689_v29 }
 0x4ef   : > { %5207 = vmatpush1.bf16.msra.mxu1 %v7687_v21 }
 0x4f0   : > { %5208 = vmatprep.subr.bf16.mxu1 %v7692_v16 }
 0x4f3   : > { %5209 = vmatpush1.bf16.msra.mxu1 %v7690_v19 }
 0x4f4   : > { %5210 = vmatprep.subr.bf16.mxu1 %v7695_v4 }
 0x4f7   : > { %5211 = vmatpush1.bf16.msra.mxu1 %v7693_v56 }
 0x4f8   : > { %5212 = vmatprep.subr.bf16.mxu1 %v7698_v31 }
 0x4fb   : > { %5213 = vmatpush1.bf16.msra.mxu1 %v7696_v33 }
 0x4fc   : > { %5214 = vmatprep.subr.bf16.mxu1 %v7701_v35 }
 0x4ff   : > { %5215 = vmatpush1.bf16.msra.mxu1 %v7699_v36 }
 0x500   : > { %5216 = vmatprep.subr.bf16.mxu1 %v7704_v37 }
 0x503   : > { %5217 = vmatpush1.bf16.msra.mxu1 %v7702_v38 }
 0x504   : > { %5218 = vmatprep.subr.bf16.mxu1 %v7707_v39 }
 0x507   : > { %5219 = vmatpush1.bf16.msra.mxu1 %v7705_v40 }
 0x508   : > { %5220 = vmatprep.subr.bf16.mxu1 %v7710_v41 }
 0x50b   : > { %5221 = vmatpush1.bf16.msra.mxu1 %v7708_v42 }
 0x50c   : > { %5222 = vmatprep.subr.bf16.mxu1 %v7713_v47 }
 0x50f   : > { %5223 = vmatpush1.bf16.msra.mxu1 %v7711_v49 }
 0x510   : > { %5224 = vmatprep.subr.bf16.mxu1 %v7716_v26 }
 0x513   : > { %5225 = vmatpush1.bf16.msra.mxu1 %v7714_v7 }
 0x514   : > { %5226 = vmatprep.subr.bf16.mxu1 %v7719_v43 }
 0x517   : > { %5227 = vmatpush1.bf16.msra.mxu1 %v7717_v50 }
 0x518   : > { %5228 = vmatprep.subr.bf16.mxu1 %v7722_v28 }
 0x51b   : > { %5229 = vmatpush1.bf16.msra.mxu1 %v7720_v51 }
 0x51c   : > { %5230 = vmatprep.subr.bf16.mxu1 %v7725_v53 }
 0x51f   : > { %5231 = vmatpush1.bf16.msra.mxu1 %v7723_v3 }
 0x520   : > { %5232 = vmatprep.subr.bf16.mxu1 %v7728_v46 }
 0x523   : > { %5233 = vmatpush1.bf16.msra.mxu1 %v7726_v54 }
 0x526   : > { %5235 = vmatmul.mubr.bf16.vlgmr.msra.gmra.mrb[12].mxu1 %v4537_v44 }
 0x5f9   : > { %v5236_v18 = vpop.f32.mrb[12].mxu1 }
 0x5fa   : > { %v7195_v52 = vadd.f32 %v5236_v18, %v1261_v13  ;;  %v5238_v20 = vpop.f32.mrb[13].mxu1  ;;  %v7806_v18 = vld [vmem:[%s9463_s7 + $0x794] ss:$8 sps:$4 sm:$0xff]  }
 0x5fb   : > { %v7196_v22 = vadd.f32 %v5238_v20, %v1265_v15  ;;  %v5240_v23 = vpop.f32.mrb[14].mxu1  ;;  %v7809_v20 = vld [vmem:[%s9463_s7 + $0x7a4] ss:$8 sps:$4 sm:$0xff]  }
 0x5fc   : > { %v6963_v27 = vmul.f32 -1.442695, %v7195_v52  ;;  %v7197_v29 = vadd.f32 %v5240_v23, %v1261_v13  ;;  %v5242_v21 = vpop.f32.mrb[15].mxu1  ;;  %v7803_v13 = vld [vmem:[%s9463_s7 + $0x784] ss:$8 sps:$4 sm:$0xff]  }
 0x5fd   : > { %v6964_v16 = vmul.f32 -1.442695, %v7196_v22  ;;  %v7198_v19 = vadd.f32 %v5242_v21, %v1265_v15  ;;  %v7801_v15 = vld [vmem:[%s9463_s7 + $0x780] ss:$8 sps:$4 sm:$0xff]   ;;  %v7812_v23 = vld [vmem:[%s9463_s7 + $0x7b4] ss:$8 sps:$4 sm:$0xff]  }
 0x5fe   : > { %7905 = vpow2.f32 %v6963_v27  ;;  %v6965_v4 = vmul.f32 -1.442695, %v7197_v29  ;;  %v7810_v27 = vld [vmem:[%s9463_s7 + $0x7b0] ss:$8 sps:$4 sm:$0xff]   ;;  %v7813_v21 = vld [vmem:[%s9463_s7 + $0x7c0] ss:$8 sps:$4 sm:$0xff]  }
 0x5ff   : > { %7907 = vpow2.f32 %v6964_v16  ;;  %v6966_v56 = vmul.f32 -1.442695, %v7198_v19  ;;  %v7818_v16 = vld [vmem:[%s9463_s7 + $0x7d4] ss:$8 sps:$4 sm:$0xff]  }
 0x600   : > { %7909 = vpow2.f32 %v6965_v4  ;;  %v7821_v4 = vld [vmem:[%s9463_s7 + $0x7e4] ss:$8 sps:$4 sm:$0xff]  }
 0x601   : > { %7911 = vpow2.f32 %v6966_v56  ;;  %v7819_v56 = vld [vmem:[%s9463_s7 + $0x7e0] ss:$8 sps:$4 sm:$0xff]  }
 0x608   : > { %v7906_v31 = vpop.eup %7905 }
 0x609   : > { %v7908_v33 = vpop.eup %7907  ;;  %v5257_v35 = vadd.f32 1.0, %v7906_v31  ;;  %v7824_v31 = vld [vmem:[%s9463_s7 + $0x7f4] ss:$8 sps:$4 sm:$0xff]  }
 0x60a   : > { %v7910_v36 = vpop.eup %7909  ;;  %v5258_v37 = vadd.f32 1.0, %v7908_v33  ;;  %v7822_v33 = vld [vmem:[%s9463_s7 + $0x7f0] ss:$8 sps:$4 sm:$0xff]  }
 0x60b   : > { %v7912_v38 = vpop.eup %7911  ;;  %7913 = vrcp.f32 %v5257_v35  ;;  %v5259_v39 = vadd.f32 1.0, %v7910_v36  ;;  %v7827_v35 = vld [vmem:[%s9463_s7 + $0x804] ss:$8 sps:$4 sm:$0xff]   ;;  %v7825_v36 = vld [vmem:[%s9463_s7 + $0x800] ss:$8 sps:$4 sm:$0xff]  }
 0x60c   : > { %7915 = vrcp.f32 %v5258_v37  ;;  %v5260_v40 = vadd.f32 1.0, %v7912_v38  ;;  %v7830_v37 = vld [vmem:[%s9463_s7 + $0x814] ss:$8 sps:$4 sm:$0xff]  }
 0x60d   : > { %7917 = vrcp.f32 %v5259_v39  ;;  %v7828_v39 = vld [vmem:[%s9463_s7 + $0x810] ss:$8 sps:$4 sm:$0xff]  }
 0x60e   : > { %7919 = vrcp.f32 %v5260_v40  ;;  %v7833_v40 = vld [vmem:[%s9463_s7 + $0x824] ss:$8 sps:$4 sm:$0xff]  }
 0x615   : > { %v7914_v41 = vpop.eup %7913 }
 0x616   : > { %v7916_v42 = vpop.eup %7915  ;;  %v5269_v26 = vmul.f32 %v7914_v41, %v7195_v52  ;;  %v7804_v52 = vld [vmem:[%s9463_s7 + $0x790] ss:$8 sps:$4 sm:$0xff]   ;;  %v7831_v41 = vld [vmem:[%s9463_s7 + $0x820] ss:$8 sps:$4 sm:$0xff]  }
 0x617   : > { %v7918_v47 = vpop.eup %7917  ;;  %v5270_v43 = vmul.f32 %v7916_v42, %v7196_v22  ;;  %v7807_v22 = vld [vmem:[%s9463_s7 + $0x7a0] ss:$8 sps:$4 sm:$0xff]   ;;  %v7836_v42 = vld [vmem:[%s9463_s7 + $0x834] ss:$8 sps:$4 sm:$0xff]  }
 0x618   : > { %v7920_v49 = vpop.eup %7919  ;;  %v5271_v7 = vmul.f32 %v7918_v47, %v7197_v29  ;;  %v7815_v29 = vld [vmem:[%s9463_s7 + $0x7c4] ss:$8 sps:$4 sm:$0xff]   ;;  %v7834_v47 = vld [vmem:[%s9463_s7 + $0x830] ss:$8 sps:$4 sm:$0xff]  }
 0x619   : > { %v5272_v50 = vmul.f32 %v7920_v49, %v7198_v19  ;;  %v7816_v19 = vld [vmem:[%s9463_s7 + $0x7d0] ss:$8 sps:$4 sm:$0xff]   ;;  %v7839_v49 = vld [vmem:[%s9463_s7 + $0x844] ss:$8 sps:$4 sm:$0xff]  }
 0x61a   : > { %v9204_v28 = vpack.c.bf16 %v5271_v7, %v5269_v26  ;;  %v7837_v26 = vld [vmem:[%s9463_s7 + $0x840] ss:$8 sps:$4 sm:$0xff]   ;;  %v7842_v7 = vld [vmem:[%s9463_s7 + $0x854] ss:$8 sps:$4 sm:$0xff]  }
 0x61b   : > { %v5274_v51 = vpack.c.bf16 %v5272_v50, %v5270_v43  ;;  %v7840_v43 = vld [vmem:[%s9463_s7 + $0x850] ss:$8 sps:$4 sm:$0xff]   ;;  %v7845_v50 = vld [vmem:[%s9463_s7 + $0x864] ss:$8 sps:$4 sm:$0xff]  }
 0x61c   : > { %v5276_v53 = vshrl.u32 %v9204_v28, 16  ;;  %v5279_v3 = vshll.u32 %v9204_v28, 16 }
 0x61d   : > { %v5283_v46 = vshrl.u32 %v5274_v51, 16  ;;  %v5286_v54 = vshll.u32 %v5274_v51, 16 }
 0x61e   : > { %v5278_v44 = vrot.slane %v5276_v53, 7  ;;  %v5293_v55 = vrot.slane %v5279_v3, 1 }
 0x61f   : > { %v5285_v57 = vrot.slane %v5283_v46, 7  ;;  %v5295_v58 = vrot.slane %v5286_v54, 1 }
 0x620   : > { %v5281_v59 = vor.u32 %v5279_v3, %v5278_v44  ;;  %v9208_v34 = vor.u32 %v5293_v55, %v5276_v53  ;;  %v7846_v53 = vld [vmem:[%s9463_s7 + $0x870] ss:$8 sps:$4 sm:$0xff]   ;;  %v7851_v3 = vld [vmem:[%s9463_s7 + $0x884] ss:$8 sps:$4 sm:$0xff]  }
 0x621   : > { %v5288_v60 = vor.u32 %v5286_v54, %v5285_v57  ;;  %v9210_v61 = vor.u32 %v5295_v58, %v5283_v46  ;;  %v7849_v46 = vld [vmem:[%s9463_s7 + $0x880] ss:$8 sps:$4 sm:$0xff]   ;;  %v7854_v54 = vld [vmem:[%s9463_s7 + $0x894] ss:$8 sps:$4 sm:$0xff]   ;;  %v7852_v44 = vld [vmem:[%s9463_s7 + $0x890] ss:$8 sps:$4 sm:$0xff]  }
 0x622   : > { %v5291_v2 = vsel %vm8348_vm5, 0, %v5281_v59  ;;  %v7857_v55 = vld [vmem:[%s9463_s7 + $0x8a4] ss:$8 sps:$4 sm:$0xff]   ;;  %v7855_v57 = vld [vmem:[%s9463_s7 + $0x8a0] ss:$8 sps:$4 sm:$0xff]  }
 0x623   : > { %v5292_v0 = vsel %vm8348_vm5, 0, %v5288_v60  ;;  %v5300_v38 = vsel %vm8342_vm2, %v9210_v61, 0  ;;  %v7860_v58 = vld [vmem:[%s9463_s7 + $0x8b4] ss:$8 sps:$4 sm:$0xff]   ;;  %v7858_v59 = vld [vmem:[%s9463_s7 + $0x8b0] ss:$8 sps:$4 sm:$0xff]  }
 0x624   : > { %5910 = vmatprep.mubr.bf16.mxu0 %v5292_v0  ;;  %v7863_v60 = vld [vmem:[%s9463_s7 + $0x8c4] ss:$8 sps:$4 sm:$0xff]   ;;  %v7861_v61 = vld [vmem:[%s9463_s7 + $0x8c0] ss:$8 sps:$4 sm:$0xff]   ;;  %v7864_v0 = vld [vmem:[%s9463_s7 + $0x8d0] ss:$8 sps:$4 sm:$0xff]  }
 0x625   : > { %5911 = vmatmul.mubr.bf16.vlgmr.msra.gmra.mrb[8].mxu0 %v5291_v2  ;;  %v7867_v2 = vld [vmem:[%s9463_s7 + $0x8e0] ss:$8 sps:$4 sm:$0xff]  }
 0x626   : > { %5922 = vmatpush1.bf16.msra.mxu0 %v7777_v63  ;;  %5953 = vmatprep.mubr.bf16.mxu0 %v5274_v51  ;;  %v7848_v51 = vld [vmem:[%s9463_s7 + $0x874] ss:$8 sps:$4 sm:$0xff]  }
 0x627   : > { %5923 = vmatprep.subr.bf16.mxu0 %v7782_v1  ;;  %v7866_v63 = vld [vmem:[%s9463_s7 + $0x8d4] ss:$8 sps:$4 sm:$0xff]   ;;  %v7869_v1 = vld [vmem:[%s9463_s7 + $0x8e4] ss:$8 sps:$4 sm:$0xff]  }
 0x62a   : > { %5924 = vmatpush1.bf16.msra.mxu0 %v7780_v32  ;;  %v7872_v32 = vld [vmem:[%s9463_s7 + $0x8f4] ss:$8 sps:$4 sm:$0xff]  }
 0x62b   : > { %5925 = vmatprep.subr.bf16.mxu0 %v7785_v48  ;;  %v7870_v48 = vld [vmem:[%s9463_s7 + $0x8f0] ss:$8 sps:$4 sm:$0xff]  }
 0x62e   : > { %5926 = vmatpush1.bf16.msra.mxu0 %v7783_v17  ;;  %v5299_v17 = vsel %vm8342_vm2, %v9208_v34, 0 }
 0x62f   : > { %5927 = vmatprep.subr.bf16.mxu0 %v7788_v14  ;;  %v1268_v14 = vsub.s32 6, %v8362_v25 }
 0x632   : > { %5928 = vmatpush1.bf16.msra.mxu0 %v7786_v45  ;;  %v1272_v45 = vsub.s32 7, %v8362_v25 }
 0x633   : > { %5929 = vmatprep.subr.bf16.mxu0 %v7791_v5  ;;  %v1269_v5 = vrot.slane %v9200_v12, %v1268_v14 }
 0x636   : > { %5930 = vmatpush1.bf16.msra.mxu0 %v7789_v6  ;;  %v1273_v6 = vrot.slane %v9200_v12, %v1272_v45 }
 0x637   : > { %5931 = vmatprep.subr.bf16.mxu0 %v7794_v24 }
 0x63a   : > { %5932 = vmatpush1.bf16.msra.mxu0 %v7792_v30 }
 0x63b   : > { %5933 = vmatprep.subr.bf16.mxu0 %v7797_v8 }
 0x63e   : > { %5934 = vmatpush1.bf16.msra.mxu0 %v7795_v9 }
 0x63f   : > { %5935 = vmatprep.subr.bf16.mxu0 %v7800_v10 }
 0x642   : > { %5936 = vmatpush1.bf16.msra.mxu0 %v7798_v11 }
 0x643   : > { %5937 = vmatprep.subr.bf16.mxu0 %v7803_v13 }
 0x646   : > { %5938 = vmatpush1.bf16.msra.mxu0 %v7801_v15 }
 0x647   : > { %5939 = vmatprep.subr.bf16.mxu0 %v7806_v18 }
 0x64a   : > { %5940 = vmatpush1.bf16.msra.mxu0 %v7804_v52 }
 0x64b   : > { %5941 = vmatprep.subr.bf16.mxu0 %v7809_v20 }
 0x64e   : > { %5942 = vmatpush1.bf16.msra.mxu0 %v7807_v22 }
 0x64f   : > { %5943 = vmatprep.subr.bf16.mxu0 %v7812_v23 }
 0x652   : > { %5944 = vmatpush1.bf16.msra.mxu0 %v7810_v27 }
 0x653   : > { %5945 = vmatprep.subr.bf16.mxu0 %v7815_v29 }
 0x656   : > { %5946 = vmatpush1.bf16.msra.mxu0 %v7813_v21 }
 0x657   : > { %5947 = vmatprep.subr.bf16.mxu0 %v7818_v16 }
 0x65a   : > { %5948 = vmatpush1.bf16.msra.mxu0 %v7816_v19 }
 0x65b   : > { %5949 = vmatprep.subr.bf16.mxu0 %v7821_v4 }
 0x65e   : > { %5950 = vmatpush1.bf16.msra.mxu0 %v7819_v56 }
 0x65f   : > { %5951 = vmatprep.subr.bf16.mxu0 %v7824_v31 }
 0x662   : > { %5952 = vmatpush1.bf16.msra.mxu0 %v7822_v33 }
 0x663   : > { %5964 = vmatprep.subr.bf16.mxu0 %v7827_v35 }
 0x665   : > { %5954 = vmatmul.mubr.bf16.vlgmr.msra.gmra.mrb[8].mxu0 %v9204_v28  ;;  %v7843_v28 = vld [vmem:[%s9463_s7 + $0x860] ss:$8 sps:$4 sm:$0xff]  }
 0x666   : > { %5965 = vmatpush1.bf16.msra.mxu0 %v7825_v36  ;;  %5996 = vmatprep.mubr.bf16.mxu0 %v5300_v38  ;;  %v6066_v38 = vld [vmem:[%s8884_s18 + $0x8] sm:$0xff] (%p9492_p3) }
 0x667   : > { %5966 = vmatprep.subr.bf16.mxu0 %v7830_v37  ;;  %v6064_v37 = vld [vmem:[%s8884_s18] sm:$0xff] (%p9492_p3)  ;;  %6067 = vst [vmem:[%s6051_s10 + $0x8] sm:$0xff] (%p9492_p3), %v6066_v38 }
 0x668   : > { %6065 = vst [vmem:[%s6051_s10] sm:$0xff] (%p9492_p3), %v6064_v37 }
 0x66a   : > { %5967 = vmatpush1.bf16.msra.mxu0 %v7828_v39  ;;  %v6068_v39 = vld [vmem:[%s8884_s18 + $0x10] sm:$0xff] (%p9492_p3) }
 0x66b   : > { %5968 = vmatprep.subr.bf16.mxu0 %v7833_v40  ;;  %v6070_v40 = vld [vmem:[%s8884_s18 + $0x18] sm:$0xff] (%p9492_p3)  ;;  %6069 = vst [vmem:[%s6051_s10 + $0x10] sm:$0xff] (%p9492_p3), %v6068_v39 }
 0x66c   : > { %6071 = vst [vmem:[%s6051_s10 + $0x18] sm:$0xff] (%p9492_p3), %v6070_v40 }
 0x66e   : > { %5969 = vmatpush1.bf16.msra.mxu0 %v7831_v41 }
 0x66f   : > { %5970 = vmatprep.subr.bf16.mxu0 %v7836_v42 }
 0x672   : > { %5971 = vmatpush1.bf16.msra.mxu0 %v7834_v47 }
 0x673   : > { %5972 = vmatprep.subr.bf16.mxu0 %v7839_v49 }
 0x676   : > { %5973 = vmatpush1.bf16.msra.mxu0 %v7837_v26 }
 0x677   : > { %5974 = vmatprep.subr.bf16.mxu0 %v7842_v7 }
 0x67a   : > { %5975 = vmatpush1.bf16.msra.mxu0 %v7840_v43 }
 0x67b   : > { %5976 = vmatprep.subr.bf16.mxu0 %v7845_v50 }
 0x67e   : > { %5977 = vmatpush1.bf16.msra.mxu0 %v7843_v28 }
 0x67f   : > { %5978 = vmatprep.subr.bf16.mxu0 %v7848_v51 }
 0x682   : > { %5979 = vmatpush1.bf16.msra.mxu0 %v7846_v53 }
 0x683   : > { %5980 = vmatprep.subr.bf16.mxu0 %v7851_v3 }
 0x686   : > { %5981 = vmatpush1.bf16.msra.mxu0 %v7849_v46 }
 0x687   : > { %5982 = vmatprep.subr.bf16.mxu0 %v7854_v54 }
 0x68a   : > { %5983 = vmatpush1.bf16.msra.mxu0 %v7852_v44 }
 0x68b   : > { %5984 = vmatprep.subr.bf16.mxu0 %v7857_v55 }
 0x68e   : > { %5985 = vmatpush1.bf16.msra.mxu0 %v7855_v57 }
 0x68f   : > { %5986 = vmatprep.subr.bf16.mxu0 %v7860_v58 }
 0x692   : > { %5987 = vmatpush1.bf16.msra.mxu0 %v7858_v59 }
 0x693   : > { %5988 = vmatprep.subr.bf16.mxu0 %v7863_v60 }
 0x696   : > { %5989 = vmatpush1.bf16.msra.mxu0 %v7861_v61 }
 0x697   : > { %5990 = vmatprep.subr.bf16.mxu0 %v7866_v63 }
 0x69a   : > { %5991 = vmatpush1.bf16.msra.mxu0 %v7864_v0 }
 0x69b   : > { %5992 = vmatprep.subr.bf16.mxu0 %v7869_v1 }
 0x69e   : > { %5993 = vmatpush1.bf16.msra.mxu0 %v7867_v2 }
 0x69f   : > { %5994 = vmatprep.subr.bf16.mxu0 %v7872_v32 }
 0x6a2   : > { %5995 = vmatpush1.bf16.msra.mxu0 %v7870_v48 }
 0x6a5   : > { %5997 = vmatmul.mubr.bf16.vlgmr.msra.gmra.mrb[8].mxu0 %v5299_v17 }
 0x778   : > { %v5998_v24 = vpop.f32.mrb[8].mxu0 }
 0x779   : > { %v7199_v30 = vadd.f32 %v5998_v24, %v1269_v5  ;;  %v6000_v8 = vpop.f32.mrb[9].mxu0 }
 0x77a   : > { %v7200_v9 = vadd.f32 %v6000_v8, %v1273_v6  ;;  %v6002_v10 = vpop.f32.mrb[10].mxu0 }
 0x77b   : > { %v7159_v11 = vmul.f32 -1.442695, %v7199_v30  ;;  %v7201_v13 = vadd.f32 %v6002_v10, %v1269_v5  ;;  %v6004_v15 = vpop.f32.mrb[11].mxu0 }
 0x77c   : > { %v7160_v18 = vmul.f32 -1.442695, %v7200_v9  ;;  %v7202_v62 = vadd.f32 %v6004_v15, %v1273_v6 }
 0x77d   : > { %7921 = vpow2.f32 %v7159_v11  ;;  %v7161_v34 = vmul.f32 -1.442695, %v7201_v13 }
 0x77e   : > { %7923 = vpow2.f32 %v7160_v18  ;;  %v7162_v52 = vmul.f32 -1.442695, %v7202_v62 }
 0x77f   : > { %7925 = vpow2.f32 %v7161_v34 }
 0x780   : > { %7927 = vpow2.f32 %v7162_v52 }
 0x787   : > { %v7922_v25 = vpop.eup %7921 }
 0x788   : > { %v7924_v20 = vpop.eup %7923  ;;  %v6019_v22 = vadd.f32 1.0, %v7922_v25 }
 0x789   : > { %v7926_v12 = vpop.eup %7925  ;;  %v6020_v23 = vadd.f32 1.0, %v7924_v20 }
 0x78a   : > { %v7928_v27 = vpop.eup %7927  ;;  %7929 = vrcp.f32 %v6019_v22  ;;  %v6021_v29 = vadd.f32 1.0, %v7926_v12 }
 0x78b   : > { %7931 = vrcp.f32 %v6020_v23  ;;  %v6022_v21 = vadd.f32 1.0, %v7928_v27 }
 0x78c   : > { %7933 = vrcp.f32 %v6021_v29 }
 0x78d   : > { %7935 = vrcp.f32 %v6022_v21 }
 0x794   : > { %v7930_v16 = vpop.eup %7929  ;;  %6046 = sbr.rel (!%p9492_p3) target bundleno = 1955 (0x7a3), region = 72 }
 0x795   : > { %v7932_v19 = vpop.eup %7931  ;;  %v6031_v4 = vmul.f32 %v7930_v16, %v7199_v30 }
 0x796   : > { %v7934_v56 = vpop.eup %7933  ;;  %v6032_v31 = vmul.f32 %v7932_v19, %v7200_v9 }
 0x797   : > { %v7936_v33 = vpop.eup %7935  ;;  %7163 = vst [vmem:[%s8884_s18 + $0x20] sm:$0xff] %v6031_v4  ;;  %v6033_v35 = vmul.f32 %v7934_v56, %v7201_v13 }
 0x798   : > { %7164 = vst [vmem:[%s8884_s18 + $0x28] sm:$0xff] %v6032_v31  ;;  %v6034_v36 = vmul.f32 %v7936_v33, %v7202_v62 }
 0x799   : > { %7165 = vst [vmem:[%s8884_s18 + $0x30] sm:$0xff] %v6033_v35 }
 0x79a   : > { %7166 = vst [vmem:[%s8884_s18 + $0x38] sm:$0xff] %v6034_v36 }
 0x79e   : > { %v6072_v41 = vld [vmem:[%s8884_s18 + $0x20] sm:$0xff] }
 0x79f   : > { %v6074_v42 = vld [vmem:[%s8884_s18 + $0x28] sm:$0xff]  ;;  %6073 = vst [vmem:[%s6051_s10 + $0x40] sm:$0xff] %v6072_v41 }
 0x7a0   : > { %v6076_v47 = vld [vmem:[%s8884_s18 + $0x30] sm:$0xff]  ;;  %6075 = vst [vmem:[%s6051_s10 + $0x48] sm:$0xff] %v6074_v42 }
 0x7a1   : > { %v6078_v49 = vld [vmem:[%s8884_s18 + $0x38] sm:$0xff]  ;;  %6077 = vst [vmem:[%s6051_s10 + $0x50] sm:$0xff] %v6076_v47 }
 0x7a2   : > { %6079 = vst [vmem:[%s6051_s10 + $0x58] sm:$0xff] %v6078_v49 }
 0x7a3 PF: > { %s21_s11 = sadd.s32 1, %s8101_s11   ;;  %s9493_s29 = sld [smem:[#allocation17_spill]] }
 0x7a4   : > { %p18_p4 = scmp.ge.s32.totalorder %s21_s11, 6   ;;  %s9494_s30 = sld [smem:[#allocation13_spill]] }
 0x7a5   : > { %s9495_s18 = sld [smem:[#allocation14_spill]]  ;;  %s9496_s9 = sld [smem:[#allocation15_spill]] }
 0x7a6   : > { %s9497_s10 = sld [smem:[#allocation16_spill]]  ;;  %s9498_s27 = smov %s8081_s28 }
 0x7a7   :  { %20 = sbr.rel (!%p18_p4) target bundleno = 9 (0x9), region = 132 }
 0x7a9   : > { %s9499_s28 = smov %s9493_s29 }
 0x7aa   : > { %s9500_s29 = smov %s9494_s30 }
 0x7ab   : > { %s9501_s30 = smov %s9495_s18 }
 0x7ae   :  { %6095 = vsyncpa [#allocation3], 1 }
 0x7af   :  { %6097 = vsyncpa [#allocation3 + $0x1], 1 }
 0x7b0   :  { %6098 = vsyncpa [#allocation7], 1 }
 0x7b1   :  { %6099 = vsyncpa [#allocation4], 1 }
 0x7b2   :  { %6101 = vsyncpa [#allocation4 + $0x1], 1 }

</bundles_post_ra>
